<compile_context>
chip_gen: v7x
topology: tpu7x:2x2x1
jax: 0.10.0
libtpu: 0.0.40
codegen_flags: <defaults>
</compile_context>

<pallas_src>
import functools

import jax
import jax.numpy as jnp
from jax import lax
from jax.experimental import pallas as pl
from jax.experimental.pallas import tpu as pltpu

ATT_SCALE = 1.2   # moderate_attention 'stocastic' scale
TOP_P = 0.05      # p for top-k
RAND_P = 0.1      # fraction of random columns
LN_EPS = 1e-5     # nn.LayerNorm default eps
NEG_INF = -1e30   # finite "masked" fill (avoids NaN on fully-masked rows)
TOPK_ITERS = 30   # binary-search iterations for the k-th largest value

# Flipped to False (with a retry) if this jax build rejects pl.Buffered(1) on a
# top-level pallas_call BlockSpec.
_BUFFER_WEIGHTS = True


# ------------------------------------------------------------------
# Spec / compiler-param helpers
# ------------------------------------------------------------------

def _vmem_limit_bytes():
    """Per-generation scoped-VMEM limit (~100 MiB on v5e/v6e, ~48 MiB on v7x)."""
    try:
        cap = pltpu.get_tpu_info().vmem_capacity_bytes
    except Exception:
        cap = 64 * 1024 * 1024                       # conservative fallback
    return int(max(32 * 1024 * 1024,
                   min(cap - 16 * 1024 * 1024, 100 * 1024 * 1024)))


def _const_spec(shape):
    """BlockSpec for grid-invariant operands (weights / biases / LN / rand mask).

    The index_map is constant, so Buffered(1) keeps them single-buffered
    instead of pointlessly double-buffered (VMEM win, esp. on v7x's 64 MiB).
    """
    idx = lambda *_: (0,) * len(shape)
    if _BUFFER_WEIGHTS:
        return pl.BlockSpec(shape, idx, pipeline_mode=pl.Buffered(1))
    return pl.BlockSpec(shape, idx)


def _q_tile(length, cap=512):
    for t in (512, 256, 128, 64, 32, 16, 8):
        if t <= cap and t <= length and length % t == 0:
            return t
    return length


def _compiler_params(semantics):
    return pltpu.CompilerParams(dimension_semantics=semantics,
                                vmem_limit_bytes=_vmem_limit_bytes())


# ------------------------------------------------------------------
# In-kernel helpers (traced inside the Pallas kernels)
# ------------------------------------------------------------------

def _layernorm(x, g, b):
    mean = jnp.mean(x, axis=-1, keepdims=True)
    xc = x - mean
    var = jnp.mean(xc * xc, axis=-1, keepdims=True)
    return xc * lax.rsqrt(var + LN_EPS) * g + b


def _kth_largest_thresh(e, k_top):
    """Per-row value of the k_top-th largest entry of `e` via binary search.

    `e = exp(s - rowmax)` lies in [0, 1] with the row max exactly 1.0, so the
    threshold is bracketed by [0, 1]; ~30 halvings (one cross-lane count each)
    replace the previous O(k_top) unrolled cross-lane-max extraction.
    """
    rows = e.shape[0]
    lo = jnp.zeros((rows, 1), jnp.float32)
    hi = jnp.ones((rows, 1), jnp.float32)

    def body(_, carry):
        lo, hi = carry
        mid = 0.5 * (lo + hi)
        cnt = jnp.sum((e >= mid).astype(jnp.float32), axis=-1, keepdims=True)
        take = cnt >= k_top
        return jnp.where(take, mid, lo), jnp.where(take, hi, mid)

    lo, _ = lax.fori_loop(0, TOPK_ITERS, body, (lo, hi))
    return lo


def _attention_core(Q, K, V, mask, rand_sel, wl, bl, att_ref, *, heads, dk, k_top):
    """Per-head attention + 'stocastic' moderation; heads written into att_ref.

    Moderation works on the unnormalized e = exp(s - max): the top-k ordering
    and the final renormalization are invariant to the softmax denominator, so
    the first per-head normalization is skipped.  1/sqrt(dk) is pre-folded
    into Q.  All matmuls are bf16 operands with f32 accumulation (MXU-native).
    """
    Qb = Q.astype(jnp.bfloat16)
    Kb = K.astype(jnp.bfloat16)
    Vb = V.astype(jnp.bfloat16)
    for h in range(heads):                               # static, small body
        sl = slice(h * dk, (h + 1) * dk)
        s = lax.dot_general(Qb[:, sl], Kb[:, sl], (((1,), (1,)), ((), ())),
                            preferred_element_type=jnp.float32)
        if mask is not None:
            s = jnp.where(mask, NEG_INF, s)              # bool mask, no f32 bias
        e = jnp.exp(s - jnp.max(s, axis=-1, keepdims=True))
        sel = rand_sel
        if k_top > 0:
            sel = jnp.logical_or(sel, e >= _kth_largest_thresh(e, k_top))
        es = jnp.where(sel, e * ATT_SCALE, e)
        pm = es * pl.reciprocal(jnp.sum(es, axis=-1, keepdims=True), approx=True)
        att_ref[:, sl] = jnp.dot(pm.astype(jnp.bfloat16), Vb[:, sl],
                                 preferred_element_type=jnp.float32)
    return jnp.dot(att_ref[...].astype(jnp.bfloat16), wl,
                   preferred_element_type=jnp.float32) + bl


# ------------------------------------------------------------------
# Pallas kernels
# ------------------------------------------------------------------

def _self_attn_kernel(x_ref, randm_ref, g_ref, b_ref, wqkv_ref, bqkv_ref,
                      wl_ref, bl_ref, o_ref, att_ref, *, heads, dk, k_top):
    x = x_ref[0].astype(jnp.float32)                     # (L, D)
    L, D = x.shape
    n = _layernorm(x, g_ref[...], b_ref[...])
    qkv = jnp.dot(n.astype(jnp.bfloat16), wqkv_ref[...],
                  preferred_element_type=jnp.float32) + bqkv_ref[...]
    Q = qkv[:, :D] * (1.0 / (dk ** 0.5))                 # scale folded into Q once
    K = qkv[:, D:2 * D]
    V = qkv[:, 2 * D:]
    # causal (future) mask built in-kernel: col > row => masked
    row = lax.broadcasted_iota(jnp.int32, (L, L), 0)
    col = lax.broadcasted_iota(jnp.int32, (L, L), 1)
    causal = col > row
    rand_sel = randm_ref[...] > 0                        # (1, L) bool
    att = _attention_core(Q, K, V, causal, rand_sel, wl_ref[...], bl_ref[...],
                          att_ref, heads=heads, dk=dk, k_top=k_top)
    o_ref[0] = (x + att).astype(o_ref.dtype)


def _cross_attn_kernel(x_ref, enc_ref, kmask_ref, randm_ref, g_ref, b_ref,
                       wq_ref, bq_ref, wkv_ref, bkv_ref, wl_ref, bl_ref,
                       o_ref, att_ref, *, heads, dk, k_top):
    x = x_ref[0].astype(jnp.float32)                     # (Lq, D)
    enc = enc_ref[0].astype(jnp.float32)                 # (Lk, D)
    D = heads * dk
    n = _layernorm(x, g_ref[...], b_ref[...])
    Q = (jnp.dot(n.astype(jnp.bfloat16), wq_ref[...],
                 preferred_element_type=jnp.float32)
         + bq_ref[...]) * (1.0 / (dk ** 0.5))
    kv = jnp.dot(enc.astype(jnp.bfloat16), wkv_ref[...],
                 preferred_element_type=jnp.float32) + bkv_ref[...]
    K = kv[:, :D]
    V = kv[:, D:]
    key_mask = kmask_ref[0] > 0                          # (1, Lk), broadcast over Lq
    rand_sel = randm_ref[...] > 0                        # (1, Lk) bool
    att = _attention_core(Q, K, V, key_mask, rand_sel, wl_ref[...], bl_ref[...],
                          att_ref, heads=heads, dk=dk, k_top=k_top)
    o_ref[0] = (x + att).astype(o_ref.dtype)


def _ffn_kernel(x_ref, g_ref, b_ref, w1_ref, b1_ref, w2_ref, b2_ref, o_ref):
    x = x_ref[0].astype(jnp.float32)                     # (TQ, D)
    n = _layernorm(x, g_ref[...], b_ref[...])
    h = jnp.maximum(jnp.dot(n.astype(jnp.bfloat16), w1_ref[...],
                            preferred_element_type=jnp.float32) + b1_ref[...],
                    0.0)                                 # nn.ReLU
    y = jnp.dot(h.astype(jnp.bfloat16), w2_ref[...],
                preferred_element_type=jnp.float32) + b2_ref[...]
    o_ref[0] = (x + y).astype(o_ref.dtype)


# ------------------------------------------------------------------
# Wrappers
# ------------------------------------------------------------------

def self_attn_sublayer(x, rand_mask, params, p_att, heads):
    B, L, D = x.shape
    dk = D // heads
    k_top = int(round(TOP_P * L))
    # Pack Q|K|V into one wide bf16 matmul (production: pre-pack/cast at init).
    wqkv = jnp.concatenate([p_att["wq"], p_att["wk"], p_att["wv"]],
                           axis=1).astype(jnp.bfloat16)
    bqkv = jnp.concatenate([p_att["bq"], p_att["bk"], p_att["bv"]], axis=1)
    kernel = functools.partial(_self_attn_kernel, heads=heads, dk=dk, k_top=k_top)
    return pl.pallas_call(
        kernel,
        out_shape=jax.ShapeDtypeStruct((B, L, D), x.dtype),
        grid=(B,),
        in_specs=[
            pl.BlockSpec((1, L, D), lambda b: (b, 0, 0)),
            _const_spec((1, L)),
            _const_spec((1, D)), _const_spec((1, D)),
            _const_spec((D, 3 * D)), _const_spec((1, 3 * D)),
            _const_spec((D, D)), _const_spec((1, D)),
        ],
        out_specs=pl.BlockSpec((1, L, D), lambda b: (b, 0, 0)),
        scratch_shapes=[pltpu.VMEM((L, D), jnp.float32)],
        compiler_params=_compiler_params(("parallel",)),
    )(x, rand_mask, params["ln_g"], params["ln_b"], wqkv, bqkv,
      p_att["wl"].astype(jnp.bfloat16), p_att["bl"])


def cross_attn_sublayer(x, enc, key_mask, rand_mask, params, p_att, heads):
    B, Lq, D = x.shape
    Lk = enc.shape[1]
    dk = D // heads
    k_top = int(round(TOP_P * Lk))
    wkv = jnp.concatenate([p_att["wk"], p_att["wv"]], axis=1).astype(jnp.bfloat16)
    bkv = jnp.concatenate([p_att["bk"], p_att["bv"]], axis=1)
    kernel = functools.partial(_cross_attn_kernel, heads=heads, dk=dk, k_top=k_top)
    return pl.pallas_call(
        kernel,
        out_shape=jax.ShapeDtypeStruct((B, Lq, D), x.dtype),
        grid=(B,),
        in_specs=[
            pl.BlockSpec((1, Lq, D), lambda b: (b, 0, 0)),
            pl.BlockSpec((1, Lk, D), lambda b: (b, 0, 0)),
            pl.BlockSpec((1, 1, Lk), lambda b: (b, 0, 0)),   # per-key pad mask
            _const_spec((1, Lk)),
            _const_spec((1, D)), _const_spec((1, D)),
            _const_spec((D, D)), _const_spec((1, D)),
            _const_spec((D, 2 * D)), _const_spec((1, 2 * D)),
            _const_spec((D, D)), _const_spec((1, D)),
        ],
        out_specs=pl.BlockSpec((1, Lq, D), lambda b: (b, 0, 0)),
        scratch_shapes=[pltpu.VMEM((Lq, D), jnp.float32)],
        compiler_params=_compiler_params(("parallel",)),
    )(x, enc, key_mask, rand_mask, params["ln_g"], params["ln_b"],
      p_att["wq"].astype(jnp.bfloat16), p_att["bq"], wkv, bkv,
      p_att["wl"].astype(jnp.bfloat16), p_att["bl"])


def ffn_sublayer(x, params, p_ffn):
    B, L, D = x.shape
    H = p_ffn["w1"].shape[1]
    TQ = _q_tile(L)
    return pl.pallas_call(
        _ffn_kernel,
        out_shape=jax.ShapeDtypeStruct((B, L, D), x.dtype),
        grid=(B, L // TQ),
        in_specs=[
            pl.BlockSpec((1, TQ, D), lambda b, q: (b, q, 0)),
            _const_spec((1, D)), _const_spec((1, D)),
            _const_spec((D, H)), _const_spec((1, H)),
            _const_spec((H, D)), _const_spec((1, D)),
        ],
        out_specs=pl.BlockSpec((1, TQ, D), lambda b, q: (b, q, 0)),
        compiler_params=_compiler_params(("parallel", "parallel")),
    )(x, params["ln_g"], params["ln_b"],
      p_ffn["w1"].astype(jnp.bfloat16), p_ffn["b1"],
      p_ffn["w2"].astype(jnp.bfloat16), p_ffn["b2"])


# ------------------------------------------------------------------
# DecoderBlock forward (first_norm=True, prev=None)
# ------------------------------------------------------------------

def decoder_block(x, encoder_x, pad_mask, future_mask, prev, params, heads,
                  rand_mask1, rand_mask2):
    # TODO(synk): nn.Dropout is treated as identity (eval semantics); the
    # `prev is not None` incremental-decoding branch is not implemented.
    # future_mask is assumed to be the standard causal triu(k=1) mask and is
    # regenerated in-kernel via iota (skips a (B, Lq, Lk) HBM read).
    # pad_mask is assumed per-key (constant over Lq) and collapsed to
    # (B, 1, Lk) int32 so the cross-attn kernel DMAs Lq-times less mask data.
    key_mask = pad_mask[:, :1, :].astype(jnp.int32)
    f1 = self_attn_sublayer(x, rand_mask1, params, params["att1"], heads)
    f2 = cross_attn_sublayer(f1, encoder_x, key_mask, rand_mask2, params,
                             params["att2"], heads)
    f3 = ffn_sublayer(f2, params, params["ffn"])
    return f3, encoder_x, pad_mask, future_mask, prev


# ------------------------------------------------------------------
# Pure-JAX f32 reference (true module semantics, for correctness check)
# ------------------------------------------------------------------

def _layernorm_ref(x, g, b):
    mean = jnp.mean(x, -1, keepdims=True)
    var = jnp.mean((x - mean) ** 2, -1, keepdims=True)
    return (x - mean) / jnp.sqrt(var + LN_EPS) * g + b


def _mha_ref(xq, xkv, mask, rand_mask, p, heads):
    B, Lq, D = xq.shape
    Lk = xkv.shape[1]
    dk = D // heads
    k_top = int(round(TOP_P * Lk))
    Q = xq @ p["wq"] + p["bq"]
    K = xkv @ p["wk"] + p["bk"]
    V = xkv @ p["wv"] + p["bv"]
    outs = []
    for h in range(heads):
        qh, kh, vh = (t[..., h * dk:(h + 1) * dk] for t in (Q, K, V))
        s = jnp.einsum("bqd,bkd->bqk", qh, kh) / (dk ** 0.5)
        s = jnp.where(mask > 0.5, NEG_INF, s)
        patt = jax.nn.softmax(s, axis=-1)
        smask = (rand_mask > 0)[None]
        if k_top > 0:
            cnt = jnp.sum((patt[..., None, :] > patt[..., :, None])
                          .astype(jnp.float32), -1)
            smask = jnp.logical_or(smask, cnt < k_top)
        ps = jnp.where(smask, patt * ATT_SCALE, patt)
        pm = ps / jnp.sum(ps, -1, keepdims=True)
        outs.append(jnp.einsum("bqk,bkd->bqd", pm, vh))
    res = jnp.concatenate(outs, -1)
    return res @ p["wl"] + p["bl"]


def decoder_block_ref(x, encoder_x, pad_mask, future_mask, params, heads,
                      rand_mask1, rand_mask2):
    fmask = future_mask.astype(jnp.float32)
    pmask = pad_mask.astype(jnp.float32)
    n1 = _layernorm_ref(x, params["ln_g"], params["ln_b"])
    f1 = x + _mha_ref(n1, n1, fmask, rand_mask1, params["att1"], heads)
    n2 = _layernorm_ref(f1, params["ln_g"], params["ln_b"])
    f2 = f1 + _mha_ref(n2, encoder_x, pmask, rand_mask2, params["att2"], heads)
    n3 = _layernorm_ref(f2, params["ln_g"], params["ln_b"])
    h = jnp.maximum(n3 @ params["ffn"]["w1"] + params["ffn"]["b1"], 0.0)
    f3 = f2 + (h @ params["ffn"]["w2"] + params["ffn"]["b2"])
    return f3


# ------------------------------------------------------------------
# Deterministic parameter / mask construction
# ------------------------------------------------------------------

def _init_linear(key, fan_in, fan_out):
    kw, kb = jax.random.split(key)
    bound = 1.0 / (fan_in ** 0.5)
    w = jax.random.uniform(kw, (fan_in, fan_out), jnp.float32, -bound, bound)
    b = jax.random.uniform(kb, (1, fan_out), jnp.float32, -bound, bound)
    return w, b


def init_params(key, D):
    ks = jax.random.split(key, 4)

    def att_params(k):
        kk = jax.random.split(k, 4)
        wq, bq = _init_linear(kk[0], D, D)
        wk, bk = _init_linear(kk[1], D, D)
        wv, bv = _init_linear(kk[2], D, D)
        wl, bl = _init_linear(kk[3], D, D)
        return dict(wq=wq, bq=bq, wk=wk, bk=bk, wv=wv, bv=bv, wl=wl, bl=bl)

    w1, b1 = _init_linear(ks[0], D, 4 * D)
    w2, b2 = _init_linear(ks[1], 4 * D, D)
    return dict(
        ln_g=jnp.ones((1, D), jnp.float32),   # nn.LayerNorm default init
        ln_b=jnp.zeros((1, D), jnp.float32),
        att1=att_params(ks[2]),
        att2=att_params(ks[3]),
        ffn=dict(w1=w1, b1=b1, w2=w2, b2=b2),
    )


def make_rand_mask(key, Lk):
    # deterministic stand-in for `random.randint` columns in 'stocastic' mode
    n_rand = int(round(RAND_P * Lk))
    if n_rand == 0:
        return jnp.zeros((1, Lk), jnp.int32)
    cols = jax.random.randint(key, (n_rand,), 0, Lk)
    hit = jnp.any(jnp.arange(Lk)[None, :] == cols[:, None], axis=0)
    return hit[None, :].astype(jnp.int32)


# ------------------------------------------------------------------

if __name__ == "__main__":
    # small but non-trivial: k_top = 2 (self) / 2 (cross), 3/5 random columns.
    B, L_DEC, L_ENC, D, HEADS = 2, 32, 48, 32, 4

    key = jax.random.PRNGKey(0)
    k_x, k_enc, k_p, k_r1, k_r2 = jax.random.split(key, 5)

    x = jax.random.normal(k_x, (B, L_DEC, D), jnp.float32)
    encoder_x = jax.random.normal(k_enc, (B, L_ENC, D), jnp.float32)
    future_mask = jnp.broadcast_to(
        jnp.triu(jnp.ones((L_DEC, L_DEC), bool), k=1), (B, L_DEC, L_DEC))
    pad_mask = jnp.zeros((B, L_DEC, L_ENC), bool).at[1, :, L_ENC - 2:].set(True)

    params = init_params(k_p, D)
    rand_mask1 = make_rand_mask(k_r1, L_DEC)   # self-attention keys
    rand_mask2 = make_rand_mask(k_r2, L_ENC)   # cross-attention keys

    def _run():
        out = decoder_block(x, encoder_x, pad_mask, future_mask, None,
                            params, HEADS, rand_mask1, rand_mask2)
        return jax.block_until_ready(out[0])

    try:
        final3 = _run()
    except Exception:
        # Fallback if this jax build rejects pipeline_mode=pl.Buffered(1) on a
        # top-level pallas_call BlockSpec: retry with default double-buffering.
        _BUFFER_WEIGHTS = False
        final3 = _run()

    ref = decoder_block_ref(x, encoder_x, pad_mask, future_mask,
                            params, HEADS, rand_mask1, rand_mask2)

    assert final3.shape == (B, L_DEC, D)
    assert not bool(jnp.any(jnp.isnan(final3)))
    # bf16 MXU operands (perf feedback) relax the tolerance vs the f32 reference.
    assert jnp.allclose(final3, ref, atol=5e-2, rtol=5e-2), (
        float(jnp.max(jnp.abs(final3 - ref))))
    print("KERNEL_OK")
</pallas_src>

<mosaic_0001>
module attributes {stable_mosaic.version = 11 : i64} {
  func.func @_self_attn_kernel(%arg0: i32, %arg1: memref<1x32x32xf32, #tpu.memory_space<vmem>>, %arg2: memref<1x32xi32, #tpu.memory_space<vmem>>, %arg3: memref<1x32xf32, #tpu.memory_space<vmem>>, %arg4: memref<1x32xf32, #tpu.memory_space<vmem>>, %arg5: memref<32x96xbf16, #tpu.memory_space<vmem>>, %arg6: memref<1x96xf32, #tpu.memory_space<vmem>>, %arg7: memref<32x32xbf16, #tpu.memory_space<vmem>>, %arg8: memref<1x32xf32, #tpu.memory_space<vmem>>, %arg9: memref<1x32x32xf32, #tpu.memory_space<vmem>>, %arg10: memref<32x32xf32, #tpu.memory_space<vmem>>) attributes {dimension_semantics = [#tpu.dimension_semantics<parallel>], iteration_bounds = array<i64: 2>, scalar_prefetch = 0 : i64, scratch_operands = 1 : i64, tpu.core_type = #tpu.core_type<tc>, window_params = [{transform_indices = @transform_0, window_bounds = array<i64: 1, 32, 32>}, {pipeline_mode = #tpu.pipeline_mode<synchronous>, transform_indices = @transform_1, window_bounds = array<i64: 1, 32>}, {pipeline_mode = #tpu.pipeline_mode<synchronous>, transform_indices = @transform_2, window_bounds = array<i64: 1, 32>}, {pipeline_mode = #tpu.pipeline_mode<synchronous>, transform_indices = @transform_3, window_bounds = array<i64: 1, 32>}, {pipeline_mode = #tpu.pipeline_mode<synchronous>, transform_indices = @transform_4, window_bounds = array<i64: 32, 96>}, {pipeline_mode = #tpu.pipeline_mode<synchronous>, transform_indices = @transform_5, window_bounds = array<i64: 1, 96>}, {pipeline_mode = #tpu.pipeline_mode<synchronous>, transform_indices = @transform_6, window_bounds = array<i64: 32, 32>}, {pipeline_mode = #tpu.pipeline_mode<synchronous>, transform_indices = @transform_7, window_bounds = array<i64: 1, 32>}, {transform_indices = @transform_8, window_bounds = array<i64: 1, 32, 32>}]} {
    %c0 = arith.constant 0 : index
    %c0_0 = arith.constant 0 : index
    %c0_1 = arith.constant 0 : index
    %0 = vector.load %arg1[%c0, %c0_0, %c0_1] : memref<1x32x32xf32, #tpu.memory_space<vmem>>, vector<1x32x32xf32>
    %1 = vector.shape_cast %0 : vector<1x32x32xf32> to vector<32x32xf32>
    %c0_2 = arith.constant 0 : index
    %c0_3 = arith.constant 0 : index
    %2 = vector.load %arg3[%c0_2, %c0_3] : memref<1x32xf32, #tpu.memory_space<vmem>>, vector<1x32xf32>
    %c0_4 = arith.constant 0 : index
    %c0_5 = arith.constant 0 : index
    %3 = vector.load %arg4[%c0_4, %c0_5] : memref<1x32xf32, #tpu.memory_space<vmem>>, vector<1x32xf32>
    %cst = arith.constant dense<0.000000e+00> : vector<32xf32>
    %4 = vector.multi_reduction <add>, %1, %cst [1] : vector<32x32xf32> to vector<32xf32>
    %5 = vector.shape_cast %4 : vector<32xf32> to vector<32x1xf32>
    %cst_6 = arith.constant 3.200000e+01 : f32
    %6 = vector.broadcast %cst_6 : f32 to vector<32x1xf32>
    %7 = arith.divf %5, %6 : vector<32x1xf32>
    %8 = vector.broadcast %7 : vector<32x1xf32> to vector<32x32xf32>
    %9 = arith.subf %1, %8 : vector<32x32xf32>
    %10 = arith.mulf %9, %9 : vector<32x32xf32>
    %cst_7 = arith.constant dense<0.000000e+00> : vector<32xf32>
    %11 = vector.multi_reduction <add>, %10, %cst_7 [1] : vector<32x32xf32> to vector<32xf32>
    %12 = vector.shape_cast %11 : vector<32xf32> to vector<32x1xf32>
    %cst_8 = arith.constant 3.200000e+01 : f32
    %13 = vector.broadcast %cst_8 : f32 to vector<32x1xf32>
    %14 = arith.divf %12, %13 : vector<32x1xf32>
    %cst_9 = arith.constant 9.99999974E-6 : f32
    %15 = vector.broadcast %cst_9 : f32 to vector<32x1xf32>
    %16 = arith.addf %14, %15 : vector<32x1xf32>
    %17 = math.rsqrt %16 : vector<32x1xf32>
    %18 = vector.broadcast %17 : vector<32x1xf32> to vector<32x32xf32>
    %19 = arith.mulf %9, %18 : vector<32x32xf32>
    %20 = vector.broadcast %2 : vector<1x32xf32> to vector<32x32xf32>
    %21 = arith.mulf %19, %20 : vector<32x32xf32>
    %22 = vector.broadcast %3 : vector<1x32xf32> to vector<32x32xf32>
    %23 = arith.addf %21, %22 : vector<32x32xf32>
    %24 = arith.truncf %23 : vector<32x32xf32> to vector<32x32xbf16>
    %c0_10 = arith.constant 0 : index
    %c0_11 = arith.constant 0 : index
    %25 = vector.load %arg5[%c0_10, %c0_11] : memref<32x96xbf16, #tpu.memory_space<vmem>>, vector<32x96xbf16>
    %cst_12 = arith.constant dense<0.000000e+00> : vector<32x96xf32>
    %26 = tpu.matmul %24, %25, %cst_12 {dimension_numbers = #tpu.dot_dimension_numbers<[1], [0], [0], [1], [0, 0, 1, 1], [], []>} : vector<32x32xbf16>, vector<32x96xbf16>, vector<32x96xf32> -> vector<32x96xf32>
    %c0_13 = arith.constant 0 : index
    %c0_14 = arith.constant 0 : index
    %27 = vector.load %arg6[%c0_13, %c0_14] : memref<1x96xf32, #tpu.memory_space<vmem>>, vector<1x96xf32>
    %28 = vector.broadcast %27 : vector<1x96xf32> to vector<32x96xf32>
    %29 = arith.addf %26, %28 : vector<32x96xf32>
    %30 = vector.extract_strided_slice %29 {offsets = [0, 0], sizes = [32, 32], strides = [1, 1]} : vector<32x96xf32> to vector<32x32xf32>
    %cst_15 = arith.constant 0.353553385 : f32
    %31 = vector.broadcast %cst_15 : f32 to vector<32x32xf32>
    %32 = arith.mulf %30, %31 : vector<32x32xf32>
    %33 = vector.extract_strided_slice %29 {offsets = [0, 32], sizes = [32, 32], strides = [1, 1]} : vector<32x96xf32> to vector<32x32xf32>
    %34 = vector.extract_strided_slice %29 {offsets = [0, 64], sizes = [32, 32], strides = [1, 1]} : vector<32x96xf32> to vector<32x32xf32>
    %35 = tpu.iota {dimensions = array<i32: 0>} : vector<32x32xi32>
    %36 = tpu.iota {dimensions = array<i32: 1>} : vector<32x32xi32>
    %37 = arith.cmpi sgt, %36, %35 : vector<32x32xi32>
    %c0_16 = arith.constant 0 : index
    %c0_17 = arith.constant 0 : index
    %38 = vector.load %arg2[%c0_16, %c0_17] : memref<1x32xi32, #tpu.memory_space<vmem>>, vector<1x32xi32>
    %c0_i32 = arith.constant 0 : i32
    %39 = vector.broadcast %c0_i32 : i32 to vector<1x32xi32>
    %40 = arith.cmpi sgt, %38, %39 : vector<1x32xi32>
    %c0_18 = arith.constant 0 : index
    %c0_19 = arith.constant 0 : index
    %41 = vector.load %arg7[%c0_18, %c0_19] : memref<32x32xbf16, #tpu.memory_space<vmem>>, vector<32x32xbf16>
    %c0_20 = arith.constant 0 : index
    %c0_21 = arith.constant 0 : index
    %42 = vector.load %arg8[%c0_20, %c0_21] : memref<1x32xf32, #tpu.memory_space<vmem>>, vector<1x32xf32>
    %43 = arith.truncf %32 : vector<32x32xf32> to vector<32x32xbf16>
    %44 = arith.truncf %33 : vector<32x32xf32> to vector<32x32xbf16>
    %45 = arith.truncf %34 : vector<32x32xf32> to vector<32x32xbf16>
    %46 = vector.extract_strided_slice %43 {offsets = [0, 0], sizes = [32, 8], strides = [1, 1]} : vector<32x32xbf16> to vector<32x8xbf16>
    %47 = vector.extract_strided_slice %44 {offsets = [0, 0], sizes = [32, 8], strides = [1, 1]} : vector<32x32xbf16> to vector<32x8xbf16>
    %cst_22 = arith.constant dense<0.000000e+00> : vector<32x32xf32>
    %48 = tpu.matmul %46, %47, %cst_22 {dimension_numbers = #tpu.dot_dimension_numbers<[1], [1], [0], [0], [0, 0, 1, 0], [], []>} : vector<32x8xbf16>, vector<32x8xbf16>, vector<32x32xf32> -> vector<32x32xf32>
    %cst_23 = arith.constant -1.000000e+30 : f32
    %49 = vector.broadcast %cst_23 : f32 to vector<32x32xf32>
    %50 = arith.select %37, %49, %48 : vector<32x32xi1>, vector<32x32xf32>
    %cst_24 = arith.constant dense<0xFF800000> : vector<32xf32>
    %51 = vector.multi_reduction <maximumf>, %50, %cst_24 [1] : vector<32x32xf32> to vector<32xf32>
    %52 = vector.shape_cast %51 : vector<32xf32> to vector<32x1xf32>
    %53 = vector.broadcast %52 : vector<32x1xf32> to vector<32x32xf32>
    %54 = arith.subf %50, %53 : vector<32x32xf32>
    %55 = math.exp %54 : vector<32x32xf32>
    %cst_25 = arith.constant 0.000000e+00 : f32
    %56 = vector.broadcast %cst_25 : f32 to vector<32x1xf32>
    %cst_26 = arith.constant 1.000000e+00 : f32
    %57 = vector.broadcast %cst_26 : f32 to vector<32x1xf32>
    %c0_i32_27 = arith.constant 0 : i32
    %c30_i32 = arith.constant 30 : i32
    %58 = arith.addi %c0_i32_27, %c30_i32 : i32
    %c1_i32 = arith.constant 1 : i32
    %59:2 = scf.for %arg11 = %c0_i32_27 to %58 step %c1_i32 iter_args(%arg12 = %56, %arg13 = %57) -> (vector<32x1xf32>, vector<32x1xf32>)  : i32 {
      %175 = arith.addf %arg12, %arg13 : vector<32x1xf32>
      %cst_75 = arith.constant 5.000000e-01 : f32
      %176 = vector.broadcast %cst_75 : f32 to vector<32x1xf32>
      %177 = arith.mulf %176, %175 : vector<32x1xf32>
      %178 = vector.broadcast %177 : vector<32x1xf32> to vector<32x32xf32>
      %179 = arith.cmpf oge, %55, %178 : vector<32x32xf32>
      %180 = arith.extui %179 : vector<32x32xi1> to vector<32x32xi32>
      %181 = arith.sitofp %180 : vector<32x32xi32> to vector<32x32xf32>
      %cst_76 = arith.constant dense<0.000000e+00> : vector<32xf32>
      %182 = vector.multi_reduction <add>, %181, %cst_76 [1] : vector<32x32xf32> to vector<32xf32>
      %183 = vector.shape_cast %182 : vector<32xf32> to vector<32x1xf32>
      %cst_77 = arith.constant 2.000000e+00 : f32
      %184 = vector.broadcast %cst_77 : f32 to vector<32x1xf32>
      %185 = arith.cmpf oge, %183, %184 : vector<32x1xf32>
      %186 = arith.select %185, %177, %arg12 : vector<32x1xi1>, vector<32x1xf32>
      %187 = arith.select %185, %arg13, %177 : vector<32x1xi1>, vector<32x1xf32>
      scf.yield %186, %187 : vector<32x1xf32>, vector<32x1xf32>
    }
    %60 = vector.broadcast %59#0 : vector<32x1xf32> to vector<32x32xf32>
    %61 = arith.cmpf oge, %55, %60 : vector<32x32xf32>
    %62 = vector.broadcast %40 : vector<1x32xi1> to vector<32x32xi1>
    %63 = arith.ori %62, %61 : vector<32x32xi1>
    %cst_28 = arith.constant 1.200000e+00 : f32
    %64 = vector.broadcast %cst_28 : f32 to vector<32x32xf32>
    %65 = arith.mulf %55, %64 : vector<32x32xf32>
    %66 = arith.select %63, %65, %55 : vector<32x32xi1>, vector<32x32xf32>
    %cst_29 = arith.constant dense<0.000000e+00> : vector<32xf32>
    %67 = vector.multi_reduction <add>, %66, %cst_29 [1] : vector<32x32xf32> to vector<32xf32>
    %68 = vector.shape_cast %67 : vector<32xf32> to vector<32x1xf32>
    %69 = tpu.reciprocal %68 {approx = true} : vector<32x1xf32> -> vector<32x1xf32>
    %70 = vector.broadcast %69 : vector<32x1xf32> to vector<32x32xf32>
    %71 = arith.mulf %66, %70 : vector<32x32xf32>
    %72 = arith.truncf %71 : vector<32x32xf32> to vector<32x32xbf16>
    %73 = vector.extract_strided_slice %45 {offsets = [0, 0], sizes = [32, 8], strides = [1, 1]} : vector<32x32xbf16> to vector<32x8xbf16>
    %cst_30 = arith.constant dense<0.000000e+00> : vector<32x8xf32>
    %74 = tpu.matmul %72, %73, %cst_30 {dimension_numbers = #tpu.dot_dimension_numbers<[1], [0], [0], [1], [0, 0, 1, 1], [], []>} : vector<32x32xbf16>, vector<32x8xbf16>, vector<32x8xf32> -> vector<32x8xf32>
    %c0_31 = arith.constant 0 : index
    %c0_32 = arith.constant 0 : index
    %75 = vector.load %arg10[%c0_31, %c0_32] : memref<32x32xf32, #tpu.memory_space<vmem>>, vector<32x8xf32>
    tpu.vector_store %arg10[%c0_31, %c0_32], %74 {strides = array<i32>} : memref<32x32xf32, #tpu.memory_space<vmem>>, vector<32x8xf32>,
    %76 = vector.extract_strided_slice %43 {offsets = [0, 8], sizes = [32, 8], strides = [1, 1]} : vector<32x32xbf16> to vector<32x8xbf16>
    %77 = vector.extract_strided_slice %44 {offsets = [0, 8], sizes = [32, 8], strides = [1, 1]} : vector<32x32xbf16> to vector<32x8xbf16>
    %cst_33 = arith.constant dense<0.000000e+00> : vector<32x32xf32>
    %78 = tpu.matmul %76, %77, %cst_33 {dimension_numbers = #tpu.dot_dimension_numbers<[1], [1], [0], [0], [0, 0, 1, 0], [], []>} : vector<32x8xbf16>, vector<32x8xbf16>, vector<32x32xf32> -> vector<32x32xf32>
    %cst_34 = arith.constant -1.000000e+30 : f32
    %79 = vector.broadcast %cst_34 : f32 to vector<32x32xf32>
    %80 = arith.select %37, %79, %78 : vector<32x32xi1>, vector<32x32xf32>
    %cst_35 = arith.constant dense<0xFF800000> : vector<32xf32>
    %81 = vector.multi_reduction <maximumf>, %80, %cst_35 [1] : vector<32x32xf32> to vector<32xf32>
    %82 = vector.shape_cast %81 : vector<32xf32> to vector<32x1xf32>
    %83 = vector.broadcast %82 : vector<32x1xf32> to vector<32x32xf32>
    %84 = arith.subf %80, %83 : vector<32x32xf32>
    %85 = math.exp %84 : vector<32x32xf32>
    %cst_36 = arith.constant 0.000000e+00 : f32
    %86 = vector.broadcast %cst_36 : f32 to vector<32x1xf32>
    %cst_37 = arith.constant 1.000000e+00 : f32
    %87 = vector.broadcast %cst_37 : f32 to vector<32x1xf32>
    %c0_i32_38 = arith.constant 0 : i32
    %c30_i32_39 = arith.constant 30 : i32
    %88 = arith.addi %c0_i32_38, %c30_i32_39 : i32
    %c1_i32_40 = arith.constant 1 : i32
    %89:2 = scf.for %arg11 = %c0_i32_38 to %88 step %c1_i32_40 iter_args(%arg12 = %86, %arg13 = %87) -> (vector<32x1xf32>, vector<32x1xf32>)  : i32 {
      %175 = arith.addf %arg12, %arg13 : vector<32x1xf32>
      %cst_75 = arith.constant 5.000000e-01 : f32
      %176 = vector.broadcast %cst_75 : f32 to vector<32x1xf32>
      %177 = arith.mulf %176, %175 : vector<32x1xf32>
      %178 = vector.broadcast %177 : vector<32x1xf32> to vector<32x32xf32>
      %179 = arith.cmpf oge, %85, %178 : vector<32x32xf32>
      %180 = arith.extui %179 : vector<32x32xi1> to vector<32x32xi32>
      %181 = arith.sitofp %180 : vector<32x32xi32> to vector<32x32xf32>
      %cst_76 = arith.constant dense<0.000000e+00> : vector<32xf32>
      %182 = vector.multi_reduction <add>, %181, %cst_76 [1] : vector<32x32xf32> to vector<32xf32>
      %183 = vector.shape_cast %182 : vector<32xf32> to vector<32x1xf32>
      %cst_77 = arith.constant 2.000000e+00 : f32
      %184 = vector.broadcast %cst_77 : f32 to vector<32x1xf32>
      %185 = arith.cmpf oge, %183, %184 : vector<32x1xf32>
      %186 = arith.select %185, %177, %arg12 : vector<32x1xi1>, vector<32x1xf32>
      %187 = arith.select %185, %arg13, %177 : vector<32x1xi1>, vector<32x1xf32>
      scf.yield %186, %187 : vector<32x1xf32>, vector<32x1xf32>
    }
    %90 = vector.broadcast %89#0 : vector<32x1xf32> to vector<32x32xf32>
    %91 = arith.cmpf oge, %85, %90 : vector<32x32xf32>
    %92 = vector.broadcast %40 : vector<1x32xi1> to vector<32x32xi1>
    %93 = arith.ori %92, %91 : vector<32x32xi1>
    %cst_41 = arith.constant 1.200000e+00 : f32
    %94 = vector.broadcast %cst_41 : f32 to vector<32x32xf32>
    %95 = arith.mulf %85, %94 : vector<32x32xf32>
    %96 = arith.select %93, %95, %85 : vector<32x32xi1>, vector<32x32xf32>
    %cst_42 = arith.constant dense<0.000000e+00> : vector<32xf32>
    %97 = vector.multi_reduction <add>, %96, %cst_42 [1] : vector<32x32xf32> to vector<32xf32>
    %98 = vector.shape_cast %97 : vector<32xf32> to vector<32x1xf32>
    %99 = tpu.reciprocal %98 {approx = true} : vector<32x1xf32> -> vector<32x1xf32>
    %100 = vector.broadcast %99 : vector<32x1xf32> to vector<32x32xf32>
    %101 = arith.mulf %96, %100 : vector<32x32xf32>
    %102 = arith.truncf %101 : vector<32x32xf32> to vector<32x32xbf16>
    %103 = vector.extract_strided_slice %45 {offsets = [0, 8], sizes = [32, 8], strides = [1, 1]} : vector<32x32xbf16> to vector<32x8xbf16>
    %cst_43 = arith.constant dense<0.000000e+00> : vector<32x8xf32>
    %104 = tpu.matmul %102, %103, %cst_43 {dimension_numbers = #tpu.dot_dimension_numbers<[1], [0], [0], [1], [0, 0, 1, 1], [], []>} : vector<32x32xbf16>, vector<32x8xbf16>, vector<32x8xf32> -> vector<32x8xf32>
    %c0_44 = arith.constant 0 : index
    %c8 = arith.constant 8 : index
    %105 = vector.load %arg10[%c0_44, %c8] : memref<32x32xf32, #tpu.memory_space<vmem>>, vector<32x8xf32>
    tpu.vector_store %arg10[%c0_44, %c8], %104 {strides = array<i32>} : memref<32x32xf32, #tpu.memory_space<vmem>>, vector<32x8xf32>,
    %106 = vector.extract_strided_slice %43 {offsets = [0, 16], sizes = [32, 8], strides = [1, 1]} : vector<32x32xbf16> to vector<32x8xbf16>
    %107 = vector.extract_strided_slice %44 {offsets = [0, 16], sizes = [32, 8], strides = [1, 1]} : vector<32x32xbf16> to vector<32x8xbf16>
    %cst_45 = arith.constant dense<0.000000e+00> : vector<32x32xf32>
    %108 = tpu.matmul %106, %107, %cst_45 {dimension_numbers = #tpu.dot_dimension_numbers<[1], [1], [0], [0], [0, 0, 1, 0], [], []>} : vector<32x8xbf16>, vector<32x8xbf16>, vector<32x32xf32> -> vector<32x32xf32>
    %cst_46 = arith.constant -1.000000e+30 : f32
    %109 = vector.broadcast %cst_46 : f32 to vector<32x32xf32>
    %110 = arith.select %37, %109, %108 : vector<32x32xi1>, vector<32x32xf32>
    %cst_47 = arith.constant dense<0xFF800000> : vector<32xf32>
    %111 = vector.multi_reduction <maximumf>, %110, %cst_47 [1] : vector<32x32xf32> to vector<32xf32>
    %112 = vector.shape_cast %111 : vector<32xf32> to vector<32x1xf32>
    %113 = vector.broadcast %112 : vector<32x1xf32> to vector<32x32xf32>
    %114 = arith.subf %110, %113 : vector<32x32xf32>
    %115 = math.exp %114 : vector<32x32xf32>
    %cst_48 = arith.constant 0.000000e+00 : f32
    %116 = vector.broadcast %cst_48 : f32 to vector<32x1xf32>
    %cst_49 = arith.constant 1.000000e+00 : f32
    %117 = vector.broadcast %cst_49 : f32 to vector<32x1xf32>
    %c0_i32_50 = arith.constant 0 : i32
    %c30_i32_51 = arith.constant 30 : i32
    %118 = arith.addi %c0_i32_50, %c30_i32_51 : i32
    %c1_i32_52 = arith.constant 1 : i32
    %119:2 = scf.for %arg11 = %c0_i32_50 to %118 step %c1_i32_52 iter_args(%arg12 = %116, %arg13 = %117) -> (vector<32x1xf32>, vector<32x1xf32>)  : i32 {
      %175 = arith.addf %arg12, %arg13 : vector<32x1xf32>
      %cst_75 = arith.constant 5.000000e-01 : f32
      %176 = vector.broadcast %cst_75 : f32 to vector<32x1xf32>
      %177 = arith.mulf %176, %175 : vector<32x1xf32>
      %178 = vector.broadcast %177 : vector<32x1xf32> to vector<32x32xf32>
      %179 = arith.cmpf oge, %115, %178 : vector<32x32xf32>
      %180 = arith.extui %179 : vector<32x32xi1> to vector<32x32xi32>
      %181 = arith.sitofp %180 : vector<32x32xi32> to vector<32x32xf32>
      %cst_76 = arith.constant dense<0.000000e+00> : vector<32xf32>
      %182 = vector.multi_reduction <add>, %181, %cst_76 [1] : vector<32x32xf32> to vector<32xf32>
      %183 = vector.shape_cast %182 : vector<32xf32> to vector<32x1xf32>
      %cst_77 = arith.constant 2.000000e+00 : f32
      %184 = vector.broadcast %cst_77 : f32 to vector<32x1xf32>
      %185 = arith.cmpf oge, %183, %184 : vector<32x1xf32>
      %186 = arith.select %185, %177, %arg12 : vector<32x1xi1>, vector<32x1xf32>
      %187 = arith.select %185, %arg13, %177 : vector<32x1xi1>, vector<32x1xf32>
      scf.yield %186, %187 : vector<32x1xf32>, vector<32x1xf32>
    }
    %120 = vector.broadcast %119#0 : vector<32x1xf32> to vector<32x32xf32>
    %121 = arith.cmpf oge, %115, %120 : vector<32x32xf32>
    %122 = vector.broadcast %40 : vector<1x32xi1> to vector<32x32xi1>
    %123 = arith.ori %122, %121 : vector<32x32xi1>
    %cst_53 = arith.constant 1.200000e+00 : f32
    %124 = vector.broadcast %cst_53 : f32 to vector<32x32xf32>
    %125 = arith.mulf %115, %124 : vector<32x32xf32>
    %126 = arith.select %123, %125, %115 : vector<32x32xi1>, vector<32x32xf32>
    %cst_54 = arith.constant dense<0.000000e+00> : vector<32xf32>
    %127 = vector.multi_reduction <add>, %126, %cst_54 [1] : vector<32x32xf32> to vector<32xf32>
    %128 = vector.shape_cast %127 : vector<32xf32> to vector<32x1xf32>
    %129 = tpu.reciprocal %128 {approx = true} : vector<32x1xf32> -> vector<32x1xf32>
    %130 = vector.broadcast %129 : vector<32x1xf32> to vector<32x32xf32>
    %131 = arith.mulf %126, %130 : vector<32x32xf32>
    %132 = arith.truncf %131 : vector<32x32xf32> to vector<32x32xbf16>
    %133 = vector.extract_strided_slice %45 {offsets = [0, 16], sizes = [32, 8], strides = [1, 1]} : vector<32x32xbf16> to vector<32x8xbf16>
    %cst_55 = arith.constant dense<0.000000e+00> : vector<32x8xf32>
    %134 = tpu.matmul %132, %133, %cst_55 {dimension_numbers = #tpu.dot_dimension_numbers<[1], [0], [0], [1], [0, 0, 1, 1], [], []>} : vector<32x32xbf16>, vector<32x8xbf16>, vector<32x8xf32> -> vector<32x8xf32>
    %c0_56 = arith.constant 0 : index
    %c16 = arith.constant 16 : index
    %135 = vector.load %arg10[%c0_56, %c16] : memref<32x32xf32, #tpu.memory_space<vmem>>, vector<32x8xf32>
    tpu.vector_store %arg10[%c0_56, %c16], %134 {strides = array<i32>} : memref<32x32xf32, #tpu.memory_space<vmem>>, vector<32x8xf32>,
    %136 = vector.extract_strided_slice %43 {offsets = [0, 24], sizes = [32, 8], strides = [1, 1]} : vector<32x32xbf16> to vector<32x8xbf16>
    %137 = vector.extract_strided_slice %44 {offsets = [0, 24], sizes = [32, 8], strides = [1, 1]} : vector<32x32xbf16> to vector<32x8xbf16>
    %cst_57 = arith.constant dense<0.000000e+00> : vector<32x32xf32>
    %138 = tpu.matmul %136, %137, %cst_57 {dimension_numbers = #tpu.dot_dimension_numbers<[1], [1], [0], [0], [0, 0, 1, 0], [], []>} : vector<32x8xbf16>, vector<32x8xbf16>, vector<32x32xf32> -> vector<32x32xf32>
    %cst_58 = arith.constant -1.000000e+30 : f32
    %139 = vector.broadcast %cst_58 : f32 to vector<32x32xf32>
    %140 = arith.select %37, %139, %138 : vector<32x32xi1>, vector<32x32xf32>
    %cst_59 = arith.constant dense<0xFF800000> : vector<32xf32>
    %141 = vector.multi_reduction <maximumf>, %140, %cst_59 [1] : vector<32x32xf32> to vector<32xf32>
    %142 = vector.shape_cast %141 : vector<32xf32> to vector<32x1xf32>
    %143 = vector.broadcast %142 : vector<32x1xf32> to vector<32x32xf32>
    %144 = arith.subf %140, %143 : vector<32x32xf32>
    %145 = math.exp %144 : vector<32x32xf32>
    %cst_60 = arith.constant 0.000000e+00 : f32
    %146 = vector.broadcast %cst_60 : f32 to vector<32x1xf32>
    %cst_61 = arith.constant 1.000000e+00 : f32
    %147 = vector.broadcast %cst_61 : f32 to vector<32x1xf32>
    %c0_i32_62 = arith.constant 0 : i32
    %c30_i32_63 = arith.constant 30 : i32
    %148 = arith.addi %c0_i32_62, %c30_i32_63 : i32
    %c1_i32_64 = arith.constant 1 : i32
    %149:2 = scf.for %arg11 = %c0_i32_62 to %148 step %c1_i32_64 iter_args(%arg12 = %146, %arg13 = %147) -> (vector<32x1xf32>, vector<32x1xf32>)  : i32 {
      %175 = arith.addf %arg12, %arg13 : vector<32x1xf32>
      %cst_75 = arith.constant 5.000000e-01 : f32
      %176 = vector.broadcast %cst_75 : f32 to vector<32x1xf32>
      %177 = arith.mulf %176, %175 : vector<32x1xf32>
      %178 = vector.broadcast %177 : vector<32x1xf32> to vector<32x32xf32>
      %179 = arith.cmpf oge, %145, %178 : vector<32x32xf32>
      %180 = arith.extui %179 : vector<32x32xi1> to vector<32x32xi32>
      %181 = arith.sitofp %180 : vector<32x32xi32> to vector<32x32xf32>
      %cst_76 = arith.constant dense<0.000000e+00> : vector<32xf32>
      %182 = vector.multi_reduction <add>, %181, %cst_76 [1] : vector<32x32xf32> to vector<32xf32>
      %183 = vector.shape_cast %182 : vector<32xf32> to vector<32x1xf32>
      %cst_77 = arith.constant 2.000000e+00 : f32
      %184 = vector.broadcast %cst_77 : f32 to vector<32x1xf32>
      %185 = arith.cmpf oge, %183, %184 : vector<32x1xf32>
      %186 = arith.select %185, %177, %arg12 : vector<32x1xi1>, vector<32x1xf32>
      %187 = arith.select %185, %arg13, %177 : vector<32x1xi1>, vector<32x1xf32>
      scf.yield %186, %187 : vector<32x1xf32>, vector<32x1xf32>
    }
    %150 = vector.broadcast %149#0 : vector<32x1xf32> to vector<32x32xf32>
    %151 = arith.cmpf oge, %145, %150 : vector<32x32xf32>
    %152 = vector.broadcast %40 : vector<1x32xi1> to vector<32x32xi1>
    %153 = arith.ori %152, %151 : vector<32x32xi1>
    %cst_65 = arith.constant 1.200000e+00 : f32
    %154 = vector.broadcast %cst_65 : f32 to vector<32x32xf32>
    %155 = arith.mulf %145, %154 : vector<32x32xf32>
    %156 = arith.select %153, %155, %145 : vector<32x32xi1>, vector<32x32xf32>
    %cst_66 = arith.constant dense<0.000000e+00> : vector<32xf32>
    %157 = vector.multi_reduction <add>, %156, %cst_66 [1] : vector<32x32xf32> to vector<32xf32>
    %158 = vector.shape_cast %157 : vector<32xf32> to vector<32x1xf32>
    %159 = tpu.reciprocal %158 {approx = true} : vector<32x1xf32> -> vector<32x1xf32>
    %160 = vector.broadcast %159 : vector<32x1xf32> to vector<32x32xf32>
    %161 = arith.mulf %156, %160 : vector<32x32xf32>
    %162 = arith.truncf %161 : vector<32x32xf32> to vector<32x32xbf16>
    %163 = vector.extract_strided_slice %45 {offsets = [0, 24], sizes = [32, 8], strides = [1, 1]} : vector<32x32xbf16> to vector<32x8xbf16>
    %cst_67 = arith.constant dense<0.000000e+00> : vector<32x8xf32>
    %164 = tpu.matmul %162, %163, %cst_67 {dimension_numbers = #tpu.dot_dimension_numbers<[1], [0], [0], [1], [0, 0, 1, 1], [], []>} : vector<32x32xbf16>, vector<32x8xbf16>, vector<32x8xf32> -> vector<32x8xf32>
    %c0_68 = arith.constant 0 : index
    %c24 = arith.constant 24 : index
    %165 = vector.load %arg10[%c0_68, %c24] : memref<32x32xf32, #tpu.memory_space<vmem>>, vector<32x8xf32>
    tpu.vector_store %arg10[%c0_68, %c24], %164 {strides = array<i32>} : memref<32x32xf32, #tpu.memory_space<vmem>>, vector<32x8xf32>,
    %c0_69 = arith.constant 0 : index
    %c0_70 = arith.constant 0 : index
    %166 = vector.load %arg10[%c0_69, %c0_70] : memref<32x32xf32, #tpu.memory_space<vmem>>, vector<32x32xf32>
    %167 = arith.truncf %166 : vector<32x32xf32> to vector<32x32xbf16>
    %cst_71 = arith.constant dense<0.000000e+00> : vector<32x32xf32>
    %168 = tpu.matmul %167, %41, %cst_71 {dimension_numbers = #tpu.dot_dimension_numbers<[1], [0], [0], [1], [0, 0, 1, 1], [], []>} : vector<32x32xbf16>, vector<32x32xbf16>, vector<32x32xf32> -> vector<32x32xf32>
    %169 = vector.broadcast %42 : vector<1x32xf32> to vector<32x32xf32>
    %170 = arith.addf %168, %169 : vector<32x32xf32>
    %171 = arith.addf %1, %170 : vector<32x32xf32>
    %c0_72 = arith.constant 0 : index
    %c0_73 = arith.constant 0 : index
    %c0_74 = arith.constant 0 : index
    %172 = vector.load %arg9[%c0_72, %c0_73, %c0_74] : memref<1x32x32xf32, #tpu.memory_space<vmem>>, vector<1x32x32xf32>
    %173 = vector.shape_cast %172 : vector<1x32x32xf32> to vector<32x32xf32>
    %174 = vector.shape_cast %171 : vector<32x32xf32> to vector<1x32x32xf32>
    tpu.vector_store %arg9[%c0_72, %c0_73, %c0_74], %174 {strides = array<i32>} : memref<1x32x32xf32, #tpu.memory_space<vmem>>, vector<1x32x32xf32>,
    return
  }
  func.func @transform_0(%arg0: i32) -> (i32, i32, i32) {
    %c0_i32 = arith.constant 0 : i32
    %c0_i32_0 = arith.constant 0 : i32
    %c0_i32_1 = arith.constant 0 : i32
    return %arg0, %c0_i32, %c0_i32_0 : i32, i32, i32
  }
  func.func @transform_1(%arg0: i32) -> (i32, i32) {
    %c0_i32 = arith.constant 0 : i32
    %c0_i32_0 = arith.constant 0 : i32
    %c0_i32_1 = arith.constant 0 : i32
    return %c0_i32, %c0_i32_0 : i32, i32
  }
  func.func @transform_2(%arg0: i32) -> (i32, i32) {
    %c0_i32 = arith.constant 0 : i32
    %c0_i32_0 = arith.constant 0 : i32
    %c0_i32_1 = arith.constant 0 : i32
    return %c0_i32, %c0_i32_0 : i32, i32
  }
  func.func @transform_3(%arg0: i32) -> (i32, i32) {
    %c0_i32 = arith.constant 0 : i32
    %c0_i32_0 = arith.constant 0 : i32
    %c0_i32_1 = arith.constant 0 : i32
    return %c0_i32, %c0_i32_0 : i32, i32
  }
  func.func @transform_4(%arg0: i32) -> (i32, i32) {
    %c0_i32 = arith.constant 0 : i32
    %c0_i32_0 = arith.constant 0 : i32
    %c0_i32_1 = arith.constant 0 : i32
    return %c0_i32, %c0_i32_0 : i32, i32
  }
  func.func @transform_5(%arg0: i32) -> (i32, i32) {
    %c0_i32 = arith.constant 0 : i32
    %c0_i32_0 = arith.constant 0 : i32
    %c0_i32_1 = arith.constant 0 : i32
    return %c0_i32, %c0_i32_0 : i32, i32
  }
  func.func @transform_6(%arg0: i32) -> (i32, i32) {
    %c0_i32 = arith.constant 0 : i32
    %c0_i32_0 = arith.constant 0 : i32
    %c0_i32_1 = arith.constant 0 : i32
    return %c0_i32, %c0_i32_0 : i32, i32
  }
  func.func @transform_7(%arg0: i32) -> (i32, i32) {
    %c0_i32 = arith.constant 0 : i32
    %c0_i32_0 = arith.constant 0 : i32
    %c0_i32_1 = arith.constant 0 : i32
    return %c0_i32, %c0_i32_0 : i32, i32
  }
  func.func @transform_8(%arg0: i32) -> (i32, i32, i32) {
    %c0_i32 = arith.constant 0 : i32
    %c0_i32_0 = arith.constant 0 : i32
    %c0_i32_1 = arith.constant 0 : i32
    return %arg0, %c0_i32, %c0_i32_0 : i32, i32, i32
  }
}

module attributes {stable_mosaic.version = 11 : i64} {
  func.func @_self_attn_kernel(%arg0: i32, %arg1: memref<1x32x32xf32, #tpu.memory_space<vmem>>, %arg2: memref<1x32xi32, #tpu.memory_space<vmem>>, %arg3: memref<1x32xf32, #tpu.memory_space<vmem>>, %arg4: memref<1x32xf32, #tpu.memory_space<vmem>>, %arg5: memref<32x96xbf16, #tpu.memory_space<vmem>>, %arg6: memref<1x96xf32, #tpu.memory_space<vmem>>, %arg7: memref<32x32xbf16, #tpu.memory_space<vmem>>, %arg8: memref<1x32xf32, #tpu.memory_space<vmem>>, %arg9: memref<1x32x32xf32, #tpu.memory_space<vmem>>, %arg10: memref<32x32xf32, #tpu.memory_space<vmem>>) attributes {dimension_semantics = [#tpu.dimension_semantics<parallel>], iteration_bounds = array<i64: 2>, scalar_prefetch = 0 : i64, scratch_operands = 1 : i64, tpu.core_type = #tpu.core_type<tc>, window_params = [{transform_indices = @transform_0, window_bounds = array<i64: 1, 32, 32>}, {pipeline_mode = #tpu.pipeline_mode<synchronous>, transform_indices = @transform_1, window_bounds = array<i64: 1, 32>}, {pipeline_mode = #tpu.pipeline_mode<synchronous>, transform_indices = @transform_2, window_bounds = array<i64: 1, 32>}, {pipeline_mode = #tpu.pipeline_mode<synchronous>, transform_indices = @transform_3, window_bounds = array<i64: 1, 32>}, {pipeline_mode = #tpu.pipeline_mode<synchronous>, transform_indices = @transform_4, window_bounds = array<i64: 32, 96>}, {pipeline_mode = #tpu.pipeline_mode<synchronous>, transform_indices = @transform_5, window_bounds = array<i64: 1, 96>}, {pipeline_mode = #tpu.pipeline_mode<synchronous>, transform_indices = @transform_6, window_bounds = array<i64: 32, 32>}, {pipeline_mode = #tpu.pipeline_mode<synchronous>, transform_indices = @transform_7, window_bounds = array<i64: 1, 32>}, {transform_indices = @transform_8, window_bounds = array<i64: 1, 32, 32>}]} {
    %c0 = arith.constant 0 : index
    %c0_0 = arith.constant 0 : index
    %c0_1 = arith.constant 0 : index
    %0 = vector.load %arg1[%c0, %c0_0, %c0_1] : memref<1x32x32xf32, #tpu.memory_space<vmem>>, vector<1x32x32xf32>
    %1 = vector.shape_cast %0 : vector<1x32x32xf32> to vector<32x32xf32>
    %c0_2 = arith.constant 0 : index
    %c0_3 = arith.constant 0 : index
    %2 = vector.load %arg3[%c0_2, %c0_3] : memref<1x32xf32, #tpu.memory_space<vmem>>, vector<1x32xf32>
    %c0_4 = arith.constant 0 : index
    %c0_5 = arith.constant 0 : index
    %3 = vector.load %arg4[%c0_4, %c0_5] : memref<1x32xf32, #tpu.memory_space<vmem>>, vector<1x32xf32>
    %cst = arith.constant dense<0.000000e+00> : vector<32xf32>
    %4 = vector.multi_reduction <add>, %1, %cst [1] : vector<32x32xf32> to vector<32xf32>
    %5 = vector.shape_cast %4 : vector<32xf32> to vector<32x1xf32>
    %cst_6 = arith.constant 3.200000e+01 : f32
    %6 = vector.broadcast %cst_6 : f32 to vector<32x1xf32>
    %7 = arith.divf %5, %6 : vector<32x1xf32>
    %8 = vector.broadcast %7 : vector<32x1xf32> to vector<32x32xf32>
    %9 = arith.subf %1, %8 : vector<32x32xf32>
    %10 = arith.mulf %9, %9 : vector<32x32xf32>
    %cst_7 = arith.constant dense<0.000000e+00> : vector<32xf32>
    %11 = vector.multi_reduction <add>, %10, %cst_7 [1] : vector<32x32xf32> to vector<32xf32>
    %12 = vector.shape_cast %11 : vector<32xf32> to vector<32x1xf32>
    %cst_8 = arith.constant 3.200000e+01 : f32
    %13 = vector.broadcast %cst_8 : f32 to vector<32x1xf32>
    %14 = arith.divf %12, %13 : vector<32x1xf32>
    %cst_9 = arith.constant 9.99999974E-6 : f32
    %15 = vector.broadcast %cst_9 : f32 to vector<32x1xf32>
    %16 = arith.addf %14, %15 : vector<32x1xf32>
    %17 = math.rsqrt %16 : vector<32x1xf32>
    %18 = vector.broadcast %17 : vector<32x1xf32> to vector<32x32xf32>
    %19 = arith.mulf %9, %18 : vector<32x32xf32>
    %20 = vector.broadcast %2 : vector<1x32xf32> to vector<32x32xf32>
    %21 = arith.mulf %19, %20 : vector<32x32xf32>
    %22 = vector.broadcast %3 : vector<1x32xf32> to vector<32x32xf32>
    %23 = arith.addf %21, %22 : vector<32x32xf32>
    %24 = arith.truncf %23 : vector<32x32xf32> to vector<32x32xbf16>
    %c0_10 = arith.constant 0 : index
    %c0_11 = arith.constant 0 : index
    %25 = vector.load %arg5[%c0_10, %c0_11] : memref<32x96xbf16, #tpu.memory_space<vmem>>, vector<32x96xbf16>
    %cst_12 = arith.constant dense<0.000000e+00> : vector<32x96xf32>
    %26 = tpu.matmul %24, %25, %cst_12 {dimension_numbers = #tpu.dot_dimension_numbers<[1], [0], [0], [1], [0, 0, 1, 1], [], []>} : vector<32x32xbf16>, vector<32x96xbf16>, vector<32x96xf32> -> vector<32x96xf32>
    %c0_13 = arith.constant 0 : index
    %c0_14 = arith.constant 0 : index
    %27 = vector.load %arg6[%c0_13, %c0_14] : memref<1x96xf32, #tpu.memory_space<vmem>>, vector<1x96xf32>
    %28 = vector.broadcast %27 : vector<1x96xf32> to vector<32x96xf32>
    %29 = arith.addf %26, %28 : vector<32x96xf32>
    %30 = vector.extract_strided_slice %29 {offsets = [0, 0], sizes = [32, 32], strides = [1, 1]} : vector<32x96xf32> to vector<32x32xf32>
    %cst_15 = arith.constant 0.353553385 : f32
    %31 = vector.broadcast %cst_15 : f32 to vector<32x32xf32>
    %32 = arith.mulf %30, %31 : vector<32x32xf32>
    %33 = vector.extract_strided_slice %29 {offsets = [0, 32], sizes = [32, 32], strides = [1, 1]} : vector<32x96xf32> to vector<32x32xf32>
    %34 = vector.extract_strided_slice %29 {offsets = [0, 64], sizes = [32, 32], strides = [1, 1]} : vector<32x96xf32> to vector<32x32xf32>
    %35 = tpu.iota {dimensions = array<i32: 0>} : vector<32x32xi32>
    %36 = tpu.iota {dimensions = array<i32: 1>} : vector<32x32xi32>
    %37 = arith.cmpi sgt, %36, %35 : vector<32x32xi32>
    %c0_16 = arith.constant 0 : index
    %c0_17 = arith.constant 0 : index
    %38 = vector.load %arg2[%c0_16, %c0_17] : memref<1x32xi32, #tpu.memory_space<vmem>>, vector<1x32xi32>
    %c0_i32 = arith.constant 0 : i32
    %39 = vector.broadcast %c0_i32 : i32 to vector<1x32xi32>
    %40 = arith.cmpi sgt, %38, %39 : vector<1x32xi32>
    %c0_18 = arith.constant 0 : index
    %c0_19 = arith.constant 0 : index
    %41 = vector.load %arg7[%c0_18, %c0_19] : memref<32x32xbf16, #tpu.memory_space<vmem>>, vector<32x32xbf16>
    %c0_20 = arith.constant 0 : index
    %c0_21 = arith.constant 0 : index
    %42 = vector.load %arg8[%c0_20, %c0_21] : memref<1x32xf32, #tpu.memory_space<vmem>>, vector<1x32xf32>
    %43 = arith.truncf %32 : vector<32x32xf32> to vector<32x32xbf16>
    %44 = arith.truncf %33 : vector<32x32xf32> to vector<32x32xbf16>
    %45 = arith.truncf %34 : vector<32x32xf32> to vector<32x32xbf16>
    %46 = vector.extract_strided_slice %43 {offsets = [0, 0], sizes = [32, 8], strides = [1, 1]} : vector<32x32xbf16> to vector<32x8xbf16>
    %47 = vector.extract_strided_slice %44 {offsets = [0, 0], sizes = [32, 8], strides = [1, 1]} : vector<32x32xbf16> to vector<32x8xbf16>
    %cst_22 = arith.constant dense<0.000000e+00> : vector<32x32xf32>
    %48 = tpu.matmul %46, %47, %cst_22 {dimension_numbers = #tpu.dot_dimension_numbers<[1], [1], [0], [0], [0, 0, 1, 0], [], []>} : vector<32x8xbf16>, vector<32x8xbf16>, vector<32x32xf32> -> vector<32x32xf32>
    %cst_23 = arith.constant -1.000000e+30 : f32
    %49 = vector.broadcast %cst_23 : f32 to vector<32x32xf32>
    %50 = arith.select %37, %49, %48 : vector<32x32xi1>, vector<32x32xf32>
    %cst_24 = arith.constant dense<0xFF800000> : vector<32xf32>
    %51 = vector.multi_reduction <maximumf>, %50, %cst_24 [1] : vector<32x32xf32> to vector<32xf32>
    %52 = vector.shape_cast %51 : vector<32xf32> to vector<32x1xf32>
    %53 = vector.broadcast %52 : vector<32x1xf32> to vector<32x32xf32>
    %54 = arith.subf %50, %53 : vector<32x32xf32>
    %55 = math.exp %54 : vector<32x32xf32>
    %cst_25 = arith.constant 0.000000e+00 : f32
    %56 = vector.broadcast %cst_25 : f32 to vector<32x1xf32>
    %cst_26 = arith.constant 1.000000e+00 : f32
    %57 = vector.broadcast %cst_26 : f32 to vector<32x1xf32>
    %c0_i32_27 = arith.constant 0 : i32
    %c30_i32 = arith.constant 30 : i32
    %58 = arith.addi %c0_i32_27, %c30_i32 : i32
    %c1_i32 = arith.constant 1 : i32
    %59:2 = scf.for %arg11 = %c0_i32_27 to %58 step %c1_i32 iter_args(%arg12 = %56, %arg13 = %57) -> (vector<32x1xf32>, vector<32x1xf32>)  : i32 {
      %175 = arith.addf %arg12, %arg13 : vector<32x1xf32>
      %cst_75 = arith.constant 5.000000e-01 : f32
      %176 = vector.broadcast %cst_75 : f32 to vector<32x1xf32>
      %177 = arith.mulf %176, %175 : vector<32x1xf32>
      %178 = vector.broadcast %177 : vector<32x1xf32> to vector<32x32xf32>
      %179 = arith.cmpf oge, %55, %178 : vector<32x32xf32>
      %180 = arith.extui %179 : vector<32x32xi1> to vector<32x32xi32>
      %181 = arith.sitofp %180 : vector<32x32xi32> to vector<32x32xf32>
      %cst_76 = arith.constant dense<0.000000e+00> : vector<32xf32>
      %182 = vector.multi_reduction <add>, %181, %cst_76 [1] : vector<32x32xf32> to vector<32xf32>
      %183 = vector.shape_cast %182 : vector<32xf32> to vector<32x1xf32>
      %cst_77 = arith.constant 2.000000e+00 : f32
      %184 = vector.broadcast %cst_77 : f32 to vector<32x1xf32>
      %185 = arith.cmpf oge, %183, %184 : vector<32x1xf32>
      %186 = arith.select %185, %177, %arg12 : vector<32x1xi1>, vector<32x1xf32>
      %187 = arith.select %185, %arg13, %177 : vector<32x1xi1>, vector<32x1xf32>
      scf.yield %186, %187 : vector<32x1xf32>, vector<32x1xf32>
    }
    %60 = vector.broadcast %59#0 : vector<32x1xf32> to vector<32x32xf32>
    %61 = arith.cmpf oge, %55, %60 : vector<32x32xf32>
    %62 = vector.broadcast %40 : vector<1x32xi1> to vector<32x32xi1>
    %63 = arith.ori %62, %61 : vector<32x32xi1>
    %cst_28 = arith.constant 1.200000e+00 : f32
    %64 = vector.broadcast %cst_28 : f32 to vector<32x32xf32>
    %65 = arith.mulf %55, %64 : vector<32x32xf32>
    %66 = arith.select %63, %65, %55 : vector<32x32xi1>, vector<32x32xf32>
    %cst_29 = arith.constant dense<0.000000e+00> : vector<32xf32>
    %67 = vector.multi_reduction <add>, %66, %cst_29 [1] : vector<32x32xf32> to vector<32xf32>
    %68 = vector.shape_cast %67 : vector<32xf32> to vector<32x1xf32>
    %69 = tpu.reciprocal %68 {approx = true} : vector<32x1xf32> -> vector<32x1xf32>
    %70 = vector.broadcast %69 : vector<32x1xf32> to vector<32x32xf32>
    %71 = arith.mulf %66, %70 : vector<32x32xf32>
    %72 = arith.truncf %71 : vector<32x32xf32> to vector<32x32xbf16>
    %73 = vector.extract_strided_slice %45 {offsets = [0, 0], sizes = [32, 8], strides = [1, 1]} : vector<32x32xbf16> to vector<32x8xbf16>
    %cst_30 = arith.constant dense<0.000000e+00> : vector<32x8xf32>
    %74 = tpu.matmul %72, %73, %cst_30 {dimension_numbers = #tpu.dot_dimension_numbers<[1], [0], [0], [1], [0, 0, 1, 1], [], []>} : vector<32x32xbf16>, vector<32x8xbf16>, vector<32x8xf32> -> vector<32x8xf32>
    %c0_31 = arith.constant 0 : index
    %c0_32 = arith.constant 0 : index
    %75 = vector.load %arg10[%c0_31, %c0_32] : memref<32x32xf32, #tpu.memory_space<vmem>>, vector<32x8xf32>
    tpu.vector_store %arg10[%c0_31, %c0_32], %74 {strides = array<i32>} : memref<32x32xf32, #tpu.memory_space<vmem>>, vector<32x8xf32>,
    %76 = vector.extract_strided_slice %43 {offsets = [0, 8], sizes = [32, 8], strides = [1, 1]} : vector<32x32xbf16> to vector<32x8xbf16>
    %77 = vector.extract_strided_slice %44 {offsets = [0, 8], sizes = [32, 8], strides = [1, 1]} : vector<32x32xbf16> to vector<32x8xbf16>
    %cst_33 = arith.constant dense<0.000000e+00> : vector<32x32xf32>
    %78 = tpu.matmul %76, %77, %cst_33 {dimension_numbers = #tpu.dot_dimension_numbers<[1], [1], [0], [0], [0, 0, 1, 0], [], []>} : vector<32x8xbf16>, vector<32x8xbf16>, vector<32x32xf32> -> vector<32x32xf32>
    %cst_34 = arith.constant -1.000000e+30 : f32
    %79 = vector.broadcast %cst_34 : f32 to vector<32x32xf32>
    %80 = arith.select %37, %79, %78 : vector<32x32xi1>, vector<32x32xf32>
    %cst_35 = arith.constant dense<0xFF800000> : vector<32xf32>
    %81 = vector.multi_reduction <maximumf>, %80, %cst_35 [1] : vector<32x32xf32> to vector<32xf32>
    %82 = vector.shape_cast %81 : vector<32xf32> to vector<32x1xf32>
    %83 = vector.broadcast %82 : vector<32x1xf32> to vector<32x32xf32>
    %84 = arith.subf %80, %83 : vector<32x32xf32>
    %85 = math.exp %84 : vector<32x32xf32>
    %cst_36 = arith.constant 0.000000e+00 : f32
    %86 = vector.broadcast %cst_36 : f32 to vector<32x1xf32>
    %cst_37 = arith.constant 1.000000e+00 : f32
    %87 = vector.broadcast %cst_37 : f32 to vector<32x1xf32>
    %c0_i32_38 = arith.constant 0 : i32
    %c30_i32_39 = arith.constant 30 : i32
    %88 = arith.addi %c0_i32_38, %c30_i32_39 : i32
    %c1_i32_40 = arith.constant 1 : i32
    %89:2 = scf.for %arg11 = %c0_i32_38 to %88 step %c1_i32_40 iter_args(%arg12 = %86, %arg13 = %87) -> (vector<32x1xf32>, vector<32x1xf32>)  : i32 {
      %175 = arith.addf %arg12, %arg13 : vector<32x1xf32>
      %cst_75 = arith.constant 5.000000e-01 : f32
      %176 = vector.broadcast %cst_75 : f32 to vector<32x1xf32>
      %177 = arith.mulf %176, %175 : vector<32x1xf32>
      %178 = vector.broadcast %177 : vector<32x1xf32> to vector<32x32xf32>
      %179 = arith.cmpf oge, %85, %178 : vector<32x32xf32>
      %180 = arith.extui %179 : vector<32x32xi1> to vector<32x32xi32>
      %181 = arith.sitofp %180 : vector<32x32xi32> to vector<32x32xf32>
      %cst_76 = arith.constant dense<0.000000e+00> : vector<32xf32>
      %182 = vector.multi_reduction <add>, %181, %cst_76 [1] : vector<32x32xf32> to vector<32xf32>
      %183 = vector.shape_cast %182 : vector<32xf32> to vector<32x1xf32>
      %cst_77 = arith.constant 2.000000e+00 : f32
      %184 = vector.broadcast %cst_77 : f32 to vector<32x1xf32>
      %185 = arith.cmpf oge, %183, %184 : vector<32x1xf32>
      %186 = arith.select %185, %177, %arg12 : vector<32x1xi1>, vector<32x1xf32>
      %187 = arith.select %185, %arg13, %177 : vector<32x1xi1>, vector<32x1xf32>
      scf.yield %186, %187 : vector<32x1xf32>, vector<32x1xf32>
    }
    %90 = vector.broadcast %89#0 : vector<32x1xf32> to vector<32x32xf32>
    %91 = arith.cmpf oge, %85, %90 : vector<32x32xf32>
    %92 = vector.broadcast %40 : vector<1x32xi1> to vector<32x32xi1>
    %93 = arith.ori %92, %91 : vector<32x32xi1>
    %cst_41 = arith.constant 1.200000e+00 : f32
    %94 = vector.broadcast %cst_41 : f32 to vector<32x32xf32>
    %95 = arith.mulf %85, %94 : vector<32x32xf32>
    %96 = arith.select %93, %95, %85 : vector<32x32xi1>, vector<32x32xf32>
    %cst_42 = arith.constant dense<0.000000e+00> : vector<32xf32>
    %97 = vector.multi_reduction <add>, %96, %cst_42 [1] : vector<32x32xf32> to vector<32xf32>
    %98 = vector.shape_cast %97 : vector<32xf32> to vector<32x1xf32>
    %99 = tpu.reciprocal %98 {approx = true} : vector<32x1xf32> -> vector<32x1xf32>
    %100 = vector.broadcast %99 : vector<32x1xf32> to vector<32x32xf32>
    %101 = arith.mulf %96, %100 : vector<32x32xf32>
    %102 = arith.truncf %101 : vector<32x32xf32> to vector<32x32xbf16>
    %103 = vector.extract_strided_slice %45 {offsets = [0, 8], sizes = [32, 8], strides = [1, 1]} : vector<32x32xbf16> to vector<32x8xbf16>
    %cst_43 = arith.constant dense<0.000000e+00> : vector<32x8xf32>
    %104 = tpu.matmul %102, %103, %cst_43 {dimension_numbers = #tpu.dot_dimension_numbers<[1], [0], [0], [1], [0, 0, 1, 1], [], []>} : vector<32x32xbf16>, vector<32x8xbf16>, vector<32x8xf32> -> vector<32x8xf32>
    %c0_44 = arith.constant 0 : index
    %c8 = arith.constant 8 : index
    %105 = vector.load %arg10[%c0_44, %c8] : memref<32x32xf32, #tpu.memory_space<vmem>>, vector<32x8xf32>
    tpu.vector_store %arg10[%c0_44, %c8], %104 {strides = array<i32>} : memref<32x32xf32, #tpu.memory_space<vmem>>, vector<32x8xf32>,
    %106 = vector.extract_strided_slice %43 {offsets = [0, 16], sizes = [32, 8], strides = [1, 1]} : vector<32x32xbf16> to vector<32x8xbf16>
    %107 = vector.extract_strided_slice %44 {offsets = [0, 16], sizes = [32, 8], strides = [1, 1]} : vector<32x32xbf16> to vector<32x8xbf16>
    %cst_45 = arith.constant dense<0.000000e+00> : vector<32x32xf32>
    %108 = tpu.matmul %106, %107, %cst_45 {dimension_numbers = #tpu.dot_dimension_numbers<[1], [1], [0], [0], [0, 0, 1, 0], [], []>} : vector<32x8xbf16>, vector<32x8xbf16>, vector<32x32xf32> -> vector<32x32xf32>
    %cst_46 = arith.constant -1.000000e+30 : f32
    %109 = vector.broadcast %cst_46 : f32 to vector<32x32xf32>
    %110 = arith.select %37, %109, %108 : vector<32x32xi1>, vector<32x32xf32>
    %cst_47 = arith.constant dense<0xFF800000> : vector<32xf32>
    %111 = vector.multi_reduction <maximumf>, %110, %cst_47 [1] : vector<32x32xf32> to vector<32xf32>
    %112 = vector.shape_cast %111 : vector<32xf32> to vector<32x1xf32>
    %113 = vector.broadcast %112 : vector<32x1xf32> to vector<32x32xf32>
    %114 = arith.subf %110, %113 : vector<32x32xf32>
    %115 = math.exp %114 : vector<32x32xf32>
    %cst_48 = arith.constant 0.000000e+00 : f32
    %116 = vector.broadcast %cst_48 : f32 to vector<32x1xf32>
    %cst_49 = arith.constant 1.000000e+00 : f32
    %117 = vector.broadcast %cst_49 : f32 to vector<32x1xf32>
    %c0_i32_50 = arith.constant 0 : i32
    %c30_i32_51 = arith.constant 30 : i32
    %118 = arith.addi %c0_i32_50, %c30_i32_51 : i32
    %c1_i32_52 = arith.constant 1 : i32
    %119:2 = scf.for %arg11 = %c0_i32_50 to %118 step %c1_i32_52 iter_args(%arg12 = %116, %arg13 = %117) -> (vector<32x1xf32>, vector<32x1xf32>)  : i32 {
      %175 = arith.addf %arg12, %arg13 : vector<32x1xf32>
      %cst_75 = arith.constant 5.000000e-01 : f32
      %176 = vector.broadcast %cst_75 : f32 to vector<32x1xf32>
      %177 = arith.mulf %176, %175 : vector<32x1xf32>
      %178 = vector.broadcast %177 : vector<32x1xf32> to vector<32x32xf32>
      %179 = arith.cmpf oge, %115, %178 : vector<32x32xf32>
      %180 = arith.extui %179 : vector<32x32xi1> to vector<32x32xi32>
      %181 = arith.sitofp %180 : vector<32x32xi32> to vector<32x32xf32>
      %cst_76 = arith.constant dense<0.000000e+00> : vector<32xf32>
      %182 = vector.multi_reduction <add>, %181, %cst_76 [1] : vector<32x32xf32> to vector<32xf32>
      %183 = vector.shape_cast %182 : vector<32xf32> to vector<32x1xf32>
      %cst_77 = arith.constant 2.000000e+00 : f32
      %184 = vector.broadcast %cst_77 : f32 to vector<32x1xf32>
      %185 = arith.cmpf oge, %183, %184 : vector<32x1xf32>
      %186 = arith.select %185, %177, %arg12 : vector<32x1xi1>, vector<32x1xf32>
      %187 = arith.select %185, %arg13, %177 : vector<32x1xi1>, vector<32x1xf32>
      scf.yield %186, %187 : vector<32x1xf32>, vector<32x1xf32>
    }
    %120 = vector.broadcast %119#0 : vector<32x1xf32> to vector<32x32xf32>
    %121 = arith.cmpf oge, %115, %120 : vector<32x32xf32>
    %122 = vector.broadcast %40 : vector<1x32xi1> to vector<32x32xi1>
    %123 = arith.ori %122, %121 : vector<32x32xi1>
    %cst_53 = arith.constant 1.200000e+00 : f32
    %124 = vector.broadcast %cst_53 : f32 to vector<32x32xf32>
    %125 = arith.mulf %115, %124 : vector<32x32xf32>
    %126 = arith.select %123, %125, %115 : vector<32x32xi1>, vector<32x32xf32>
    %cst_54 = arith.constant dense<0.000000e+00> : vector<32xf32>
    %127 = vector.multi_reduction <add>, %126, %cst_54 [1] : vector<32x32xf32> to vector<32xf32>
    %128 = vector.shape_cast %127 : vector<32xf32> to vector<32x1xf32>
    %129 = tpu.reciprocal %128 {approx = true} : vector<32x1xf32> -> vector<32x1xf32>
    %130 = vector.broadcast %129 : vector<32x1xf32> to vector<32x32xf32>
    %131 = arith.mulf %126, %130 : vector<32x32xf32>
    %132 = arith.truncf %131 : vector<32x32xf32> to vector<32x32xbf16>
    %133 = vector.extract_strided_slice %45 {offsets = [0, 16], sizes = [32, 8], strides = [1, 1]} : vector<32x32xbf16> to vector<32x8xbf16>
    %cst_55 = arith.constant dense<0.000000e+00> : vector<32x8xf32>
    %134 = tpu.matmul %132, %133, %cst_55 {dimension_numbers = #tpu.dot_dimension_numbers<[1], [0], [0], [1], [0, 0, 1, 1], [], []>} : vector<32x32xbf16>, vector<32x8xbf16>, vector<32x8xf32> -> vector<32x8xf32>
    %c0_56 = arith.constant 0 : index
    %c16 = arith.constant 16 : index
    %135 = vector.load %arg10[%c0_56, %c16] : memref<32x32xf32, #tpu.memory_space<vmem>>, vector<32x8xf32>
    tpu.vector_store %arg10[%c0_56, %c16], %134 {strides = array<i32>} : memref<32x32xf32, #tpu.memory_space<vmem>>, vector<32x8xf32>,
    %136 = vector.extract_strided_slice %43 {offsets = [0, 24], sizes = [32, 8], strides = [1, 1]} : vector<32x32xbf16> to vector<32x8xbf16>
    %137 = vector.extract_strided_slice %44 {offsets = [0, 24], sizes = [32, 8], strides = [1, 1]} : vector<32x32xbf16> to vector<32x8xbf16>
    %cst_57 = arith.constant dense<0.000000e+00> : vector<32x32xf32>
    %138 = tpu.matmul %136, %137, %cst_57 {dimension_numbers = #tpu.dot_dimension_numbers<[1], [1], [0], [0], [0, 0, 1, 0], [], []>} : vector<32x8xbf16>, vector<32x8xbf16>, vector<32x32xf32> -> vector<32x32xf32>
    %cst_58 = arith.constant -1.000000e+30 : f32
    %139 = vector.broadcast %cst_58 : f32 to vector<32x32xf32>
    %140 = arith.select %37, %139, %138 : vector<32x32xi1>, vector<32x32xf32>
    %cst_59 = arith.constant dense<0xFF800000> : vector<32xf32>
    %141 = vector.multi_reduction <maximumf>, %140, %cst_59 [1] : vector<32x32xf32> to vector<32xf32>
    %142 = vector.shape_cast %141 : vector<32xf32> to vector<32x1xf32>
    %143 = vector.broadcast %142 : vector<32x1xf32> to vector<32x32xf32>
    %144 = arith.subf %140, %143 : vector<32x32xf32>
    %145 = math.exp %144 : vector<32x32xf32>
    %cst_60 = arith.constant 0.000000e+00 : f32
    %146 = vector.broadcast %cst_60 : f32 to vector<32x1xf32>
    %cst_61 = arith.constant 1.000000e+00 : f32
    %147 = vector.broadcast %cst_61 : f32 to vector<32x1xf32>
    %c0_i32_62 = arith.constant 0 : i32
    %c30_i32_63 = arith.constant 30 : i32
    %148 = arith.addi %c0_i32_62, %c30_i32_63 : i32
    %c1_i32_64 = arith.constant 1 : i32
    %149:2 = scf.for %arg11 = %c0_i32_62 to %148 step %c1_i32_64 iter_args(%arg12 = %146, %arg13 = %147) -> (vector<32x1xf32>, vector<32x1xf32>)  : i32 {
      %175 = arith.addf %arg12, %arg13 : vector<32x1xf32>
      %cst_75 = arith.constant 5.000000e-01 : f32
      %176 = vector.broadcast %cst_75 : f32 to vector<32x1xf32>
      %177 = arith.mulf %176, %175 : vector<32x1xf32>
      %178 = vector.broadcast %177 : vector<32x1xf32> to vector<32x32xf32>
      %179 = arith.cmpf oge, %145, %178 : vector<32x32xf32>
      %180 = arith.extui %179 : vector<32x32xi1> to vector<32x32xi32>
      %181 = arith.sitofp %180 : vector<32x32xi32> to vector<32x32xf32>
      %cst_76 = arith.constant dense<0.000000e+00> : vector<32xf32>
      %182 = vector.multi_reduction <add>, %181, %cst_76 [1] : vector<32x32xf32> to vector<32xf32>
      %183 = vector.shape_cast %182 : vector<32xf32> to vector<32x1xf32>
      %cst_77 = arith.constant 2.000000e+00 : f32
      %184 = vector.broadcast %cst_77 : f32 to vector<32x1xf32>
      %185 = arith.cmpf oge, %183, %184 : vector<32x1xf32>
      %186 = arith.select %185, %177, %arg12 : vector<32x1xi1>, vector<32x1xf32>
      %187 = arith.select %185, %arg13, %177 : vector<32x1xi1>, vector<32x1xf32>
      scf.yield %186, %187 : vector<32x1xf32>, vector<32x1xf32>
    }
    %150 = vector.broadcast %149#0 : vector<32x1xf32> to vector<32x32xf32>
    %151 = arith.cmpf oge, %145, %150 : vector<32x32xf32>
    %152 = vector.broadcast %40 : vector<1x32xi1> to vector<32x32xi1>
    %153 = arith.ori %152, %151 : vector<32x32xi1>
    %cst_65 = arith.constant 1.200000e+00 : f32
    %154 = vector.broadcast %cst_65 : f32 to vector<32x32xf32>
    %155 = arith.mulf %145, %154 : vector<32x32xf32>
    %156 = arith.select %153, %155, %145 : vector<32x32xi1>, vector<32x32xf32>
    %cst_66 = arith.constant dense<0.000000e+00> : vector<32xf32>
    %157 = vector.multi_reduction <add>, %156, %cst_66 [1] : vector<32x32xf32> to vector<32xf32>
    %158 = vector.shape_cast %157 : vector<32xf32> to vector<32x1xf32>
    %159 = tpu.reciprocal %158 {approx = true} : vector<32x1xf32> -> vector<32x1xf32>
    %160 = vector.broadcast %159 : vector<32x1xf32> to vector<32x32xf32>
    %161 = arith.mulf %156, %160 : vector<32x32xf32>
    %162 = arith.truncf %161 : vector<32x32xf32> to vector<32x32xbf16>
    %163 = vector.extract_strided_slice %45 {offsets = [0, 24], sizes = [32, 8], strides = [1, 1]} : vector<32x32xbf16> to vector<32x8xbf16>
    %cst_67 = arith.constant dense<0.000000e+00> : vector<32x8xf32>
    %164 = tpu.matmul %162, %163, %cst_67 {dimension_numbers = #tpu.dot_dimension_numbers<[1], [0], [0], [1], [0, 0, 1, 1], [], []>} : vector<32x32xbf16>, vector<32x8xbf16>, vector<32x8xf32> -> vector<32x8xf32>
    %c0_68 = arith.constant 0 : index
    %c24 = arith.constant 24 : index
    %165 = vector.load %arg10[%c0_68, %c24] : memref<32x32xf32, #tpu.memory_space<vmem>>, vector<32x8xf32>
    tpu.vector_store %arg10[%c0_68, %c24], %164 {strides = array<i32>} : memref<32x32xf32, #tpu.memory_space<vmem>>, vector<32x8xf32>,
    %c0_69 = arith.constant 0 : index
    %c0_70 = arith.constant 0 : index
    %166 = vector.load %arg10[%c0_69, %c0_70] : memref<32x32xf32, #tpu.memory_space<vmem>>, vector<32x32xf32>
    %167 = arith.truncf %166 : vector<32x32xf32> to vector<32x32xbf16>
    %cst_71 = arith.constant dense<0.000000e+00> : vector<32x32xf32>
    %168 = tpu.matmul %167, %41, %cst_71 {dimension_numbers = #tpu.dot_dimension_numbers<[1], [0], [0], [1], [0, 0, 1, 1], [], []>} : vector<32x32xbf16>, vector<32x32xbf16>, vector<32x32xf32> -> vector<32x32xf32>
    %169 = vector.broadcast %42 : vector<1x32xf32> to vector<32x32xf32>
    %170 = arith.addf %168, %169 : vector<32x32xf32>
    %171 = arith.addf %1, %170 : vector<32x32xf32>
    %c0_72 = arith.constant 0 : index
    %c0_73 = arith.constant 0 : index
    %c0_74 = arith.constant 0 : index
    %172 = vector.load %arg9[%c0_72, %c0_73, %c0_74] : memref<1x32x32xf32, #tpu.memory_space<vmem>>, vector<1x32x32xf32>
    %173 = vector.shape_cast %172 : vector<1x32x32xf32> to vector<32x32xf32>
    %174 = vector.shape_cast %171 : vector<32x32xf32> to vector<1x32x32xf32>
    tpu.vector_store %arg9[%c0_72, %c0_73, %c0_74], %174 {strides = array<i32>} : memref<1x32x32xf32, #tpu.memory_space<vmem>>, vector<1x32x32xf32>,
    return
  }
  func.func @transform_0(%arg0: i32) -> (i32, i32, i32) {
    %c0_i32 = arith.constant 0 : i32
    %c0_i32_0 = arith.constant 0 : i32
    %c0_i32_1 = arith.constant 0 : i32
    return %arg0, %c0_i32, %c0_i32_0 : i32, i32, i32
  }
  func.func @transform_1(%arg0: i32) -> (i32, i32) {
    %c0_i32 = arith.constant 0 : i32
    %c0_i32_0 = arith.constant 0 : i32
    %c0_i32_1 = arith.constant 0 : i32
    return %c0_i32, %c0_i32_0 : i32, i32
  }
  func.func @transform_2(%arg0: i32) -> (i32, i32) {
    %c0_i32 = arith.constant 0 : i32
    %c0_i32_0 = arith.constant 0 : i32
    %c0_i32_1 = arith.constant 0 : i32
    return %c0_i32, %c0_i32_0 : i32, i32
  }
  func.func @transform_3(%arg0: i32) -> (i32, i32) {
    %c0_i32 = arith.constant 0 : i32
    %c0_i32_0 = arith.constant 0 : i32
    %c0_i32_1 = arith.constant 0 : i32
    return %c0_i32, %c0_i32_0 : i32, i32
  }
  func.func @transform_4(%arg0: i32) -> (i32, i32) {
    %c0_i32 = arith.constant 0 : i32
    %c0_i32_0 = arith.constant 0 : i32
    %c0_i32_1 = arith.constant 0 : i32
    return %c0_i32, %c0_i32_0 : i32, i32
  }
  func.func @transform_5(%arg0: i32) -> (i32, i32) {
    %c0_i32 = arith.constant 0 : i32
    %c0_i32_0 = arith.constant 0 : i32
    %c0_i32_1 = arith.constant 0 : i32
    return %c0_i32, %c0_i32_0 : i32, i32
  }
  func.func @transform_6(%arg0: i32) -> (i32, i32) {
    %c0_i32 = arith.constant 0 : i32
    %c0_i32_0 = arith.constant 0 : i32
    %c0_i32_1 = arith.constant 0 : i32
    return %c0_i32, %c0_i32_0 : i32, i32
  }
  func.func @transform_7(%arg0: i32) -> (i32, i32) {
    %c0_i32 = arith.constant 0 : i32
    %c0_i32_0 = arith.constant 0 : i32
    %c0_i32_1 = arith.constant 0 : i32
    return %c0_i32, %c0_i32_0 : i32, i32
  }
  func.func @transform_8(%arg0: i32) -> (i32, i32, i32) {
    %c0_i32 = arith.constant 0 : i32
    %c0_i32_0 = arith.constant 0 : i32
    %c0_i32_1 = arith.constant 0 : i32
    return %arg0, %c0_i32, %c0_i32_0 : i32, i32, i32
  }
}

</mosaic_0001>

<bundles_post_ra>
// kernel: tpu_custom_call.1
= control target key start
LH: loop header
LB: loop body
LE: loop exit
PB: predicated region body
PF: predicated region fallthrough
CT: control target
= control target key end

     0   :  { %13 = vsyncpa [#allocation4], 0  ;;  %s3853_s0 = inlined_call_operand.hbm [shape: f32[2,32,32], index: 0, kind: input, shape index: {}]   ;;  %s3854_s1 = inlined_call_operand.vmem [shape: s32[1,32], index: 1, kind: input, shape index: {}]   ;;  %s3855_s2 = inlined_call_operand.vmem [shape: f32[1,32], index: 2, kind: input, shape index: {}]   ;;  %s3856_s3 = inlined_call_operand.vmem [shape: f32[1,32], index: 3, kind: input, shape index: {}]   ;;  %s3857_s4 = inlined_call_operand.hbm [shape: bf16[32,96], index: 4, kind: input, shape index: {}]   ;;  %s3858_s5 = inlined_call_operand.vmem [shape: f32[1,96], index: 5, kind: input, shape index: {}]   ;;  %s3859_s6 = inlined_call_operand.vmem [shape: bf16[32,32], index: 6, kind: input, shape index: {}]   ;;  %s3860_s7 = inlined_call_operand.vmem [shape: f32[1,32], index: 7, kind: input, shape index: {}]   ;;  %s3861_s8 = inlined_call_operand.hbm [shape: f32[2,32,32], index: 8, kind: output, shape index: {}]  }
   0x1   :  { %15 = vsyncpa [#allocation4 + $0x1], 0 }
   0x2   :  { %16 = vsyncpa [#allocation7], 0 }
   0x3   :  { %17 = vsyncpa [#allocation5], 0 }
   0x4   :  { %19 = vsyncpa [#allocation5 + $0x1], 0  ;;  %s3039_s27 = smov 0   ;;  %s3041_s28 = smov 0  }
   0x5   :  { %s3043_s29 = smov 0   ;;  %s3045_s30 = smov 0  }
   0x6 LB: > { %s3060_s9 = sadd.s32 4294967295, %s2821_s30   ;;  %s1916_s10 = sadd.s32 4294967294, %s2821_s30   ;;  %s2821_s30 = sphi %s3045_s30, %s3897_s30   ;;  %s2817_s29 = sphi %s3043_s29, %s3900_s29   ;;  %s2813_s28 = sphi %s3041_s28, %s3899_s28   ;;  %s2809_s27 = sphi %s3039_s27, %s3898_s27  }
   0x7   : > { %p45_p0 = scmp.ne.s32.totalorder %s2813_s28, %s2809_s27  ;;  %p3862_p1 = scmp.eq.s32.totalorder %s3060_s9, 0 }
   0x8   : > { %p222_p3 = scmp.eq.s32.totalorder %s1916_s10, 1  ;;  %p1917_p5 = scmp.ge.s32.totalorder %s2821_s30, 1 }
   0x9   : > { %p3069_p4 = por %p3862_p1, %p45_p0  ;;  %p229_p7 = scmp.lt.s32.totalorder %s2821_s30, 3 }
   0xa   : > { %p3074_p6 = por %p222_p3, %p45_p0  ;;  %s2967_s14 = smov [#allocation6]  }
   0xb   : > { %s3867_s11 = scalar_select %p3069_p4, 1, 0 }
   0xc   : > { %s3868_s12 = scalar_select %p3074_p6, 1, 0 }
   0xd   : > { %p3079_p8 = pnand %p1917_p5, %p229_p7  ;;  %s250_s15 = sshll.u32 %s2967_s14, 4  ;;  %s3083_s15 = int_to_ptr.vmem [resolvable:$true] %s250_s15 }
   0xe   : > { %s3095_s17 = sadd.s32 1, %s2821_s30   ;;  %s32_s18 = sadd.s32 1, %s2817_s29 }
   0xf   : > { %s3869_s13 = scalar_select %p3079_p8, 1, 0 }
  0x10   : > { %p2114_p9 = pneg %p3079_p8  ;;  %3871 = sst [smem:[#allocation12_spill]] %s3095_s17 }
  0x11   : > { %s29_s19 = ssub.s32 %s2821_s30, %s3095_s17  ;;  %s2549_s22 = scalar_lea.hbm %s3857_s4, 256 }
  0x12   : > { %p3090_p11 = pnand %p2114_p9, %p3862_p1  ;;  %p2550_p12 = scmp.ne.s32.totalorder %s3857_s4, %s2549_s22 }
  0x13   : > { %p2556_p5 = scmp.lt.u32.totalorder %s2549_s22, %s3857_s4 }
  0x14   : > { %p2551_p13 = pneg %p3090_p11 }
  0x16   : > { %p2552_p0 = pnand %p2551_p13, %p2550_p12 }
  0x18   : > { %p2553_p3 = pneg %p2552_p0 }
  0x1a   : > { %p2558_p7 = pnand %p2556_p5, %p2553_p3 }
  0x1c   : > { %2561 = shalt.err (!%p2558_p7)
}
  0x1d   : > { %s2562_s10 = scalar_lea.vmem %s3083_s15, 256  ;;  %p2570_p2 = scmp.lt.s32.totalorder %s3083_s15, %s3083_s15 }
  0x1e   : > { %p2563_p9 = scmp.ne.s32.totalorder %s3083_s15, %s2562_s10  ;;  %p2571_p6 = scmp.lt.s32.totalorder %s2562_s10, %s2562_s10 }
  0x20   : > { %p2565_p10 = pnand %p2563_p9, %p2551_p13  ;;  %p2572_p4 = por %p2571_p6, %p2570_p2 }
  0x22   : > { %p2566_p1 = pneg %p2565_p10 }
  0x24   : > { %p2573_p8 = pnand %p2572_p4, %p2566_p1 }
  0x26   : > { %2576 = shalt.err (!%p2573_p8)
}
  0x27   : > { %s2968_s14 = smov 64   ;;  %s2969_s20 = smov 4  }
  0x28   : > { %2117 = dma.hbm_to_vmem [thread:$0]  (!%p3090_p11), %s3857_s4, 256, %s3083_s15, [#allocation7], %s2968_s14, %s2968_s14, %s2969_s20  }
  0x29   : > { %p30_p2 = scmp.eq.s32.totalorder %s29_s19, 0  ;;  %p39_p1 = scmp.ne.s32.totalorder %s2817_s29, %s2813_s28 }
  0x2a   : > { %p40_p4 = scmp.eq.s32.totalorder %s2821_s30, 0  ;;  %p2127_p6 = scmp.lt.s32.totalorder %s2821_s30, 2 }
  0x2b   : > { %s3126_s23 = scalar_select %p30_p2, %s2817_s29, %s32_s18  }
  0x2c   : > { %p41_p8 = por %p40_p4, %p39_p1  ;;  %p3872_p10 = scmp.eq.s32.totalorder %s3060_s9, 1 }
  0x2d   : > { %s273_s25 = sand.u32 1, %s2817_s29   ;;  %s1976_s26 = sshll.u32 %s2821_s30, 9 }
  0x2e   : > { %p3130_p12 = por %p3872_p10, %p39_p1  ;;  %s1920_s10 = sshll.u32 %s273_s25, 5 }
  0x2f   : > { %s3139_s21 = scalar_lea.hbm %s3853_s0, %s1976_s26  ;;  %s277_s15 = scalar_lea.vmem [#allocation3], %s1920_s10 }
  0x30   : > { %s284_s18 = sshll.u32 %s277_s15, 4  ;;  %p3141_p11 = pnand %p2127_p6, %p41_p8  ;;  %s3145_s18 = int_to_ptr.vmem [resolvable:$true] %s284_s18 }
  0x31   : > { %s3147_s14 = scalar_lea.sflag [#allocation4], %s273_s25  ;;  %s2577_s20 = scalar_lea.hbm %s3139_s21, 512 }
  0x32   : > { %p2578_p13 = scmp.ne.s32.totalorder %s3139_s21, %s2577_s20  ;;  %p2579_p0 = pneg %p3141_p11 }
  0x33   : > { %s2582_s26 = scalar_lea.hbm %s3853_s0, 1024  ;;  %p2583_p7 = scmp.lt.u32.totalorder %s3139_s21, %s3853_s0 }
  0x34   : > { %p2580_p3 = pnand %p2579_p0, %p2578_p13  ;;  %p2584_p9 = scmp.lt.u32.totalorder %s2582_s26, %s2577_s20 }
  0x35   : > { %p2586_p1 = scmp.lt.u32.totalorder %s2577_s20, %s3139_s21 }
  0x36   : > { %p2581_p5 = pneg %p2580_p3  ;;  %p2585_p2 = por %p2584_p9, %p2583_p7 }
  0x38   : > { %p2587_p4 = por %p2586_p1, %p2585_p2 }
  0x3a   : > { %p2588_p6 = pnand %p2587_p4, %p2581_p5 }
  0x3c   : > { %2591 = shalt.err (!%p2588_p6)
}
  0x3d   : > { %s2592_s25 = scalar_lea.vmem %s3145_s18, 512  ;;  %s2970_s15 = smov [#allocation3]  }
  0x3e   : > { %p2593_p8 = scmp.ne.s32.totalorder %s3145_s18, %s2592_s25  ;;  %s2597_s17 = sshll.u32 %s2970_s15, 4  ;;  %s2598_s17 = int_to_ptr.vmem [resolvable:$false] %s2597_s17 }
  0x3f   : > { %s2599_s22 = scalar_lea.vmem %s2598_s17, 1024  ;;  %p2600_p3 = scmp.lt.s32.totalorder %s3145_s18, %s2598_s17 }
  0x40   : > { %p2595_p10 = pnand %p2593_p8, %p2579_p0  ;;  %p2601_p7 = scmp.lt.s32.totalorder %s2599_s22, %s2592_s25 }
  0x42   : > { %p2596_p13 = pneg %p2595_p10  ;;  %p2602_p9 = por %p2601_p7, %p2600_p3 }
  0x44   : > { %p2603_p2 = pnand %p2602_p9, %p2596_p13 }
  0x46   : > { %2606 = shalt.err (!%p2603_p2)
}
  0x47   : > { %s2971_s20 = smov 128   ;;  %s2972_s26 = smov 8  }
  0x48   : > { %2121 = dma.hbm_to_vmem [thread:$0]  (!%p3141_p11), %s3139_s21, 512, %s3145_s18, %s3147_s14, %s2971_s20, %s2971_s20, %s2972_s26  }
  0x49   : > { %p3875_p0 = scmp.ne.s32.totalorder %s3869_s13, 0 }
  0x4a   : > { %s3178_s10 = sand.u32 (!%p3875_p0), 1, %s2813_s28   ;;  %p3876_p5 = scmp.ne.s32.totalorder (!%p3875_p0), %s3867_s11, 0 }
  0x4b   : > { %296 = sbr.rel (%p3875_p0) target bundleno = 4221 (0x107d), region = 52  ;;  %s1924_s16 = sshll.u32 (!%p3875_p0), %s3178_s10, 5 }
  0x4c   : > { %s299_s25 = scalar_lea.sflag (!%p3875_p0), [#allocation4], %s3178_s10  ;;  %s302_s15 = scalar_lea.vmem (!%p3875_p0), [#allocation3], %s1924_s16 }
  0x52   : > { %2796 = dma.done.wait (%p3876_p5), %s299_s25, 512  }
  0x53   : > { %2798 = vsyncadd (%p3876_p5), %s299_s25, 4294966784  ;;  %p3877_p11 = scmp.eq.s32.totalorder %s3060_s9, 0 }
  0x55   : > { %2800 = dma.done.wait (%p3877_p11), [#allocation7], 256   ;;  %p3878_p1 = pmov %p3877_p11 }
  0x56   : > { %vm346_vm0 = vcmask 261120   ;;  %v3195_v0 = vld [vmem:[%s3854_s1] sm:$0x1]  ;;  %v3205_v2 = vld [vmem:[%s3859_s6 + $0x4] sm:$0xf]  ;;  %v3222_v7 = vld [vmem:[%s302_s15 + $0x10] sm:$0xff] }
  0x57   : > { %2802 = vsyncadd (%p3878_p1), [#allocation7], 4294967040  ;;  %v3200_v1 = vld [vmem:[%s3859_s6] sm:$0xf]  ;;  %vm516_vm1 = vcmp.gt.s32.totalorder %v3195_v0, 0  ;;  %v3224_v8 = vld [vmem:[%s302_s15 + $0x8] sm:$0xff] }
  0x58   : > { %v3211_v3 = vld [vmem:[%s3859_s6 + $0x8] sm:$0xf]  ;;  %v3216_v4 = vld [vmem:[%s3859_s6 + $0xc] sm:$0xf]  ;;  %v3218_v5 = vld [vmem:[%s302_s15] sm:$0xff]  ;;  %v353_v10 = vsel %vm346_vm0, %v3222_v7, 0.0 }
  0x59   : > { %v347_v6 = vsel %vm346_vm0, %v3218_v5, 0.0  ;;  %v3226_v9 = vld [vmem:[%s302_s15 + $0x18] sm:$0xff]  ;;  %v350_v11 = vsel %vm346_vm0, %v3224_v8, 0.0  ;;  %354 = vadd.xlane.f32.xlu1 %v353_v10  ;;  %v2475_v33 = vld [vmem:[#allocation6] sm:$0xff]   ;;  %v2476_v34 = vld [vmem:[#allocation6 + $0x8] sm:$0xff]   ;;  %s2973_s14 = smov 96  }
  0x5a   : > { %348 = vadd.xlane.f32.xlu0 %v347_v6  ;;  %v356_v12 = vsel %vm346_vm0, %v3226_v9, 0.0  ;;  %2018 = vmatprep.subr.bf16.mxu0 %v2475_v33  ;;  %v1927_v49 = vld [vmem:[%s3855_s2] ss:$0 sm:$0xff]  ;;  %vm532_vm2 = vcmask 64512   ;;  %s3318_s11 = scalar_lea.vmem [#allocation8], %s1924_s16  ;;  %s3336_s17 = smov 0  }
  0x5b   : > { %2019 = vmatpush3.bf16.msra.mxu0 %v2475_v33  ;;  %v1928_v55 = vld [vmem:[%s3856_s3] ss:$0 sm:$0xff]  ;;  %v504_v33 = vlaneseq }
  0x5c   : > { %2020 = vmatprep.subr.bf16.mxu0 %v2476_v34 }
  0x5d   : > { %357 = vadd.xlane.f32.xlu1 %v356_v12  ;;  %v1929_v12 = vld [vmem:[%s3858_s5] ss:$0 sm:$0xff] }
  0x5e   : > { %351 = vadd.xlane.f32.xlu0 %v350_v11 }
  0x5f   : > { %2021 = vmatpush3.bf16.msra.mxu0 %v2476_v34  ;;  %v3271_v34 = vshrl.u32 %v504_v33, 7 }
  0xe6   : > { %v355_v15 = vpop.xlane.xlu1 %354 }
  0xe7   : > { %v349_v13 = vpop.xlane.xlu0 %348  ;;  %v362_v16 = vmul.f32 0.03125, %v355_v15 }
  0xe8   : > { %v360_v14 = vmul.f32 0.03125, %v349_v13 }
  0xe9   : > { %v366_v18 = vsub.f32 %v3222_v7, %v362_v16 }
  0xea   : > { %v364_v17 = vsub.f32 %v3218_v5, %v360_v14  ;;  %v358_v21 = vpop.xlane.xlu1 %357 }
  0xeb   : > { %v352_v19 = vpop.xlane.xlu0 %351  ;;  %v363_v23 = vmul.f32 0.03125, %v358_v21  ;;  %v370_v24 = vmul.f32 %v366_v18, %v366_v18 }
  0xec   : > { %v361_v20 = vmul.f32 0.03125, %v352_v19  ;;  %v368_v22 = vmul.f32 %v364_v17, %v364_v17 }
  0xed   : > { %v367_v27 = vsub.f32 %v3226_v9, %v363_v23  ;;  %v378_v28 = vsel %vm346_vm0, %v370_v24, 0.0 }
  0xee   : > { %v365_v25 = vsub.f32 %v3224_v8, %v361_v20  ;;  %v372_v26 = vsel %vm346_vm0, %v368_v22, 0.0 }
  0xef   : > { %373 = vadd.xlane.f32.xlu0 %v372_v26  ;;  %v371_v30 = vmul.f32 %v367_v27, %v367_v27 }
  0xf0   : > { %v369_v29 = vmul.f32 %v365_v25, %v365_v25 }
  0xf1   : > { %v381_v32 = vsel %vm346_vm0, %v371_v30, 0.0 }
  0xf2   : > { %v375_v31 = vsel %vm346_vm0, %v369_v29, 0.0 }
  0xf3   : > { %379 = vadd.xlane.f32.xlu0 %v378_v28  ;;  %376 = vadd.xlane.f32.xlu1 %v375_v31 }
  0xf7   : > { %382 = vadd.xlane.f32.xlu1 %v381_v32 }
 0x17c   : > { %v374_v35 = vpop.xlane.xlu0 %373 }
 0x17d   : > { %v384_v36 = vmul.f32 0.03125, %v374_v35  ;;  %v3273_v35 = vand.u32 127, %v504_v33 }
 0x17f   : > { %v388_v37 = vadd.f32 1e-05, %v384_v36  ;;  %v3276_v36 = vadd.s32 24, %v3271_v34  ;;  %vm511_vm3 = vcmp.gt.s32.totalorder %v3273_v35, %v3271_v34 }
 0x180   : > { %v377_v38 = vpop.xlane.xlu1 %376  ;;  %v380_v39 = vpop.xlane.xlu0 %379 }
 0x181   : > { %2477 = vrsqrt.f32 %v388_v37  ;;  %v385_v40 = vmul.f32 0.03125, %v377_v38  ;;  %v386_v41 = vmul.f32 0.03125, %v380_v39  ;;  %v3279_v37 = vadd.s32 8, %v3271_v34 }
 0x182   : > { %v3282_v38 = vadd.s32 16, %v3271_v34  ;;  %vm514_vm4 = vcmp.gt.s32.totalorder %v3273_v35, %v3276_v36 }
 0x183   : > { %v389_v42 = vadd.f32 1e-05, %v385_v40  ;;  %v390_v43 = vadd.f32 1e-05, %v386_v41  ;;  %vm512_vm5 = vcmp.gt.s32.totalorder %v3273_v35, %v3279_v37 }
 0x184   : > { %v383_v44 = vpop.xlane.xlu1 %382  ;;  %vm513_vm6 = vcmp.gt.s32.totalorder %v3273_v35, %v3282_v38 }
 0x185   : > { %2479 = vrsqrt.f32 %v389_v42  ;;  %v387_v45 = vmul.f32 0.03125, %v383_v44 }
 0x186   : > { %2481 = vrsqrt.f32 %v390_v43 }
 0x187   : > { %v391_v46 = vadd.f32 1e-05, %v387_v45 }
 0x189   : > { %2483 = vrsqrt.f32 %v391_v46 }
 0x18b   : > { %v2478_v47 = vpop.eup %2477 }
 0x18c   : > { %v396_v48 = vmul.f32 %v2478_v47, %v364_v17 }
 0x18e   : > { %v406_v53 = vmul.f32 %v1927_v49, %v396_v48 }
 0x18f   : > { %v2480_v50 = vpop.eup %2479 }
 0x190   : > { %v2482_v51 = vpop.eup %2481  ;;  %v397_v52 = vmul.f32 %v2480_v50, %v365_v25  ;;  %v416_v59 = vadd.f32 %v1928_v55, %v406_v53 }
 0x191   : > { %v398_v54 = vmul.f32 %v2482_v51, %v366_v18 }
 0x192   : > { %v407_v56 = vmul.f32 %v1927_v49, %v397_v52 }
 0x193   : > { %v2484_v57 = vpop.eup %2483  ;;  %v408_v61 = vmul.f32 %v1927_v49, %v398_v54 }
 0x194   : > { %v399_v58 = vmul.f32 %v2484_v57, %v367_v27  ;;  %v417_v60 = vadd.f32 %v1928_v55, %v407_v56 }
 0x195   : > { %v418_v6 = vadd.f32 %v1928_v55, %v408_v61 }
 0x196   : > { %v420_v62 = vpack.c.bf16 %v417_v60, %v416_v59  ;;  %v409_v63 = vmul.f32 %v1927_v49, %v399_v58 }
 0x198   : > { %2022 = vmatprep.mubr.msk.bf16.mxu0 %vm346_vm0, %v420_v62  ;;  %v419_v10 = vadd.f32 %v1928_v55, %v409_v63 }
 0x19a   : > { %v421_v11 = vpack.c.bf16 %v419_v10, %v418_v6 }
 0x19c   : > { %2023 = vmatmul.mubr.msk.bf16.vlgmr.msra.gmra.mrb[0].mxu0 %vm346_vm0, %v421_v11 }
 0x26f   : > { %v2024_v13 = vpop.f32.mrb[0].mxu0 }
 0x270   : > { %v494_v14 = vadd.f32 %v2024_v13, %v1929_v12  ;;  %v485_v15 = vpop.f32.mrb[1].mxu0  ;;  %v3322_v13 = vmov 1.0  }
 0x271   : > { %v486_v16 = vadd.f32 %v1929_v12, %v485_v15  ;;  %v2025_v17 = vpop.f32.mrb[2].mxu0  ;;  %v3326_v15 = vmov 1.0  }
 0x272   : > { %v497_v18 = vadd.f32 %v2025_v17, %v1929_v12  ;;  %v488_v19 = vpop.f32.mrb[3].mxu0  ;;  %v502_v21 = vmul.f32 0.35355338, %v494_v14  ;;  %v3330_v17 = vmov 0.0  }
 0x273   : > { %v489_v20 = vadd.f32 %v1929_v12, %v488_v19  ;;  %v500_v24 = vmul.f32 0.35355338, %v486_v16  ;;  %v3320_v12 = vmov 1.0   ;;  %v3334_v19 = vmov 0.0  }
 0x274   : > { %v503_v22 = vmul.f32 0.35355338, %v497_v18  ;;  %v3253_v23 = vpack.c.bf16 %v497_v18, %v494_v14  ;;  %v3324_v14 = vmov 1.0   ;;  %v3332_v18 = vmov 0.0  }
 0x275   : > { %v501_v25 = vmul.f32 0.35355338, %v489_v20  ;;  %v3255_v26 = vpack.c.bf16 %v489_v20, %v486_v16  ;;  %v3328_v16 = vmov 0.0  }
 0x276   : > { %v3257_v27 = vpack.c.bf16 %v503_v22, %v502_v21  ;;  %530 = vrot.lane.b32.xlu1 %v3253_v23, %s2973_s14 }
 0x277   : > { %528 = vrot.lane.b32.xlu0 %v3255_v26, %s2973_s14  ;;  %v3261_v28 = vpack.c.bf16 %v501_v25, %v500_v24 }
 0x279   : > { %2030 = vmatprep.mubr.msk.bf16.mxu1 %vm532_vm2, %v3261_v28 }
 0x2e8   : > { %v531_v31 = vpop.permute.xlu1 %530 }
 0x2e9   : > { %v529_v29 = vpop.permute.xlu0 %528  ;;  %v543_v32 = vsel %vm532_vm2, %v531_v31, 0 }
 0x2ea   : > { %2098 = vmatprep.subr.msk.bf16.mxu1 %vm532_vm2, %v529_v29  ;;  %v540_v30 = vsel %vm532_vm2, %v529_v29, 0 }
 0x2eb   : > { %2027 = vmatpush3.bf16.xpose.msra.mxu1 %v540_v30 }
 0x2ec   : > { %2099 = vmatprep.subr.msk.bf16.mxu1 %vm532_vm2, %v531_v31 }
 0x2f3   : > { %2029 = vmatpush3.bf16.xpose.msra.mxu1 %v543_v32 }
 0x2fa   : > { %2031 = vmatmul.mubr.msk.bf16.vlgmr.msra.gmra.mrb[0].mxu1 %vm532_vm2, %v3257_v27 }
 0x3cd   : > { %v2032_v39 = vpop.f32.mrb[0].mxu1 }
 0x3ce   : > { %v579_v40 = vpop.f32.mrb[1].mxu1  ;;  %v596_v48 = vsel %vm513_vm6, -1e+30, %v2032_v39 }
 0x3cf   : > { %v594_v41 = vsel %vm511_vm3, -1e+30, %v579_v40  ;;  %v2033_v42 = vpop.f32.mrb[2].mxu1  ;;  %v604_v50 = vsel %vm346_vm0, %v596_v48, -inf }
 0x3d0   : > { %v582_v43 = vpop.f32.mrb[3].mxu1  ;;  %v598_v44 = vsel %vm346_vm0, %v594_v41, -inf  ;;  %v597_v45 = vsel %vm514_vm4, -1e+30, %v2033_v42 }
 0x3d1   : > { %v595_v46 = vsel %vm512_vm5, -1e+30, %v582_v43  ;;  %599 = vmax.xlane.f32.xlu1 %v598_v44  ;;  %v607_v49 = vsel %vm346_vm0, %v597_v45, -inf }
 0x3d2   : > { %v601_v47 = vsel %vm346_vm0, %v595_v46, -inf }
 0x3d3   : > { %602 = vmax.xlane.f32.xlu0 %v601_v47 }
 0x3d5   : > { %608 = vmax.xlane.f32.xlu1 %v607_v49 }
 0x3d7   : > { %605 = vmax.xlane.f32.xlu0 %v604_v50 }
 0x45e   : > { %v600_v51 = vpop.xlane.xlu1 %599 }
 0x45f   : > { %v610_v52 = vsub.f32 %v594_v41, %v600_v51 }
 0x460   : > { %v603_v53 = vpop.xlane.xlu0 %602 }
 0x461   : > { %v614_v54 = vmul.f32 1.442695, %v610_v52  ;;  %v611_v55 = vsub.f32 %v595_v46, %v603_v53 }
 0x462   : > { %v609_v56 = vpop.xlane.xlu1 %608 }
 0x463   : > { %2485 = vpow2.f32 %v614_v54  ;;  %v616_v57 = vmul.f32 1.442695, %v611_v55  ;;  %v613_v58 = vsub.f32 %v597_v45, %v609_v56 }
 0x464   : > { %v606_v59 = vpop.xlane.xlu0 %605 }
 0x465   : > { %2487 = vpow2.f32 %v616_v57  ;;  %v620_v60 = vmul.f32 1.442695, %v613_v58  ;;  %v612_v61 = vsub.f32 %v596_v48, %v606_v59 }
 0x467   : > { %2489 = vpow2.f32 %v620_v60  ;;  %v618_v62 = vmul.f32 1.442695, %v612_v61 }
 0x469   : > { %2491 = vpow2.f32 %v618_v62 }
 0x46d   : > { %v3308_v63 = vpop.eup %2485 }
 0x46f   : > { %v3310_v6 = vpop.eup %2487 }
 0x471   : > { %v3312_v10 = vpop.eup %2489 }
 0x473   : > { %v3314_v11 = vpop.eup %2491 }
 0x474 LB: >> { %v636_v20 = vadd.f32 %v2837_v15, %v2853_v19  ;;  %v638_v21 = vadd.f32 %v2829_v13, %v2845_v17  ;;  %v637_v24 = vadd.f32 %v2833_v14, %v2849_v18  ;;  %v639_v30 = vadd.f32 %v2825_v12, %v2841_v16  ;;  %s627_s17 = sadd.s32 1, %s2857_s17   ;;  %s2857_s17 = sphi %s3336_s17, %s627_s17   ;;  %v2853_v19 = vphi %v3334_v19, %v3882_v19   ;;  %v2849_v18 = vphi %v3332_v18, %v3881_v18   ;;  %v2845_v17 = vphi %v3330_v17, %v3880_v17   ;;  %v2841_v16 = vphi %v3328_v16, %v3879_v16   ;;  %v2837_v15 = vphi %v3326_v15, %v676_v15   ;;  %v2833_v14 = vphi %v3324_v14, %v677_v14   ;;  %v2829_v13 = vphi %v3322_v13, %v678_v13   ;;  %v2825_v12 = vphi %v3320_v12, %v679_v12  }
 0x475   : >> { %v2974_v31 = vmov 0.0   ;;  %p624_p4 = scmp.ge.s32.totalorder %s627_s17, 30  }
 0x476   : >> { %v640_v22 = vmul.f32 0.5, %v636_v20  ;;  %v642_v25 = vmul.f32 0.5, %v638_v21  ;;  %v641_v29 = vmul.f32 0.5, %v637_v24  ;;  %v643_v40 = vmul.f32 0.5, %v639_v30  ;;  %s2976_s16 = smov (%p624_p4), 64   ;;  %s2977_s22 = smov (%p624_p4), 88  }
 0x477   : > { %v687_v54 = vsub.s32 (%p624_p4), 0, %v3271_v34  ;;  %v2975_v55 = vmov (%p624_p4), 0   ;;  %v696_v58 = vmul.f32 (%p624_p4), 1.2, %v3314_v11  ;;  %v694_v59 = vmul.f32 (%p624_p4), 1.2, %v3308_v63 }
 0x478   : >> { %vm644_vm7 = vcmp.ge.f32.partialorder %v3308_v63, %v640_v22  ;;  %vm646_vm8 = vcmp.ge.f32.partialorder %v3314_v11, %v642_v25  ;;  %vm645_vm9 = vcmp.ge.f32.partialorder %v3310_v6, %v641_v29  ;;  %vm647_vm10 = vcmp.ge.f32.partialorder %v3312_v10, %v643_v40  ;;  %s2978_s20 = smov (%p624_p4), 120   ;;  %s3464_s26 = smov (%p624_p4), 0  }
 0x479   : >> { %v1936_v32 = vsel %vm644_vm7, 1.0, %v2974_v31  ;;  %v1938_v39 = vsel %vm646_vm8, 1.0, %v2974_v31  ;;  %v1937_v42 = vsel %vm645_vm9, 1.0, %v2974_v31  ;;  %v1939_v44 = vsel %vm647_vm10, 1.0, %v2974_v31 }
 0x47a   : >> { %v656_v33 = vsel %vm346_vm0, %v1936_v32, 0.0  ;;  %v662_v41 = vsel %vm346_vm0, %v1938_v39, 0.0  ;;  %v659_v43 = vsel %vm346_vm0, %v1937_v42, 0.0  ;;  %v665_v45 = vsel %vm346_vm0, %v1939_v44, 0.0 }
 0x47b   : >> { %657 = vadd.xlane.f32.xlu0 %v656_v33  ;;  %663 = vadd.xlane.f32.xlu1 %v662_v41  ;;  %v684_v56 = vsel (%p624_p4), %vm516_vm1, 1, %v2975_v55  ;;  %v697_v60 = vmul.f32 (%p624_p4), 1.2, %v3312_v10  ;;  %v695_v0 = vmul.f32 (%p624_p4), 1.2, %v3310_v6 }
 0x47c   : > { %v3380_v57 = vrot.slane (%p624_p4), %v684_v56, %v687_v54 }
 0x47e   : > { %vm689_vm8 = vcmp.eq.s32.totalorder (%p624_p4), %v3380_v57, 1 }
 0x47f   : >> { %660 = vadd.xlane.f32.xlu0 %v659_v43  ;;  %666 = vadd.xlane.f32.xlu1 %v665_v45 }
 0x508   : >> { %v658_v46 = vpop.xlane.xlu0 %657  ;;  %v664_v47 = vpop.xlane.xlu1 %663 }
 0x509   : >> { %vm668_vm11 = vcmp.ge.f32.partialorder %v658_v46, 2.0  ;;  %vm670_vm12 = vcmp.ge.f32.partialorder %v664_v47, 2.0  ;;  %626 = sbr.rel (!%p624_p4) target bundleno = 1140 (0x474), region = 129 }
 0x50a   : >> { %v672_v48 = vsel %vm668_vm11, %v640_v22, %v2853_v19   ;;  %v676_v15 = vsel %vm668_vm11, %v2837_v15, %v640_v22   ;;  %v674_v49 = vsel %vm670_vm12, %v642_v25, %v2845_v17   ;;  %v678_v13 = vsel %vm670_vm12, %v2829_v13, %v642_v25  }
 0x50b   : >> { %v3880_v17 = vmov %v674_v49  ;;  %v3882_v19 = vmov %v672_v48  ;;  %vm682_vm15 = vcmp.ge.f32.partialorder (%p624_p4), %v3314_v11, %v674_v49  ;;  %vm680_vm7 = vcmp.ge.f32.partialorder (%p624_p4), %v3308_v63, %v672_v48 }
 0x50c   : >> { %v661_v50 = vpop.xlane.xlu0 %660  ;;  %v667_v51 = vpop.xlane.xlu1 %666  ;;  %vm692_vm10 = vmor (%p624_p4), %vm689_vm8, %vm682_vm15 }
 0x50d   : >> { %vm669_vm13 = vcmp.ge.f32.partialorder %v661_v50, 2.0  ;;  %vm671_vm14 = vcmp.ge.f32.partialorder %v667_v51, 2.0  ;;  %v700_v61 = vsel (%p624_p4), %vm692_vm10, %v696_v58, %v3314_v11  ;;  %vm690_vm11 = vmor (%p624_p4), %vm689_vm8, %vm680_vm7 }
 0x50e   : >> { %v673_v52 = vsel %vm669_vm13, %v641_v29, %v2849_v18   ;;  %v677_v14 = vsel %vm669_vm13, %v2833_v14, %v641_v29   ;;  %v675_v53 = vsel %vm671_vm14, %v643_v40, %v2841_v16   ;;  %v679_v12 = vsel %vm671_vm14, %v2825_v12, %v643_v40  }
 0x50f   : >> { %v3879_v16 = vmov %v675_v53  ;;  %v3881_v18 = vmov %v673_v52  ;;  %vm683_vm9 = vcmp.ge.f32.partialorder (%p624_p4), %v3312_v10, %v675_v53  ;;  %vm681_vm1 = vcmp.ge.f32.partialorder (%p624_p4), %v3310_v6, %v673_v52 }
 0x510   : > { %v708_v62 = vsel %vm346_vm0, %v700_v61, 0.0  ;;  %v698_v12 = vsel %vm690_vm11, %v694_v59, %v3308_v63  ;;  %vm693_vm12 = vmor %vm689_vm8, %vm683_vm9 }
 0x511   : > { %709 = vadd.xlane.f32.xlu1 %v708_v62  ;;  %v702_v13 = vsel %vm346_vm0, %v698_v12, 0.0  ;;  %v701_v14 = vsel %vm693_vm12, %v697_v60, %v3312_v10  ;;  %vm691_vm13 = vmor %vm689_vm8, %vm681_vm1 }
 0x512   : > { %703 = vadd.xlane.f32.xlu0 %v702_v13  ;;  %v711_v11 = vsel %vm346_vm0, %v701_v14, 0.0  ;;  %v699_v15 = vsel %vm691_vm13, %v695_v0, %v3310_v6 }
 0x513   : > { %v705_v16 = vsel %vm346_vm0, %v699_v15, 0.0 }
 0x515   : > { %712 = vadd.xlane.f32.xlu1 %v711_v11 }
 0x516   : > { %706 = vadd.xlane.f32.xlu0 %v705_v16 }
 0x526   : > { %726 = vrot.lane.b32.xlu1 %v3253_v23, %s2976_s16 }
 0x52a   : > { %795 = vrot.lane.b32.xlu1 %v3255_v26, %s2977_s22 }
 0x52c   : > { %724 = vrot.lane.b32.xlu0 %v3255_v26, %s2976_s16 }
 0x52e   : > { %797 = vrot.lane.b32.xlu1 %v3253_v23, %s2977_s22 }
 0x530   : > { %791 = vrot.lane.b32.xlu0 %v3261_v28, %s2978_s20 }
 0x532   : > { %793 = vrot.lane.b32.xlu1 %v3257_v27, %s2978_s20 }
 0x59e   : > { %v710_v63 = vpop.xlane.xlu1 %709 }
 0x59f   : > { %2493 = vrcp.f32 %v710_v63  ;;  %v704_v6 = vpop.xlane.xlu0 %703 }
 0x5a0   : > { %2495 = vrcp.f32 %v704_v6 }
 0x5a2   : > { %v713_v10 = vpop.xlane.xlu1 %712 }
 0x5a3   : > { %2497 = vrcp.f32 %v713_v10  ;;  %v707_v17 = vpop.xlane.xlu0 %706 }
 0x5a4   : > { %2499 = vrcp.f32 %v707_v17 }
 0x5a6   : > { %v727_v19 = vpop.permute.xlu1 %726 }
 0x5a7   : > { %v725_v18 = vpop.permute.xlu0 %724 }
 0x5a8   : > { %2034 = vmatprep.subr.bf16.mxu0 %v725_v18 }
 0x5a9   : > { %v2494_v20 = vpop.eup %2493  ;;  %2035 = vmatpush3.bf16.msra.mxu0 %v725_v18 }
 0x5aa   : > { %2036 = vmatprep.subr.bf16.mxu0 %v727_v19  ;;  %v796_v21 = vpop.permute.xlu1 %795  ;;  %v2496_v22 = vpop.eup %2495  ;;  %v720_v24 = vmul.f32 %v2494_v20, %v700_v61 }
 0x5ab   : > { %v718_v31 = vmul.f32 %v2496_v22, %v698_v12  ;;  %v792_v40 = vpop.permute.xlu0 %791  ;;  %v806_v41 = vsel %vm532_vm2, %v796_v21, 0  ;;  %v3448_v22 = vmov 1.0  }
 0x5ad   : > { %v2498_v25 = vpop.eup %2497  ;;  %2037 = vmatpush3.bf16.msra.mxu0 %v727_v19 }
 0x5ae   : > { %v2500_v29 = vpop.eup %2499  ;;  %v721_v30 = vmul.f32 %v2498_v25, %v701_v14  ;;  %2100 = vmatprep.subr.msk.bf16.mxu0 %vm532_vm2, %v796_v21  ;;  %v798_v42 = vpop.permute.xlu1 %797  ;;  %v3452_v25 = vmov 1.0  }
 0x5af   : > { %v719_v32 = vmul.f32 %v2500_v29, %v699_v15  ;;  %v809_v43 = vsel %vm532_vm2, %v798_v42, 0  ;;  %v3454_v29 = vmov 1.0  }
 0x5b0   : > { %v723_v33 = vpack.c.bf16 %v721_v30, %v720_v24  ;;  %v3450_v24 = vmov 1.0   ;;  %v3456_v30 = vmov 0.0  }
 0x5b1   : > { %v722_v39 = vpack.c.bf16 %v719_v32, %v718_v31  ;;  %v3458_v31 = vmov 0.0   ;;  %v3460_v32 = vmov 0.0  }
 0x5b2   : > { %v794_v44 = vpop.permute.xlu1 %793 }
 0x5b3   : > { %2038 = vmatprep.mubr.msk.bf16.mxu0 %vm346_vm0, %v722_v39 }
 0x5b4   : > { %2039 = vmatmul.mubr.msk.bf16.vlgmr.msra.gmra.mrb[4].mxu0 %vm346_vm0, %v723_v33  ;;  %v3462_v33 = vmov 0.0  }
 0x5b5   : > { %2046 = vmatprep.mubr.msk.bf16.mxu0 %vm532_vm2, %v792_v40 }
 0x5b6   : > { %2043 = vmatpush3.bf16.xpose.msra.mxu0 %v806_v41 }
 0x5b7   : > { %2101 = vmatprep.subr.msk.bf16.mxu0 %vm532_vm2, %v798_v42 }
 0x5be   : > { %2045 = vmatpush3.bf16.xpose.msra.mxu0 %v809_v43 }
 0x5c5   : > { %2047 = vmatmul.mubr.msk.bf16.vlgmr.msra.gmra.mrb[8].mxu0 %vm532_vm2, %v794_v44 }
 0x687   : > { %v2040_v45 = vpop.f32.mrb[4].mxu0 }
 0x688   : > { %787 = vst.msk [vmem:[#allocation2 + $0x10] sm:$0xff] %vm532_vm2, %v2040_v45  ;;  %v770_v46 = vpop.f32.mrb[5].mxu0 }
 0x689   : > { %785 = vst.msk [vmem:[#allocation2] sm:$0xff] %vm532_vm2, %v770_v46  ;;  %v2041_v47 = vpop.f32.mrb[6].mxu0 }
 0x68a   : > { %788 = vst.msk [vmem:[#allocation2 + $0x18] sm:$0xff] %vm532_vm2, %v2041_v47  ;;  %v773_v48 = vpop.f32.mrb[7].mxu0 }
 0x68b   : > { %786 = vst.msk [vmem:[#allocation2 + $0x8] sm:$0xff] %vm532_vm2, %v773_v48 }
 0x698   : > { %v2048_v49 = vpop.f32.mrb[8].mxu0 }
 0x699   : > { %v845_v50 = vpop.f32.mrb[9].mxu0  ;;  %v862_v55 = vsel %vm513_vm6, -1e+30, %v2048_v49 }
 0x69a   : > { %v860_v51 = vsel %vm511_vm3, -1e+30, %v845_v50  ;;  %v2049_v52 = vpop.f32.mrb[10].mxu0  ;;  %v870_v59 = vsel %vm346_vm0, %v862_v55, -inf }
 0x69b   : > { %v848_v53 = vpop.f32.mrb[11].mxu0  ;;  %v864_v54 = vsel %vm346_vm0, %v860_v51, -inf  ;;  %v863_v60 = vsel %vm514_vm4, -1e+30, %v2049_v52 }
 0x69c   : > { %v861_v56 = vsel %vm512_vm5, -1e+30, %v848_v53  ;;  %865 = vmax.xlane.f32.xlu0 %v864_v54  ;;  %v873_v0 = vsel %vm346_vm0, %v863_v60, -inf }
 0x69d   : > { %v867_v58 = vsel %vm346_vm0, %v861_v56, -inf }
 0x69e   : > { %868 = vmax.xlane.f32.xlu1 %v867_v58 }
 0x6a0   : > { %871 = vmax.xlane.f32.xlu0 %v870_v59 }
 0x6a4   : > { %874 = vmax.xlane.f32.xlu0 %v873_v0 }
 0x729   : > { %v866_v61 = vpop.xlane.xlu0 %865 }
 0x72a   : > { %v876_v62 = vsub.f32 %v860_v51, %v866_v61 }
 0x72b   : > { %v869_v12 = vpop.xlane.xlu1 %868 }
 0x72c   : > { %v880_v13 = vmul.f32 1.442695, %v876_v62  ;;  %v877_v14 = vsub.f32 %v861_v56, %v869_v12 }
 0x72d   : > { %v872_v11 = vpop.xlane.xlu0 %871 }
 0x72e   : > { %2501 = vpow2.f32 %v880_v13  ;;  %v882_v15 = vmul.f32 1.442695, %v877_v14  ;;  %v878_v16 = vsub.f32 %v862_v55, %v872_v11 }
 0x730   : > { %2503 = vpow2.f32 %v882_v15  ;;  %v884_v63 = vmul.f32 1.442695, %v878_v16 }
 0x731   : > { %v875_v6 = vpop.xlane.xlu0 %874 }
 0x732   : > { %2505 = vpow2.f32 %v884_v63  ;;  %v879_v10 = vsub.f32 %v863_v60, %v875_v6 }
 0x734   : > { %v886_v17 = vmul.f32 1.442695, %v879_v10 }
 0x736   : > { %2507 = vpow2.f32 %v886_v17 }
 0x738   : > { %v3440_v18 = vpop.eup %2501 }
 0x73a   : > { %v3442_v19 = vpop.eup %2503 }
 0x73c   : > { %v3444_v20 = vpop.eup %2505 }
 0x740   : > { %v3446_v21 = vpop.eup %2507 }
 0x741 LB: >> { %v902_v39 = vadd.f32 %v2873_v29, %v2889_v33  ;;  %v904_v40 = vadd.f32 %v2865_v24, %v2881_v31  ;;  %v903_v42 = vadd.f32 %v2869_v25, %v2885_v32  ;;  %v905_v45 = vadd.f32 %v2861_v22, %v2877_v30  ;;  %s893_s26 = sadd.s32 1, %s2893_s26   ;;  %s2893_s26 = sphi %s3464_s26, %s893_s26   ;;  %v2889_v33 = vphi %v3462_v33, %v3886_v33   ;;  %v2885_v32 = vphi %v3460_v32, %v3885_v32   ;;  %v2881_v31 = vphi %v3458_v31, %v3884_v31   ;;  %v2877_v30 = vphi %v3456_v30, %v3883_v30   ;;  %v2873_v29 = vphi %v3454_v29, %v942_v29   ;;  %v2869_v25 = vphi %v3452_v25, %v943_v25   ;;  %v2865_v24 = vphi %v3450_v24, %v944_v24   ;;  %v2861_v22 = vphi %v3448_v22, %v945_v22  }
 0x742   : >> { %v2979_v46 = vmov 0.0   ;;  %p890_p6 = scmp.ge.s32.totalorder %s893_s26, 30  }
 0x743   : >> { %v906_v41 = vmul.f32 0.5, %v902_v39  ;;  %v908_v43 = vmul.f32 0.5, %v904_v40  ;;  %v907_v44 = vmul.f32 0.5, %v903_v42  ;;  %v909_v50 = vmul.f32 0.5, %v905_v45  ;;  %s2980_s25 = smov (%p890_p6), 56   ;;  %s2981_s15 = smov (%p890_p6), 80  }
 0x744   : > { %v956_v13 = vmul.f32 (%p890_p6), 1.2, %v3444_v20  ;;  %v954_v14 = vmul.f32 (%p890_p6), 1.2, %v3440_v18  ;;  %v957_v11 = vmul.f32 (%p890_p6), 1.2, %v3446_v21 }
 0x745   : >> { %vm910_vm14 = vcmp.ge.f32.partialorder %v3440_v18, %v906_v41  ;;  %vm912_vm15 = vcmp.ge.f32.partialorder %v3444_v20, %v908_v43  ;;  %vm911_vm7 = vcmp.ge.f32.partialorder %v3442_v19, %v907_v44  ;;  %vm913_vm9 = vcmp.ge.f32.partialorder %v3446_v21, %v909_v50  ;;  %s2982_s13 = smov (%p890_p6), 112   ;;  %s2983_s21 = smov (%p890_p6), 8  }
 0x746   : >> { %v1944_v47 = vsel %vm910_vm14, 1.0, %v2979_v46  ;;  %v1946_v49 = vsel %vm912_vm15, 1.0, %v2979_v46  ;;  %v1945_v52 = vsel %vm911_vm7, 1.0, %v2979_v46  ;;  %v1947_v54 = vsel %vm913_vm9, 1.0, %v2979_v46  ;;  %s3590_s18 = smov (%p890_p6), 0  }
 0x747   : >> { %v922_v48 = vsel %vm346_vm0, %v1944_v47, 0.0  ;;  %v928_v51 = vsel %vm346_vm0, %v1946_v49, 0.0  ;;  %v925_v53 = vsel %vm346_vm0, %v1945_v52, 0.0  ;;  %v931_v55 = vsel %vm346_vm0, %v1947_v54, 0.0 }
 0x748   : >> { %923 = vadd.xlane.f32.xlu0 %v922_v48  ;;  %929 = vadd.xlane.f32.xlu1 %v928_v51  ;;  %v955_v15 = vmul.f32 (%p890_p6), 1.2, %v3442_v19 }
 0x74c   : >> { %926 = vadd.xlane.f32.xlu0 %v925_v53  ;;  %932 = vadd.xlane.f32.xlu1 %v931_v55 }
 0x7d5   : >> { %v924_v56 = vpop.xlane.xlu0 %923  ;;  %v930_v58 = vpop.xlane.xlu1 %929 }
 0x7d6   : >> { %vm934_vm10 = vcmp.ge.f32.partialorder %v924_v56, 2.0  ;;  %vm936_vm1 = vcmp.ge.f32.partialorder %v930_v58, 2.0  ;;  %892 = sbr.rel (!%p890_p6) target bundleno = 1857 (0x741), region = 140 }
 0x7d7   : >> { %v938_v59 = vsel %vm934_vm10, %v906_v41, %v2889_v33   ;;  %v942_v29 = vsel %vm934_vm10, %v2873_v29, %v906_v41   ;;  %v940_v60 = vsel %vm936_vm1, %v908_v43, %v2881_v31   ;;  %v944_v24 = vsel %vm936_vm1, %v2865_v24, %v908_v43  }
 0x7d8   : >> { %v3884_v31 = vmov %v940_v60  ;;  %v3886_v33 = vmov %v938_v59  ;;  %vm948_vm13 = vcmp.ge.f32.partialorder (%p890_p6), %v3444_v20, %v940_v60  ;;  %vm946_vm14 = vcmp.ge.f32.partialorder (%p890_p6), %v3440_v18, %v938_v59 }
 0x7d9   : >> { %v927_v0 = vpop.xlane.xlu0 %926  ;;  %v933_v61 = vpop.xlane.xlu1 %932  ;;  %vm952_vm15 = vmor (%p890_p6), %vm689_vm8, %vm948_vm13 }
 0x7da   : >> { %vm935_vm11 = vcmp.ge.f32.partialorder %v927_v0, 2.0  ;;  %vm937_vm12 = vcmp.ge.f32.partialorder %v933_v61, 2.0  ;;  %v960_v16 = vsel (%p890_p6), %vm952_vm15, %v956_v13, %v3444_v20  ;;  %vm950_vm10 = vmor (%p890_p6), %vm689_vm8, %vm946_vm14 }
 0x7db   : >> { %v939_v62 = vsel %vm935_vm11, %v907_v44, %v2885_v32   ;;  %v943_v25 = vsel %vm935_vm11, %v2869_v25, %v907_v44   ;;  %v941_v12 = vsel %vm937_vm12, %v909_v50, %v2877_v30   ;;  %v945_v22 = vsel %vm937_vm12, %v2861_v22, %v909_v50  }
 0x7dc   : >> { %v3883_v30 = vmov %v941_v12  ;;  %v3885_v32 = vmov %v939_v62  ;;  %vm949_vm7 = vcmp.ge.f32.partialorder (%p890_p6), %v3446_v21, %v941_v12  ;;  %vm947_vm9 = vcmp.ge.f32.partialorder (%p890_p6), %v3442_v19, %v939_v62 }
 0x7dd   : > { %v968_v63 = vsel %vm346_vm0, %v960_v16, 0.0  ;;  %v958_v6 = vsel %vm950_vm10, %v954_v14, %v3440_v18  ;;  %vm953_vm1 = vmor %vm689_vm8, %vm949_vm7  ;;  %vm1061_vm12 = vcmask 130112  }
 0x7de   : > { %969 = vadd.xlane.f32.xlu1 %v968_v63  ;;  %v962_v10 = vsel %vm346_vm0, %v958_v6, 0.0  ;;  %v961_v17 = vsel %vm953_vm1, %v957_v11, %v3446_v21  ;;  %vm951_vm11 = vmor %vm689_vm8, %vm947_vm9 }
 0x7df   : > { %963 = vadd.xlane.f32.xlu0 %v962_v10  ;;  %v971_v20 = vsel %vm346_vm0, %v961_v17, 0.0  ;;  %v959_v22 = vsel %vm951_vm11, %v955_v15, %v3442_v19 }
 0x7e0   : > { %v965_v24 = vsel %vm346_vm0, %v959_v22, 0.0 }
 0x7e2   : > { %972 = vadd.xlane.f32.xlu1 %v971_v20 }
 0x7e3   : > { %966 = vadd.xlane.f32.xlu0 %v965_v24 }
 0x7f3   : > { %986 = vrot.lane.b32.xlu1 %v3253_v23, %s2980_s25 }
 0x7f7   : > { %1070 = vrot.lane.b32.xlu1 %v3255_v26, %s2981_s15 }
 0x7f9   : > { %984 = vrot.lane.b32.xlu0 %v3255_v26, %s2980_s25 }
 0x7fb   : > { %1072 = vrot.lane.b32.xlu1 %v3253_v23, %s2981_s15 }
 0x7fd   : > { %1066 = vrot.lane.b32.xlu0 %v3261_v28, %s2982_s13 }
 0x7ff   : > { %1068 = vrot.lane.b32.xlu1 %v3257_v27, %s2982_s13 }
 0x86b   : > { %v970_v18 = vpop.xlane.xlu1 %969 }
 0x86c   : > { %v964_v19 = vpop.xlane.xlu0 %963  ;;  %2509 = vrcp.f32 %v970_v18 }
 0x86d   : > { %2511 = vrcp.f32 %v964_v19 }
 0x86f   : > { %v973_v21 = vpop.xlane.xlu1 %972 }
 0x870   : > { %2513 = vrcp.f32 %v973_v21  ;;  %v967_v25 = vpop.xlane.xlu0 %966 }
 0x871   : > { %2515 = vrcp.f32 %v967_v25 }
 0x873   : > { %v987_v30 = vpop.permute.xlu1 %986 }
 0x874   : > { %v985_v29 = vpop.permute.xlu0 %984 }
 0x875   : > { %2050 = vmatprep.subr.bf16.mxu1 %v985_v29 }
 0x876   : > { %2051 = vmatpush3.bf16.msra.mxu1 %v985_v29  ;;  %v2510_v31 = vpop.eup %2509 }
 0x877   : > { %2052 = vmatprep.subr.bf16.mxu1 %v987_v30  ;;  %v1071_v32 = vpop.permute.xlu1 %1070  ;;  %v2512_v33 = vpop.eup %2511  ;;  %v980_v41 = vmul.f32 %v2510_v31, %v960_v16 }
 0x878   : > { %v978_v43 = vmul.f32 %v2512_v33, %v958_v6  ;;  %v1067_v47 = vpop.permute.xlu0 %1066  ;;  %v1081_v48 = vsel %vm532_vm2, %v1071_v32, 0 }
 0x87a   : > { %v2514_v39 = vpop.eup %2513  ;;  %2053 = vmatpush3.bf16.msra.mxu1 %v987_v30 }
 0x87b   : > { %v2516_v40 = vpop.eup %2515  ;;  %v981_v42 = vmul.f32 %v2514_v39, %v961_v17  ;;  %2102 = vmatprep.subr.msk.bf16.mxu1 %vm532_vm2, %v1071_v32  ;;  %v1073_v49 = vpop.permute.xlu1 %1072 }
 0x87c   : > { %v979_v44 = vmul.f32 %v2516_v40, %v959_v22  ;;  %v1084_v50 = vsel %vm532_vm2, %v1073_v49, 0 }
 0x87d   : > { %v983_v45 = vpack.c.bf16 %v981_v42, %v980_v41  ;;  %v3574_v42 = vmov 1.0  }
 0x87e   : > { %v982_v46 = vpack.c.bf16 %v979_v44, %v978_v43  ;;  %v3576_v43 = vmov 1.0   ;;  %v3578_v44 = vmov 1.0  }
 0x87f   : > { %v1069_v51 = vpop.permute.xlu1 %1068 }
 0x880   : > { %2054 = vmatprep.mubr.msk.bf16.mxu1 %vm346_vm0, %v982_v46  ;;  %v3582_v46 = vmov 0.0  }
 0x881   : > { %2055 = vmatmul.mubr.msk.bf16.vlgmr.msra.gmra.mrb[4].mxu1 %vm346_vm0, %v983_v45  ;;  %v3580_v45 = vmov 1.0  }
 0x882   : > { %2062 = vmatprep.mubr.msk.bf16.mxu1 %vm532_vm2, %v1067_v47  ;;  %v3584_v47 = vmov 0.0  }
 0x883   : > { %2059 = vmatpush3.bf16.xpose.msra.mxu1 %v1081_v48  ;;  %v3586_v48 = vmov 0.0  }
 0x884   : > { %2103 = vmatprep.subr.msk.bf16.mxu1 %vm532_vm2, %v1073_v49  ;;  %v3588_v49 = vmov 0.0  }
 0x88b   : > { %2061 = vmatpush3.bf16.xpose.msra.mxu1 %v1084_v50 }
 0x892   : > { %2063 = vmatmul.mubr.msk.bf16.vlgmr.msra.gmra.mrb[8].mxu1 %vm532_vm2, %v1069_v51 }
 0x954   : > { %v2056_v52 = vpop.f32.mrb[4].mxu1 }
 0x955   : > { %v1030_v53 = vpop.f32.mrb[5].mxu1 }
 0x956   : > { %v2057_v54 = vpop.f32.mrb[6].mxu1 }
 0x957   : > { %v1033_v55 = vpop.f32.mrb[7].mxu1 }
 0x958   : > { %1051 = vrot.lane.b32.xlu1 %v1033_v55, %s2983_s21 }
 0x95c   : > { %1053 = vrot.lane.b32.xlu1 %v2056_v52, %s2983_s21 }
 0x965   : > { %v2064_v56 = vpop.f32.mrb[8].mxu1 }
 0x966   : > { %v1137_v58 = vsel %vm513_vm6, -1e+30, %v2064_v56  ;;  %v1120_v59 = vpop.f32.mrb[9].mxu1 }
 0x967   : > { %v1145_v60 = vsel %vm346_vm0, %v1137_v58, -inf  ;;  %v1135_v0 = vsel %vm511_vm3, -1e+30, %v1120_v59  ;;  %v2065_v61 = vpop.f32.mrb[10].mxu1 }
 0x968   : > { %1146 = vmax.xlane.f32.xlu0 %v1145_v60  ;;  %v1123_v62 = vpop.f32.mrb[11].mxu1  ;;  %v1139_v12 = vsel %vm346_vm0, %v1135_v0, -inf  ;;  %v1138_v13 = vsel %vm514_vm4, -1e+30, %v2065_v61 }
 0x969   : > { %v1148_v14 = vsel %vm346_vm0, %v1138_v13, -inf  ;;  %v1136_v11 = vsel %vm512_vm5, -1e+30, %v1123_v62 }
 0x96a   : > { %v1142_v15 = vsel %vm346_vm0, %v1136_v11, -inf }
 0x96c   : > { %1140 = vmax.xlane.f32.xlu0 %v1139_v12 }
 0x970   : > { %1149 = vmax.xlane.f32.xlu0 %v1148_v14 }
 0x980   : > { %1143 = vmax.xlane.f32.xlu1 %v1142_v15 }
 0x986   : > { %1049 = vrot.lane.b32.xlu0 %v1030_v53, %s2983_s21 }
 0x991   : > { %1055 = vrot.lane.b32.xlu1 %v2057_v54, %s2983_s21 }
 0x9ca   : > { %v1052_v16 = vpop.permute.xlu1 %1051 }
 0x9cb   : > { %1063 = vst.msk [vmem:[#allocation2 + $0x8] sm:$0xff] %vm1061_vm12, %v1052_v16 }
 0x9ce   : > { %v1054_v63 = vpop.permute.xlu1 %1053 }
 0x9cf   : > { %1064 = vst.msk [vmem:[#allocation2 + $0x10] sm:$0xff] %vm1061_vm12, %v1054_v63 }
 0x9f5   : > { %v1147_v6 = vpop.xlane.xlu0 %1146 }
 0x9f6   : > { %v1153_v10 = vsub.f32 %v1137_v58, %v1147_v6 }
 0x9f8   : > { %v1159_v17 = vmul.f32 1.442695, %v1153_v10 }
 0x9f9   : > { %v1141_v20 = vpop.xlane.xlu0 %1140 }
 0x9fa   : > { %2517 = vpow2.f32 %v1159_v17  ;;  %v1151_v22 = vsub.f32 %v1135_v0, %v1141_v20 }
 0x9fc   : > { %v1155_v24 = vmul.f32 1.442695, %v1151_v22 }
 0x9fd   : > { %v1150_v18 = vpop.xlane.xlu0 %1149 }
 0x9fe   : > { %2519 = vpow2.f32 %v1155_v24  ;;  %v1154_v19 = vsub.f32 %v1138_v13, %v1150_v18 }
 0xa00   : > { %v1161_v21 = vmul.f32 1.442695, %v1154_v19 }
 0xa01   : > { %v1050_v25 = vpop.permute.xlu0 %1049 }
 0xa02   : > { %2521 = vpow2.f32 %v1161_v21  ;;  %1062 = vst.msk [vmem:[#allocation2] sm:$0xff] %vm1061_vm12, %v1050_v25 }
 0xa04   : > { %v3565_v29 = vpop.eup %2517 }
 0xa08   : > { %v3567_v30 = vpop.eup %2519 }
 0xa0c   : > { %v3569_v31 = vpop.eup %2521 }
 0xa0d   : > { %v1144_v32 = vpop.xlane.xlu1 %1143 }
 0xa0e   : > { %v1152_v33 = vsub.f32 %v1136_v11, %v1144_v32 }
 0xa10   : > { %v1157_v39 = vmul.f32 1.442695, %v1152_v33 }
 0xa11   : > { %v1056_v40 = vpop.permute.xlu1 %1055 }
 0xa12   : > { %2523 = vpow2.f32 %v1157_v39  ;;  %1065 = vst.msk [vmem:[#allocation2 + $0x18] sm:$0xff] %vm1061_vm12, %v1056_v40 }
 0xa1c   : > { %v3572_v41 = vpop.eup %2523 }
 0xa1d LB: >> { %v1177_v50 = vadd.f32 %v2909_v45, %v2925_v49  ;;  %v1179_v51 = vadd.f32 %v2901_v43, %v2917_v47  ;;  %v1178_v53 = vadd.f32 %v2905_v44, %v2921_v48  ;;  %v1180_v56 = vadd.f32 %v2897_v42, %v2913_v46  ;;  %s1168_s18 = sadd.s32 1, %s2929_s18   ;;  %s2929_s18 = sphi %s3590_s18, %s1168_s18   ;;  %v2925_v49 = vphi %v3588_v49, %v3890_v49   ;;  %v2921_v48 = vphi %v3586_v48, %v3889_v48   ;;  %v2917_v47 = vphi %v3584_v47, %v3888_v47   ;;  %v2913_v46 = vphi %v3582_v46, %v3887_v46   ;;  %v2909_v45 = vphi %v3580_v45, %v1217_v45   ;;  %v2905_v44 = vphi %v3578_v44, %v1218_v44   ;;  %v2901_v43 = vphi %v3576_v43, %v1219_v43   ;;  %v2897_v42 = vphi %v3574_v42, %v1220_v42  }
 0xa1e   : >> { %v2984_v58 = vmov 0.0   ;;  %p1165_p8 = scmp.ge.s32.totalorder %s1168_s18, 30  }
 0xa1f   : >> { %v1181_v52 = vmul.f32 0.5, %v1177_v50  ;;  %v1183_v54 = vmul.f32 0.5, %v1179_v51  ;;  %v1182_v55 = vmul.f32 0.5, %v1178_v53  ;;  %v1184_v61 = vmul.f32 0.5, %v1180_v56  ;;  %s2985_s19 = smov (%p1165_p8), 48   ;;  %s2986_s14 = smov (%p1165_p8), 72  }
 0xa20   : > { %v1231_v24 = vmul.f32 (%p1165_p8), 1.2, %v3565_v29  ;;  %v1229_v18 = vmul.f32 (%p1165_p8), 1.2, %v3567_v30  ;;  %v1232_v19 = vmul.f32 (%p1165_p8), 1.2, %v3569_v31 }
 0xa21   : >> { %vm1185_vm13 = vcmp.ge.f32.partialorder %v3567_v30, %v1181_v52  ;;  %vm1187_vm14 = vcmp.ge.f32.partialorder %v3565_v29, %v1183_v54  ;;  %vm1186_vm15 = vcmp.ge.f32.partialorder %v3572_v41, %v1182_v55  ;;  %vm1188_vm7 = vcmp.ge.f32.partialorder %v3569_v31, %v1184_v61  ;;  %s2987_s17 = smov (%p1165_p8), 104   ;;  %s2988_s16 = smov (%p1165_p8), 16  }
 0xa22   : >> { %v1952_v59 = vsel %vm1185_vm13, 1.0, %v2984_v58  ;;  %v1954_v0 = vsel %vm1187_vm14, 1.0, %v2984_v58  ;;  %v1953_v12 = vsel %vm1186_vm15, 1.0, %v2984_v58  ;;  %v1955_v14 = vsel %vm1188_vm7, 1.0, %v2984_v58  ;;  %s3712_s22 = smov (%p1165_p8), 0  }
 0xa23   : >> { %v1197_v60 = vsel %vm346_vm0, %v1952_v59, 0.0  ;;  %v1203_v62 = vsel %vm346_vm0, %v1954_v0, 0.0  ;;  %v1200_v13 = vsel %vm346_vm0, %v1953_v12, 0.0  ;;  %v1206_v11 = vsel %vm346_vm0, %v1955_v14, 0.0 }
 0xa24   : >> { %1198 = vadd.xlane.f32.xlu0 %v1197_v60  ;;  %1204 = vadd.xlane.f32.xlu1 %v1203_v62  ;;  %v1230_v21 = vmul.f32 (%p1165_p8), 1.2, %v3572_v41 }
 0xa28   : >> { %1201 = vadd.xlane.f32.xlu0 %v1200_v13  ;;  %1207 = vadd.xlane.f32.xlu1 %v1206_v11 }
 0xab1   : >> { %v1199_v15 = vpop.xlane.xlu0 %1198  ;;  %v1205_v16 = vpop.xlane.xlu1 %1204 }
 0xab2   : >> { %vm1209_vm9 = vcmp.ge.f32.partialorder %v1199_v15, 2.0  ;;  %vm1211_vm10 = vcmp.ge.f32.partialorder %v1205_v16, 2.0  ;;  %1167 = sbr.rel (!%p1165_p8) target bundleno = 2589 (0xa1d), region = 151 }
 0xab3   : >> { %v1213_v63 = vsel %vm1209_vm9, %v1181_v52, %v2925_v49   ;;  %v1217_v45 = vsel %vm1209_vm9, %v2909_v45, %v1181_v52   ;;  %v1215_v6 = vsel %vm1211_vm10, %v1183_v54, %v2917_v47   ;;  %v1219_v43 = vsel %vm1211_vm10, %v2901_v43, %v1183_v54  }
 0xab4   : >> { %v3888_v47 = vmov %v1215_v6  ;;  %v3890_v49 = vmov %v1213_v63  ;;  %vm1223_vm12 = vcmp.ge.f32.partialorder (%p1165_p8), %v3565_v29, %v1215_v6  ;;  %vm1221_vm13 = vcmp.ge.f32.partialorder (%p1165_p8), %v3567_v30, %v1213_v63 }
 0xab5   : >> { %v1202_v10 = vpop.xlane.xlu0 %1201  ;;  %v1208_v17 = vpop.xlane.xlu1 %1207  ;;  %vm1227_vm14 = vmor (%p1165_p8), %vm689_vm8, %vm1223_vm12 }
 0xab6   : >> { %vm1210_vm1 = vcmp.ge.f32.partialorder %v1202_v10, 2.0  ;;  %vm1212_vm11 = vcmp.ge.f32.partialorder %v1208_v17, 2.0  ;;  %v1235_v25 = vsel (%p1165_p8), %vm1227_vm14, %v1231_v24, %v3565_v29  ;;  %vm1225_vm9 = vmor (%p1165_p8), %vm689_vm8, %vm1221_vm13 }
 0xab7   : >> { %v1214_v20 = vsel %vm1210_vm1, %v1182_v55, %v2921_v48   ;;  %v1218_v44 = vsel %vm1210_vm1, %v2905_v44, %v1182_v55   ;;  %v1216_v22 = vsel %vm1212_vm11, %v1184_v61, %v2913_v46   ;;  %v1220_v42 = vsel %vm1212_vm11, %v2897_v42, %v1184_v61  }
 0xab8   : >> { %v3887_v46 = vmov %v1216_v22  ;;  %v3889_v48 = vmov %v1214_v20  ;;  %vm1224_vm15 = vcmp.ge.f32.partialorder (%p1165_p8), %v3569_v31, %v1216_v22  ;;  %vm1222_vm7 = vcmp.ge.f32.partialorder (%p1165_p8), %v3572_v41, %v1214_v20 }
 0xab9   : > { %v1243_v32 = vsel %vm346_vm0, %v1235_v25, 0.0  ;;  %v1233_v33 = vsel %vm1225_vm9, %v1229_v18, %v3567_v30  ;;  %vm1228_vm10 = vmor %vm689_vm8, %vm1224_vm15 }
 0xaba   : > { %1244 = vadd.xlane.f32.xlu1 %v1243_v32  ;;  %v1237_v39 = vsel %vm346_vm0, %v1233_v33, 0.0  ;;  %v1236_v40 = vsel %vm1228_vm10, %v1232_v19, %v3569_v31  ;;  %vm1226_vm1 = vmor %vm689_vm8, %vm1222_vm7 }
 0xabb   : > { %1238 = vadd.xlane.f32.xlu0 %v1237_v39  ;;  %v1246_v29 = vsel %vm346_vm0, %v1236_v40, 0.0  ;;  %v1234_v42 = vsel %vm1226_vm1, %v1230_v21, %v3572_v41 }
 0xabc   : > { %v1240_v43 = vsel %vm346_vm0, %v1234_v42, 0.0 }
 0xabe   : > { %1247 = vadd.xlane.f32.xlu1 %v1246_v29 }
 0xabf   : > { %1241 = vadd.xlane.f32.xlu0 %v1240_v43 }
 0xacf   : > { %1261 = vrot.lane.b32.xlu1 %v3253_v23, %s2985_s19 }
 0xad3   : > { %1345 = vrot.lane.b32.xlu1 %v3255_v26, %s2986_s14 }
 0xad5   : > { %1259 = vrot.lane.b32.xlu0 %v3255_v26, %s2985_s19 }
 0xad7   : > { %1347 = vrot.lane.b32.xlu1 %v3253_v23, %s2986_s14 }
 0xad9   : > { %1341 = vrot.lane.b32.xlu0 %v3261_v28, %s2987_s17 }
 0xadb   : > { %1343 = vrot.lane.b32.xlu1 %v3257_v27, %s2987_s17 }
 0xb47   : > { %v1245_v30 = vpop.xlane.xlu1 %1244 }
 0xb48   : > { %v1239_v31 = vpop.xlane.xlu0 %1238  ;;  %2525 = vrcp.f32 %v1245_v30 }
 0xb49   : > { %2527 = vrcp.f32 %v1239_v31 }
 0xb4b   : > { %v1248_v41 = vpop.xlane.xlu1 %1247 }
 0xb4c   : > { %2529 = vrcp.f32 %v1248_v41  ;;  %v1242_v44 = vpop.xlane.xlu0 %1241 }
 0xb4d   : > { %2531 = vrcp.f32 %v1242_v44 }
 0xb4f   : > { %v1262_v46 = vpop.permute.xlu1 %1261 }
 0xb50   : > { %v1260_v45 = vpop.permute.xlu0 %1259 }
 0xb51   : > { %2066 = vmatprep.subr.bf16.mxu0 %v1260_v45 }
 0xb52   : > { %2067 = vmatpush3.bf16.msra.mxu0 %v1260_v45  ;;  %v2526_v47 = vpop.eup %2525 }
 0xb53   : > { %2068 = vmatprep.subr.bf16.mxu0 %v1262_v46  ;;  %v1346_v48 = vpop.permute.xlu1 %1345  ;;  %v2528_v49 = vpop.eup %2527  ;;  %v1255_v27 = vmul.f32 %v2526_v47, %v1235_v25  ;;  %v3698_v47 = vmov 1.0  }
 0xb54   : > { %v1253_v52 = vmul.f32 %v2528_v49, %v1233_v33  ;;  %v1342_v56 = vpop.permute.xlu0 %1341  ;;  %v1356_v58 = vsel %vm532_vm2, %v1346_v48, 0  ;;  %v3702_v49 = vmov 1.0  }
 0xb56   : > { %v2530_v50 = vpop.eup %2529  ;;  %2069 = vmatpush3.bf16.msra.mxu0 %v1262_v46  ;;  %v3696_v46 = vmov 1.0  }
 0xb57   : > { %v2532_v28 = vpop.eup %2531  ;;  %v1256_v51 = vmul.f32 %v2530_v50, %v1236_v40  ;;  %2104 = vmatprep.subr.msk.bf16.mxu0 %vm532_vm2, %v1346_v48  ;;  %v1348_v59 = vpop.permute.xlu1 %1347  ;;  %v3700_v48 = vmov 1.0   ;;  %v3704_v50 = vmov 0.0  }
 0xb58   : > { %v1254_v53 = vmul.f32 %v2532_v28, %v1234_v42  ;;  %v1359_v60 = vsel %vm532_vm2, %v1348_v59, 0  ;;  %v3706_v28 = vmov 0.0  }
 0xb59   : > { %v1258_v54 = vpack.c.bf16 %v1256_v51, %v1255_v27  ;;  %v3708_v27 = vmov 0.0   ;;  %v3710_v51 = vmov 0.0  }
 0xb5a   : > { %v1257_v55 = vpack.c.bf16 %v1254_v53, %v1253_v52 }
 0xb5b   : > { %v1344_v0 = vpop.permute.xlu1 %1343 }
 0xb5c   : > { %2070 = vmatprep.mubr.msk.bf16.mxu0 %vm346_vm0, %v1257_v55 }
 0xb5d   : > { %2071 = vmatmul.mubr.msk.bf16.vlgmr.msra.gmra.mrb[12].mxu0 %vm346_vm0, %v1258_v54 }
 0xb5e   : > { %2078 = vmatprep.mubr.msk.bf16.mxu0 %vm532_vm2, %v1342_v56 }
 0xb5f   : > { %2075 = vmatpush3.bf16.xpose.msra.mxu0 %v1356_v58 }
 0xb60   : > { %2105 = vmatprep.subr.msk.bf16.mxu0 %vm532_vm2, %v1348_v59 }
 0xb67   : > { %2077 = vmatpush3.bf16.xpose.msra.mxu0 %v1359_v60 }
 0xb6e   : > { %2079 = vmatmul.mubr.msk.bf16.vlgmr.msra.gmra.mrb[16].mxu0 %vm532_vm2, %v1344_v0  ;;  %vm1336_vm2 = vcmask 195712  }
 0xc30   : > { %v2072_v61 = vpop.f32.mrb[12].mxu0 }
 0xc31   : > { %v1305_v62 = vpop.f32.mrb[13].mxu0 }
 0xc32   : > { %v2073_v12 = vpop.f32.mrb[14].mxu0 }
 0xc33   : > { %v1308_v13 = vpop.f32.mrb[15].mxu0 }
 0xc34   : > { %1326 = vrot.lane.b32.xlu1 %v1308_v13, %s2988_s16 }
 0xc38   : > { %1328 = vrot.lane.b32.xlu1 %v2072_v61, %s2988_s16 }
 0xc41   : > { %v2080_v14 = vpop.f32.mrb[16].mxu0 }
 0xc42   : > { %v1412_v11 = vsel %vm513_vm6, -1e+30, %v2080_v14  ;;  %v1395_v15 = vpop.f32.mrb[17].mxu0 }
 0xc43   : > { %v1420_v16 = vsel %vm346_vm0, %v1412_v11, -inf  ;;  %v1410_v63 = vsel %vm511_vm3, -1e+30, %v1395_v15  ;;  %v2081_v6 = vpop.f32.mrb[18].mxu0 }
 0xc44   : > { %1421 = vmax.xlane.f32.xlu0 %v1420_v16  ;;  %v1398_v10 = vpop.f32.mrb[19].mxu0  ;;  %v1414_v17 = vsel %vm346_vm0, %v1410_v63, -inf  ;;  %v1413_v20 = vsel %vm514_vm4, -1e+30, %v2081_v6 }
 0xc45   : > { %v1423_v38 = vsel %vm346_vm0, %v1413_v20, -inf  ;;  %v1411_v22 = vsel %vm512_vm5, -1e+30, %v1398_v10 }
 0xc46   : > { %v1417_v34 = vsel %vm346_vm0, %v1411_v22, -inf }
 0xc48   : > { %1415 = vmax.xlane.f32.xlu0 %v1414_v17 }
 0xc4c   : > { %1424 = vmax.xlane.f32.xlu0 %v1423_v38 }
 0xc5c   : > { %1418 = vmax.xlane.f32.xlu1 %v1417_v34 }
 0xc62   : > { %1324 = vrot.lane.b32.xlu0 %v1305_v62, %s2988_s16 }
 0xc6d   : > { %1330 = vrot.lane.b32.xlu1 %v2073_v12, %s2988_s16 }
 0xca6   : > { %v1327_v24 = vpop.permute.xlu1 %1326 }
 0xca7   : > { %1338 = vst.msk [vmem:[#allocation2 + $0x8] sm:$0xff] %vm1336_vm2, %v1327_v24 }
 0xcaa   : > { %v1329_v18 = vpop.permute.xlu1 %1328 }
 0xcab   : > { %1339 = vst.msk [vmem:[#allocation2 + $0x10] sm:$0xff] %vm1336_vm2, %v1329_v18 }
 0xcd1   : > { %v1422_v36 = vpop.xlane.xlu0 %1421 }
 0xcd2   : > { %v1428_v19 = vsub.f32 %v1412_v11, %v1422_v36 }
 0xcd4   : > { %v1434_v21 = vmul.f32 1.442695, %v1428_v19 }
 0xcd5   : > { %v1416_v25 = vpop.xlane.xlu0 %1415 }
 0xcd6   : > { %2533 = vpow2.f32 %v1434_v21  ;;  %v1426_v32 = vsub.f32 %v1410_v63, %v1416_v25 }
 0xcd8   : > { %v1430_v35 = vmul.f32 1.442695, %v1426_v32 }
 0xcd9   : > { %v1425_v37 = vpop.xlane.xlu0 %1424 }
 0xcda   : > { %2535 = vpow2.f32 %v1430_v35  ;;  %v1429_v33 = vsub.f32 %v1413_v20, %v1425_v37 }
 0xcdc   : > { %v1436_v39 = vmul.f32 1.442695, %v1429_v33 }
 0xcdd   : > { %v1325_v40 = vpop.permute.xlu0 %1324 }
 0xcde   : > { %2537 = vpow2.f32 %v1436_v39  ;;  %1337 = vst.msk [vmem:[#allocation2] sm:$0xff] %vm1336_vm2, %v1325_v40 }
 0xce0   : > { %v3687_v29 = vpop.eup %2533 }
 0xce4   : > { %v3689_v42 = vpop.eup %2535 }
 0xce8   : > { %v3691_v43 = vpop.eup %2537 }
 0xce9   : > { %v1419_v30 = vpop.xlane.xlu1 %1418 }
 0xcea   : > { %v1427_v31 = vsub.f32 %v1411_v22, %v1419_v30 }
 0xcec   : > { %v1432_v41 = vmul.f32 1.442695, %v1427_v31 }
 0xced   : > { %v1331_v44 = vpop.permute.xlu1 %1330 }
 0xcee   : > { %2539 = vpow2.f32 %v1432_v41  ;;  %1340 = vst.msk [vmem:[#allocation2 + $0x18] sm:$0xff] %vm1336_vm2, %v1331_v44 }
 0xcf8   : > { %v3694_v45 = vpop.eup %2539 }
 0xcf9 LB: >> { %v1452_v52 = vadd.f32 %v2945_v49, %v2961_v51  ;;  %v1454_v53 = vadd.f32 %v2937_v47, %v2953_v28  ;;  %v1453_v55 = vadd.f32 %v2941_v48, %v2957_v27  ;;  %v1455_v59 = vadd.f32 %v2933_v46, %v2949_v50  ;;  %s1443_s22 = sadd.s32 1, %s2965_s22   ;;  %s2965_s22 = sphi %s3712_s22, %s1443_s22   ;;  %v2961_v51 = vphi %v3710_v51, %v3894_v51   ;;  %v2957_v27 = vphi %v3708_v27, %v3893_v27   ;;  %v2953_v28 = vphi %v3706_v28, %v3892_v28   ;;  %v2949_v50 = vphi %v3704_v50, %v3891_v50   ;;  %v2945_v49 = vphi %v3702_v49, %v1492_v49   ;;  %v2941_v48 = vphi %v3700_v48, %v1493_v48   ;;  %v2937_v47 = vphi %v3698_v47, %v1494_v47   ;;  %v2933_v46 = vphi %v3696_v46, %v1495_v46  }
 0xcfa   : >> { %v2989_v60 = vmov 0.0   ;;  %p1440_p10 = scmp.ge.s32.totalorder %s1443_s22, 30  }
 0xcfb   : >> { %v1456_v54 = vmul.f32 0.5, %v1452_v52  ;;  %v1458_v56 = vmul.f32 0.5, %v1454_v53  ;;  %v1457_v58 = vmul.f32 0.5, %v1453_v55  ;;  %v1459_v12 = vmul.f32 0.5, %v1455_v59  ;;  %s2990_s20 = smov (%p1440_p10), 40   ;;  %s2991_s26 = smov (%p1440_p10), 24  }
 0xcfc   : > { %v1506_v24 = vmul.f32 (%p1440_p10), 1.2, %v3687_v29  ;;  %v1504_v18 = vmul.f32 (%p1440_p10), 1.2, %v3689_v42  ;;  %v1507_v36 = vmul.f32 (%p1440_p10), 1.2, %v3691_v43 }
 0xcfd   : >> { %vm1460_vm3 = vcmp.ge.f32.partialorder %v3689_v42, %v1456_v54  ;;  %vm1462_vm4 = vcmp.ge.f32.partialorder %v3687_v29, %v1458_v56  ;;  %vm1461_vm5 = vcmp.ge.f32.partialorder %v3694_v45, %v1457_v58  ;;  %vm1463_vm6 = vcmp.ge.f32.partialorder %v3691_v43, %v1459_v12  ;;  %s1977_s13 = sshll.u32 (%p1440_p10), %s3060_s9, 9  ;;  %s1717_s18 = sshll.u32 (%p1440_p10), %s3318_s11, 4  ;;  %s3804_s18 = int_to_ptr.vmem [resolvable:$true] %s1717_s18 }
 0xcfe   : >> { %v1960_v0 = vsel %vm1460_vm3, 1.0, %v2989_v60  ;;  %v1962_v62 = vsel %vm1462_vm4, 1.0, %v2989_v60  ;;  %v1961_v14 = vsel %vm1461_vm5, 1.0, %v2989_v60  ;;  %v1963_v15 = vsel %vm1463_vm6, 1.0, %v2989_v60  ;;  %s3799_s17 = scalar_lea.hbm (%p1440_p10), %s3861_s8, %s1977_s13  ;;  %s1704_s9 = scalar_lea.sflag (%p1440_p10), [#allocation5], %s3178_s10 }
 0xcff   : >> { %v1472_v61 = vsel %vm346_vm0, %v1960_v0, 0.0  ;;  %v1478_v13 = vsel %vm346_vm0, %v1962_v62, 0.0  ;;  %v1475_v11 = vsel %vm346_vm0, %v1961_v14, 0.0  ;;  %v1481_v16 = vsel %vm346_vm0, %v1963_v15, 0.0  ;;  %s2607_s16 = scalar_lea.vmem (%p1440_p10), %s3804_s18, 512  ;;  %s2992_s22 = smov (%p1440_p10), [#allocation8]  }
 0xd00   : >> { %1473 = vadd.xlane.f32.xlu0 %v1472_v61  ;;  %1479 = vadd.xlane.f32.xlu1 %v1478_v13  ;;  %v1505_v19 = vmul.f32 (%p1440_p10), 1.2, %v3694_v45  ;;  %v1966_v61 = vld [vmem:[%s3860_s7] ss:$0 sm:$0xff] (%p1440_p10)  ;;  %p2608_p13 = scmp.ne.s32.totalorder (%p1440_p10), %s3804_s18, %s2607_s16 }
 0xd02   : > { %p2609_p3 = pnand (%p1440_p10), %p2608_p13, %p3130_p12 }
 0xd04   : >> { %1476 = vadd.xlane.f32.xlu0 %v1475_v11  ;;  %1482 = vadd.xlane.f32.xlu1 %v1481_v16  ;;  %p2610_p7 = pneg (%p1440_p10), %p2609_p3 }
 0xd8d   : >> { %v1474_v63 = vpop.xlane.xlu0 %1473  ;;  %v1480_v6 = vpop.xlane.xlu1 %1479 }
 0xd8e   : >> { %vm1484_vm11 = vcmp.ge.f32.partialorder %v1474_v63, 2.0  ;;  %vm1486_vm12 = vcmp.ge.f32.partialorder %v1480_v6, 2.0  ;;  %1442 = sbr.rel (!%p1440_p10) target bundleno = 3321 (0xcf9), region = 162 }
 0xd8f   : >> { %v1488_v10 = vsel %vm1484_vm11, %v1456_v54, %v2961_v51   ;;  %v1492_v49 = vsel %vm1484_vm11, %v2945_v49, %v1456_v54   ;;  %v1490_v17 = vsel %vm1486_vm12, %v1458_v56, %v2953_v28   ;;  %v1494_v47 = vsel %vm1486_vm12, %v2937_v47, %v1458_v56  }
 0xd90   : >> { %v3892_v28 = vmov %v1490_v17  ;;  %v3894_v51 = vmov %v1488_v10  ;;  %vm1498_vm15 = vcmp.ge.f32.partialorder (%p1440_p10), %v3687_v29, %v1490_v17  ;;  %vm1496_vm7 = vcmp.ge.f32.partialorder (%p1440_p10), %v3689_v42, %v1488_v10 }
 0xd91   : >> { %v1477_v20 = vpop.xlane.xlu0 %1476  ;;  %v1483_v38 = vpop.xlane.xlu1 %1482  ;;  %vm1502_vm9 = vmor (%p1440_p10), %vm689_vm8, %vm1498_vm15  ;;  %v1967_v28 = vcombine.low (%p1440_p10), %v3200_v1, %v3205_v2 }
 0xd92   : >> { %vm1485_vm13 = vcmp.ge.f32.partialorder %v1477_v20, 2.0  ;;  %vm1487_vm14 = vcmp.ge.f32.partialorder %v1483_v38, 2.0  ;;  %v1510_v21 = vsel (%p1440_p10), %vm1502_vm9, %v1506_v24, %v3687_v29  ;;  %vm1500_vm2 = vmor (%p1440_p10), %vm689_vm8, %vm1496_vm7 }
 0xd93   : >> { %v1489_v22 = vsel %vm1485_vm13, %v1457_v58, %v2957_v27   ;;  %v1493_v48 = vsel %vm1485_vm13, %v2941_v48, %v1457_v58   ;;  %v1491_v34 = vsel %vm1487_vm14, %v1459_v12, %v2949_v50   ;;  %v1495_v46 = vsel %vm1487_vm14, %v2933_v46, %v1459_v12  }
 0xd94   : >> { %v3891_v50 = vmov %v1491_v34  ;;  %v3893_v27 = vmov %v1489_v22  ;;  %vm1499_vm10 = vcmp.ge.f32.partialorder (%p1440_p10), %v3691_v43, %v1491_v34  ;;  %vm1497_vm1 = vcmp.ge.f32.partialorder (%p1440_p10), %v3694_v45, %v1489_v22 }
 0xd95   : > { %v1518_v25 = vsel %vm346_vm0, %v1510_v21, 0.0  ;;  %v1508_v32 = vsel %vm1500_vm2, %v1504_v18, %v3689_v42  ;;  %vm1503_vm3 = vmor %vm689_vm8, %vm1499_vm10  ;;  %v1968_v27 = vcombine.low %v3211_v3, %v3216_v4 }
 0xd96   : > { %1519 = vadd.xlane.f32.xlu1 %v1518_v25  ;;  %v1512_v35 = vsel %vm346_vm0, %v1508_v32, 0.0  ;;  %v1511_v37 = vsel %vm1503_vm3, %v1507_v36, %v3691_v43  ;;  %vm1501_vm4 = vmor %vm689_vm8, %vm1497_vm1  ;;  %vm1611_vm8 = vcmask 261312  }
 0xd97   : > { %1513 = vadd.xlane.f32.xlu0 %v1512_v35  ;;  %v1521_v33 = vsel %vm346_vm0, %v1511_v37, 0.0  ;;  %v1509_v39 = vsel %vm1501_vm4, %v1505_v19, %v3694_v45 }
 0xd98   : > { %v1515_v40 = vsel %vm346_vm0, %v1509_v39, 0.0 }
 0xd9a   : > { %1522 = vadd.xlane.f32.xlu1 %v1521_v33 }
 0xd9b   : > { %1516 = vadd.xlane.f32.xlu0 %v1515_v40 }
 0xdab   : > { %1536 = vrot.lane.b32.xlu1 %v3253_v23, %s2990_s20 }
 0xdb1   : > { %1534 = vrot.lane.b32.xlu0 %v3255_v26, %s2990_s20  ;;  %s2611_s20 = sshll.u32 %s2992_s22, 4  ;;  %s2612_s20 = int_to_ptr.vmem [resolvable:$false] %s2611_s20 }
 0xdb2   : > { %p2614_p9 = scmp.lt.s32.totalorder %s3804_s18, %s2612_s20 }
 0xe23   : > { %v1520_v29 = vpop.xlane.xlu1 %1519 }
 0xe24   : > { %v1514_v42 = vpop.xlane.xlu0 %1513  ;;  %2541 = vrcp.f32 %v1520_v29 }
 0xe25   : > { %2543 = vrcp.f32 %v1514_v42 }
 0xe27   : > { %v1523_v57 = vpop.xlane.xlu1 %1522 }
 0xe28   : > { %2545 = vrcp.f32 %v1523_v57  ;;  %v1517_v43 = vpop.xlane.xlu0 %1516 }
 0xe29   : > { %2547 = vrcp.f32 %v1517_v43 }
 0xe2b   : > { %v1537_v31 = vpop.permute.xlu1 %1536 }
 0xe2c   : > { %v1535_v30 = vpop.permute.xlu0 %1534 }
 0xe2d   : > { %2082 = vmatprep.subr.bf16.mxu1 %v1535_v30 }
 0xe2e   : > { %2083 = vmatpush3.bf16.msra.mxu1 %v1535_v30  ;;  %v2542_v41 = vpop.eup %2541 }
 0xe2f   : > { %2084 = vmatprep.subr.bf16.mxu1 %v1537_v31  ;;  %v2544_v44 = vpop.eup %2543  ;;  %v1530_v46 = vmul.f32 %v2542_v41, %v1510_v21 }
 0xe30   : > { %v1528_v47 = vmul.f32 %v2544_v44, %v1508_v32 }
 0xe32   : > { %v2546_v45 = vpop.eup %2545  ;;  %2085 = vmatpush3.bf16.msra.mxu1 %v1537_v31 }
 0xe33   : > { %v2548_v23 = vpop.eup %2547  ;;  %v1531_v26 = vmul.f32 %v2546_v45, %v1511_v37  ;;  %2090 = vmatprep.subr.bf16.mxu1 %v1967_v28 }
 0xe34   : > { %v1529_v48 = vmul.f32 %v2548_v23, %v1509_v39 }
 0xe35   : > { %v1533_v49 = vpack.c.bf16 %v1531_v26, %v1530_v46 }
 0xe36   : > { %v1532_v50 = vpack.c.bf16 %v1529_v48, %v1528_v47 }
 0xe38   : > { %2086 = vmatprep.mubr.msk.bf16.mxu1 %vm346_vm0, %v1532_v50 }
 0xe39   : > { %2087 = vmatmul.mubr.msk.bf16.vlgmr.msra.gmra.mrb[12].mxu1 %vm346_vm0, %v1533_v49 }
 0xe3a   : > { %2091 = vmatpush3.bf16.msra.mxu1 %v1967_v28 }
 0xe3b   : > { %2092 = vmatprep.subr.bf16.mxu1 %v1968_v27 }
 0xe3e   : > { %2093 = vmatpush3.bf16.msra.mxu1 %v1968_v27 }
 0xf0c   : > { %v2088_v51 = vpop.f32.mrb[12].mxu1 }
 0xf0d   : > { %1603 = vrot.lane.b32.xlu0 %v2088_v51, %s2991_s26  ;;  %v1580_v52 = vpop.f32.mrb[13].mxu1 }
 0xf0e   : > { %1599 = vrot.lane.b32.xlu1 %v1580_v52, %s2991_s26  ;;  %v2089_v53 = vpop.f32.mrb[14].mxu1 }
 0xf0f   : > { %v1583_v54 = vpop.f32.mrb[15].mxu1 }
 0xf12   : > { %1601 = vrot.lane.b32.xlu1 %v1583_v54, %s2991_s26 }
 0xf16   : > { %1605 = vrot.lane.b32.xlu1 %v2089_v53, %s2991_s26  ;;  %s2613_s26 = scalar_lea.vmem %s2612_s20, 1024 }
 0xf17   : > { %p2615_p2 = scmp.lt.s32.totalorder %s2613_s26, %s2607_s16 }
 0xf19   : > { %p2616_p0 = por %p2615_p2, %p2614_p9 }
 0xf1b   : > { %p2617_p5 = pnand %p2616_p0, %p2610_p7 }
 0xf7f   : > { %v1604_v55 = vpop.permute.xlu0 %1603 }
 0xf80   : > { %1614 = vst.msk [vmem:[#allocation2 + $0x10] sm:$0xff] %vm1611_vm8, %v1604_v55  ;;  %v1600_v1 = vpop.permute.xlu1 %1599 }
 0xf81   : > { %1612 = vst.msk [vmem:[#allocation2] sm:$0xff] %vm1611_vm8, %v1600_v1 }
 0xf84   : > { %v1602_v2 = vpop.permute.xlu1 %1601 }
 0xf85   : > { %1613 = vst.msk [vmem:[#allocation2 + $0x8] sm:$0xff] %vm1611_vm8, %v1602_v2 }
 0xf87   : > { %v1618_v59 = vld [vmem:[#allocation2 + $0x10] sm:$0xff] }
 0xf88   : > { %v1606_v3 = vpop.permute.xlu1 %1605  ;;  %v1616_v4 = vld [vmem:[#allocation2] sm:$0xff] }
 0xf89   : > { %1615 = vst.msk [vmem:[#allocation2 + $0x18] sm:$0xff] %vm1611_vm8, %v1606_v3 }
 0xf8c   : > { %v1617_v56 = vld [vmem:[#allocation2 + $0x8] sm:$0xff] }
 0xf8d   : > { %v1620_v58 = vpack.c.bf16 %v1617_v56, %v1616_v4 }
 0xf8f   : > { %2094 = vmatprep.mubr.msk.bf16.mxu1 %vm346_vm0, %v1620_v58 }
 0xf90   : > { %v1619_v60 = vld [vmem:[#allocation2 + $0x18] sm:$0xff] }
 0xf91   : > { %v1621_v0 = vpack.c.bf16 %v1619_v60, %v1618_v59 }
 0xf93   : > { %2095 = vmatmul.mubr.msk.bf16.vlgmr.msra.gmra.mrb[16].mxu1 %vm346_vm0, %v1621_v0 }
0x1066   : > { %v2096_v62 = vpop.f32.mrb[16].mxu1 }
0x1067   : > { %v1689_v12 = vadd.f32 %v2096_v62, %v1966_v61  ;;  %v1680_v13 = vpop.f32.mrb[17].mxu1 }
0x1068   : > { %v1681_v14 = vadd.f32 %v1966_v61, %v1680_v13  ;;  %v2097_v11 = vpop.f32.mrb[18].mxu1 }
0x1069   : > { %v1697_v15 = vadd.f32 %v1689_v12, %v3222_v7  ;;  %v1692_v16 = vadd.f32 %v2097_v11, %v1966_v61  ;;  %v1683_v63 = vpop.f32.mrb[19].mxu1 }
0x106a   : > { %v1695_v6 = vadd.f32 %v1681_v14, %v3218_v5  ;;  %v1684_v10 = vadd.f32 %v1966_v61, %v1683_v63 }
0x106b   : > { %1701 = vst.msk [vmem:[%s3318_s11 + $0x10] sm:$0xff] %vm346_vm0, %v1697_v15  ;;  %v1698_v17 = vadd.f32 %v1692_v16, %v3226_v9 }
0x106c   : > { %1699 = vst.msk [vmem:[%s3318_s11] sm:$0xff] %vm346_vm0, %v1695_v6  ;;  %v1696_v7 = vadd.f32 %v1684_v10, %v3224_v8 }
0x106d   : > { %1702 = vst.msk [vmem:[%s3318_s11 + $0x18] sm:$0xff] %vm346_vm0, %v1698_v17 }
0x106e   : > { %1700 = vst.msk [vmem:[%s3318_s11 + $0x8] sm:$0xff] %vm346_vm0, %v1696_v7 }
0x106f   : > { %2620 = shalt.err (!%p2617_p5)
}
0x1070   : > { %s2621_s11 = scalar_lea.hbm %s3799_s17, 512  ;;  %s2625_s13 = scalar_lea.hbm %s3861_s8, 1024 }
0x1071   : > { %p2622_p11 = scmp.ne.s32.totalorder %s3799_s17, %s2621_s11  ;;  %p2626_p6 = scmp.lt.u32.totalorder %s3799_s17, %s3861_s8 }
0x1072   : > { %p2627_p8 = scmp.lt.u32.totalorder %s2625_s13, %s2621_s11  ;;  %p2629_p13 = scmp.lt.u32.totalorder %s2621_s11, %s3799_s17 }
0x1073   : > { %p2623_p1 = pnand %p2622_p11, %p3130_p12 }
0x1074   : > { %p2628_p10 = por %p2627_p8, %p2626_p6 }
0x1075   : > { %p2624_p4 = pneg %p2623_p1 }
0x1076   : > { %p2630_p3 = por %p2629_p13, %p2628_p10 }
0x1078   : > { %p2631_p7 = pnand %p2630_p3, %p2624_p4 }
0x107a   : > { %2634 = shalt.err (!%p2631_p7)
}
0x107b   : > { %s2993_s16 = smov 128  }
0x107c   : > { %2112 = dma.vmem_to_hbm [thread:$0]  (%p3130_p12), %s3804_s18, 512, %s3799_s17, %s1704_s9, %s2993_s16, %s2993_s16, %s2983_s21  }
0x107d PF: > { %s1732_s22 = sand.u32 1, %s2809_s27   ;;  %p3895_p9 = scmp.ne.s32.totalorder %s3868_s12, 0 }
0x107e   : > { %p3896_p2 = scmp.ge.s32.totalorder %s2821_s30, 2  ;;  %s1733_s20 = scalar_lea.sflag [#allocation5], %s1732_s22 }
0x1080   : > { %p2123_p0 = pnand %p3896_p2, %p3895_p9 }
0x1082   : > { %2804 = dma.done.wait (!%p2123_p0), %s1733_s20, 512  }
0x1083   : > { %2806 = vsyncadd (!%p2123_p0), %s1733_s20, 4294966784  ;;  %s3897_s30 = sld [smem:[#allocation12_spill]]  ;;  %s3898_s27 = smov %s2813_s28 }
0x1084   : > { %s3899_s28 = smov %s2817_s29  ;;  %s3900_s29 = smov %s3126_s23 }
0x1089   : > { %p22_p5 = scmp.ge.s32.totalorder %s3897_s30, 4  }
0x108b   :  { %24 = sbr.rel (!%p22_p5) target bundleno = 6 (0x6), region = 173 }
0x1092   :  { %1738 = vsyncpa [#allocation4], 1 }
0x1093   :  { %1740 = vsyncpa [#allocation4 + $0x1], 1 }
0x1094   :  { %1741 = vsyncpa [#allocation7], 1 }
0x1095   :  { %1742 = vsyncpa [#allocation5], 1 }
0x1096   :  { %1744 = vsyncpa [#allocation5 + $0x1], 1 }

// kernel: tpu_custom_call.1
= control target key start
LH: loop header
LB: loop body
LE: loop exit
PB: predicated region body
PF: predicated region fallthrough
CT: control target
= control target key end

     0   :  { %13 = vsyncpa [#allocation4], 0  ;;  %s3853_s0 = inlined_call_operand.hbm [shape: f32[2,32,32], index: 0, kind: input, shape index: {}]   ;;  %s3854_s1 = inlined_call_operand.vmem [shape: s32[1,32], index: 1, kind: input, shape index: {}]   ;;  %s3855_s2 = inlined_call_operand.vmem [shape: f32[1,32], index: 2, kind: input, shape index: {}]   ;;  %s3856_s3 = inlined_call_operand.vmem [shape: f32[1,32], index: 3, kind: input, shape index: {}]   ;;  %s3857_s4 = inlined_call_operand.hbm [shape: bf16[32,96], index: 4, kind: input, shape index: {}]   ;;  %s3858_s5 = inlined_call_operand.vmem [shape: f32[1,96], index: 5, kind: input, shape index: {}]   ;;  %s3859_s6 = inlined_call_operand.vmem [shape: bf16[32,32], index: 6, kind: input, shape index: {}]   ;;  %s3860_s7 = inlined_call_operand.vmem [shape: f32[1,32], index: 7, kind: input, shape index: {}]   ;;  %s3861_s8 = inlined_call_operand.hbm [shape: f32[2,32,32], index: 8, kind: output, shape index: {}]  }
   0x1   :  { %15 = vsyncpa [#allocation4 + $0x1], 0 }
   0x2   :  { %16 = vsyncpa [#allocation7], 0 }
   0x3   :  { %17 = vsyncpa [#allocation5], 0 }
   0x4   :  { %19 = vsyncpa [#allocation5 + $0x1], 0  ;;  %s3039_s27 = smov 0   ;;  %s3041_s28 = smov 0  }
   0x5   :  { %s3043_s29 = smov 0   ;;  %s3045_s30 = smov 0  }
   0x6 LB: > { %s3060_s9 = sadd.s32 4294967295, %s2821_s30   ;;  %s1916_s10 = sadd.s32 4294967294, %s2821_s30   ;;  %s2821_s30 = sphi %s3045_s30, %s3897_s30   ;;  %s2817_s29 = sphi %s3043_s29, %s3900_s29   ;;  %s2813_s28 = sphi %s3041_s28, %s3899_s28   ;;  %s2809_s27 = sphi %s3039_s27, %s3898_s27  }
   0x7   : > { %p45_p0 = scmp.ne.s32.totalorder %s2813_s28, %s2809_s27  ;;  %p3862_p1 = scmp.eq.s32.totalorder %s3060_s9, 0 }
   0x8   : > { %p222_p3 = scmp.eq.s32.totalorder %s1916_s10, 1  ;;  %p1917_p5 = scmp.ge.s32.totalorder %s2821_s30, 1 }
   0x9   : > { %p3069_p4 = por %p3862_p1, %p45_p0  ;;  %p229_p7 = scmp.lt.s32.totalorder %s2821_s30, 3 }
   0xa   : > { %p3074_p6 = por %p222_p3, %p45_p0  ;;  %s2967_s14 = smov [#allocation6]  }
   0xb   : > { %s3867_s11 = scalar_select %p3069_p4, 1, 0 }
   0xc   : > { %s3868_s12 = scalar_select %p3074_p6, 1, 0 }
   0xd   : > { %p3079_p8 = pnand %p1917_p5, %p229_p7  ;;  %s250_s15 = sshll.u32 %s2967_s14, 4  ;;  %s3083_s15 = int_to_ptr.vmem [resolvable:$true] %s250_s15 }
   0xe   : > { %s3095_s17 = sadd.s32 1, %s2821_s30   ;;  %s32_s18 = sadd.s32 1, %s2817_s29 }
   0xf   : > { %s3869_s13 = scalar_select %p3079_p8, 1, 0 }
  0x10   : > { %p2114_p9 = pneg %p3079_p8  ;;  %3871 = sst [smem:[#allocation12_spill]] %s3095_s17 }
  0x11   : > { %s29_s19 = ssub.s32 %s2821_s30, %s3095_s17  ;;  %s2549_s22 = scalar_lea.hbm %s3857_s4, 256 }
  0x12   : > { %p3090_p11 = pnand %p2114_p9, %p3862_p1  ;;  %p2550_p12 = scmp.ne.s32.totalorder %s3857_s4, %s2549_s22 }
  0x13   : > { %p2556_p5 = scmp.lt.u32.totalorder %s2549_s22, %s3857_s4 }
  0x14   : > { %p2551_p13 = pneg %p3090_p11 }
  0x16   : > { %p2552_p0 = pnand %p2551_p13, %p2550_p12 }
  0x18   : > { %p2553_p3 = pneg %p2552_p0 }
  0x1a   : > { %p2558_p7 = pnand %p2556_p5, %p2553_p3 }
  0x1c   : > { %2561 = shalt.err (!%p2558_p7)
}
  0x1d   : > { %s2562_s10 = scalar_lea.vmem %s3083_s15, 256  ;;  %p2570_p2 = scmp.lt.s32.totalorder %s3083_s15, %s3083_s15 }
  0x1e   : > { %p2563_p9 = scmp.ne.s32.totalorder %s3083_s15, %s2562_s10  ;;  %p2571_p6 = scmp.lt.s32.totalorder %s2562_s10, %s2562_s10 }
  0x20   : > { %p2565_p10 = pnand %p2563_p9, %p2551_p13  ;;  %p2572_p4 = por %p2571_p6, %p2570_p2 }
  0x22   : > { %p2566_p1 = pneg %p2565_p10 }
  0x24   : > { %p2573_p8 = pnand %p2572_p4, %p2566_p1 }
  0x26   : > { %2576 = shalt.err (!%p2573_p8)
}
  0x27   : > { %s2968_s14 = smov 64   ;;  %s2969_s20 = smov 4  }
  0x28   : > { %2117 = dma.hbm_to_vmem [thread:$0]  (!%p3090_p11), %s3857_s4, 256, %s3083_s15, [#allocation7], %s2968_s14, %s2968_s14, %s2969_s20  }
  0x29   : > { %p30_p2 = scmp.eq.s32.totalorder %s29_s19, 0  ;;  %p39_p1 = scmp.ne.s32.totalorder %s2817_s29, %s2813_s28 }
  0x2a   : > { %p40_p4 = scmp.eq.s32.totalorder %s2821_s30, 0  ;;  %p2127_p6 = scmp.lt.s32.totalorder %s2821_s30, 2 }
  0x2b   : > { %s3126_s23 = scalar_select %p30_p2, %s2817_s29, %s32_s18  }
  0x2c   : > { %p41_p8 = por %p40_p4, %p39_p1  ;;  %p3872_p10 = scmp.eq.s32.totalorder %s3060_s9, 1 }
  0x2d   : > { %s273_s25 = sand.u32 1, %s2817_s29   ;;  %s1976_s26 = sshll.u32 %s2821_s30, 9 }
  0x2e   : > { %p3130_p12 = por %p3872_p10, %p39_p1  ;;  %s1920_s10 = sshll.u32 %s273_s25, 5 }
  0x2f   : > { %s3139_s21 = scalar_lea.hbm %s3853_s0, %s1976_s26  ;;  %s277_s15 = scalar_lea.vmem [#allocation3], %s1920_s10 }
  0x30   : > { %s284_s18 = sshll.u32 %s277_s15, 4  ;;  %p3141_p11 = pnand %p2127_p6, %p41_p8  ;;  %s3145_s18 = int_to_ptr.vmem [resolvable:$true] %s284_s18 }
  0x31   : > { %s3147_s14 = scalar_lea.sflag [#allocation4], %s273_s25  ;;  %s2577_s20 = scalar_lea.hbm %s3139_s21, 512 }
  0x32   : > { %p2578_p13 = scmp.ne.s32.totalorder %s3139_s21, %s2577_s20  ;;  %p2579_p0 = pneg %p3141_p11 }
  0x33   : > { %s2582_s26 = scalar_lea.hbm %s3853_s0, 1024  ;;  %p2583_p7 = scmp.lt.u32.totalorder %s3139_s21, %s3853_s0 }
  0x34   : > { %p2580_p3 = pnand %p2579_p0, %p2578_p13  ;;  %p2584_p9 = scmp.lt.u32.totalorder %s2582_s26, %s2577_s20 }
  0x35   : > { %p2586_p1 = scmp.lt.u32.totalorder %s2577_s20, %s3139_s21 }
  0x36   : > { %p2581_p5 = pneg %p2580_p3  ;;  %p2585_p2 = por %p2584_p9, %p2583_p7 }
  0x38   : > { %p2587_p4 = por %p2586_p1, %p2585_p2 }
  0x3a   : > { %p2588_p6 = pnand %p2587_p4, %p2581_p5 }
  0x3c   : > { %2591 = shalt.err (!%p2588_p6)
}
  0x3d   : > { %s2592_s25 = scalar_lea.vmem %s3145_s18, 512  ;;  %s2970_s15 = smov [#allocation3]  }
  0x3e   : > { %p2593_p8 = scmp.ne.s32.totalorder %s3145_s18, %s2592_s25  ;;  %s2597_s17 = sshll.u32 %s2970_s15, 4  ;;  %s2598_s17 = int_to_ptr.vmem [resolvable:$false] %s2597_s17 }
  0x3f   : > { %s2599_s22 = scalar_lea.vmem %s2598_s17, 1024  ;;  %p2600_p3 = scmp.lt.s32.totalorder %s3145_s18, %s2598_s17 }
  0x40   : > { %p2595_p10 = pnand %p2593_p8, %p2579_p0  ;;  %p2601_p7 = scmp.lt.s32.totalorder %s2599_s22, %s2592_s25 }
  0x42   : > { %p2596_p13 = pneg %p2595_p10  ;;  %p2602_p9 = por %p2601_p7, %p2600_p3 }
  0x44   : > { %p2603_p2 = pnand %p2602_p9, %p2596_p13 }
  0x46   : > { %2606 = shalt.err (!%p2603_p2)
}
  0x47   : > { %s2971_s20 = smov 128   ;;  %s2972_s26 = smov 8  }
  0x48   : > { %2121 = dma.hbm_to_vmem [thread:$0]  (!%p3141_p11), %s3139_s21, 512, %s3145_s18, %s3147_s14, %s2971_s20, %s2971_s20, %s2972_s26  }
  0x49   : > { %p3875_p0 = scmp.ne.s32.totalorder %s3869_s13, 0 }
  0x4a   : > { %s3178_s10 = sand.u32 (!%p3875_p0), 1, %s2813_s28   ;;  %p3876_p5 = scmp.ne.s32.totalorder (!%p3875_p0), %s3867_s11, 0 }
  0x4b   : > { %296 = sbr.rel (%p3875_p0) target bundleno = 4221 (0x107d), region = 52  ;;  %s1924_s16 = sshll.u32 (!%p3875_p0), %s3178_s10, 5 }
  0x4c   : > { %s299_s25 = scalar_lea.sflag (!%p3875_p0), [#allocation4], %s3178_s10  ;;  %s302_s15 = scalar_lea.vmem (!%p3875_p0), [#allocation3], %s1924_s16 }
  0x52   : > { %2796 = dma.done.wait (%p3876_p5), %s299_s25, 512  }
  0x53   : > { %2798 = vsyncadd (%p3876_p5), %s299_s25, 4294966784  ;;  %p3877_p11 = scmp.eq.s32.totalorder %s3060_s9, 0 }
  0x55   : > { %2800 = dma.done.wait (%p3877_p11), [#allocation7], 256   ;;  %p3878_p1 = pmov %p3877_p11 }
  0x56   : > { %vm346_vm0 = vcmask 261120   ;;  %v3195_v0 = vld [vmem:[%s3854_s1] sm:$0x1]  ;;  %v3205_v2 = vld [vmem:[%s3859_s6 + $0x4] sm:$0xf]  ;;  %v3222_v7 = vld [vmem:[%s302_s15 + $0x10] sm:$0xff] }
  0x57   : > { %2802 = vsyncadd (%p3878_p1), [#allocation7], 4294967040  ;;  %v3200_v1 = vld [vmem:[%s3859_s6] sm:$0xf]  ;;  %vm516_vm1 = vcmp.gt.s32.totalorder %v3195_v0, 0  ;;  %v3224_v8 = vld [vmem:[%s302_s15 + $0x8] sm:$0xff] }
  0x58   : > { %v3211_v3 = vld [vmem:[%s3859_s6 + $0x8] sm:$0xf]  ;;  %v3216_v4 = vld [vmem:[%s3859_s6 + $0xc] sm:$0xf]  ;;  %v3218_v5 = vld [vmem:[%s302_s15] sm:$0xff]  ;;  %v353_v10 = vsel %vm346_vm0, %v3222_v7, 0.0 }
  0x59   : > { %v347_v6 = vsel %vm346_vm0, %v3218_v5, 0.0  ;;  %v3226_v9 = vld [vmem:[%s302_s15 + $0x18] sm:$0xff]  ;;  %v350_v11 = vsel %vm346_vm0, %v3224_v8, 0.0  ;;  %354 = vadd.xlane.f32.xlu1 %v353_v10  ;;  %v2475_v33 = vld [vmem:[#allocation6] sm:$0xff]   ;;  %v2476_v34 = vld [vmem:[#allocation6 + $0x8] sm:$0xff]   ;;  %s2973_s14 = smov 96  }
  0x5a   : > { %348 = vadd.xlane.f32.xlu0 %v347_v6  ;;  %v356_v12 = vsel %vm346_vm0, %v3226_v9, 0.0  ;;  %2018 = vmatprep.subr.bf16.mxu0 %v2475_v33  ;;  %v1927_v49 = vld [vmem:[%s3855_s2] ss:$0 sm:$0xff]  ;;  %vm532_vm2 = vcmask 64512   ;;  %s3318_s11 = scalar_lea.vmem [#allocation8], %s1924_s16  ;;  %s3336_s17 = smov 0  }
  0x5b   : > { %2019 = vmatpush3.bf16.msra.mxu0 %v2475_v33  ;;  %v1928_v55 = vld [vmem:[%s3856_s3] ss:$0 sm:$0xff]  ;;  %v504_v33 = vlaneseq }
  0x5c   : > { %2020 = vmatprep.subr.bf16.mxu0 %v2476_v34 }
  0x5d   : > { %357 = vadd.xlane.f32.xlu1 %v356_v12  ;;  %v1929_v12 = vld [vmem:[%s3858_s5] ss:$0 sm:$0xff] }
  0x5e   : > { %351 = vadd.xlane.f32.xlu0 %v350_v11 }
  0x5f   : > { %2021 = vmatpush3.bf16.msra.mxu0 %v2476_v34  ;;  %v3271_v34 = vshrl.u32 %v504_v33, 7 }
  0xe6   : > { %v355_v15 = vpop.xlane.xlu1 %354 }
  0xe7   : > { %v349_v13 = vpop.xlane.xlu0 %348  ;;  %v362_v16 = vmul.f32 0.03125, %v355_v15 }
  0xe8   : > { %v360_v14 = vmul.f32 0.03125, %v349_v13 }
  0xe9   : > { %v366_v18 = vsub.f32 %v3222_v7, %v362_v16 }
  0xea   : > { %v364_v17 = vsub.f32 %v3218_v5, %v360_v14  ;;  %v358_v21 = vpop.xlane.xlu1 %357 }
  0xeb   : > { %v352_v19 = vpop.xlane.xlu0 %351  ;;  %v363_v23 = vmul.f32 0.03125, %v358_v21  ;;  %v370_v24 = vmul.f32 %v366_v18, %v366_v18 }
  0xec   : > { %v361_v20 = vmul.f32 0.03125, %v352_v19  ;;  %v368_v22 = vmul.f32 %v364_v17, %v364_v17 }
  0xed   : > { %v367_v27 = vsub.f32 %v3226_v9, %v363_v23  ;;  %v378_v28 = vsel %vm346_vm0, %v370_v24, 0.0 }
  0xee   : > { %v365_v25 = vsub.f32 %v3224_v8, %v361_v20  ;;  %v372_v26 = vsel %vm346_vm0, %v368_v22, 0.0 }
  0xef   : > { %373 = vadd.xlane.f32.xlu0 %v372_v26  ;;  %v371_v30 = vmul.f32 %v367_v27, %v367_v27 }
  0xf0   : > { %v369_v29 = vmul.f32 %v365_v25, %v365_v25 }
  0xf1   : > { %v381_v32 = vsel %vm346_vm0, %v371_v30, 0.0 }
  0xf2   : > { %v375_v31 = vsel %vm346_vm0, %v369_v29, 0.0 }
  0xf3   : > { %379 = vadd.xlane.f32.xlu0 %v378_v28  ;;  %376 = vadd.xlane.f32.xlu1 %v375_v31 }
  0xf7   : > { %382 = vadd.xlane.f32.xlu1 %v381_v32 }
 0x17c   : > { %v374_v35 = vpop.xlane.xlu0 %373 }
 0x17d   : > { %v384_v36 = vmul.f32 0.03125, %v374_v35  ;;  %v3273_v35 = vand.u32 127, %v504_v33 }
 0x17f   : > { %v388_v37 = vadd.f32 1e-05, %v384_v36  ;;  %v3276_v36 = vadd.s32 24, %v3271_v34  ;;  %vm511_vm3 = vcmp.gt.s32.totalorder %v3273_v35, %v3271_v34 }
 0x180   : > { %v377_v38 = vpop.xlane.xlu1 %376  ;;  %v380_v39 = vpop.xlane.xlu0 %379 }
 0x181   : > { %2477 = vrsqrt.f32 %v388_v37  ;;  %v385_v40 = vmul.f32 0.03125, %v377_v38  ;;  %v386_v41 = vmul.f32 0.03125, %v380_v39  ;;  %v3279_v37 = vadd.s32 8, %v3271_v34 }
 0x182   : > { %v3282_v38 = vadd.s32 16, %v3271_v34  ;;  %vm514_vm4 = vcmp.gt.s32.totalorder %v3273_v35, %v3276_v36 }
 0x183   : > { %v389_v42 = vadd.f32 1e-05, %v385_v40  ;;  %v390_v43 = vadd.f32 1e-05, %v386_v41  ;;  %vm512_vm5 = vcmp.gt.s32.totalorder %v3273_v35, %v3279_v37 }
 0x184   : > { %v383_v44 = vpop.xlane.xlu1 %382  ;;  %vm513_vm6 = vcmp.gt.s32.totalorder %v3273_v35, %v3282_v38 }
 0x185   : > { %2479 = vrsqrt.f32 %v389_v42  ;;  %v387_v45 = vmul.f32 0.03125, %v383_v44 }
 0x186   : > { %2481 = vrsqrt.f32 %v390_v43 }
 0x187   : > { %v391_v46 = vadd.f32 1e-05, %v387_v45 }
 0x189   : > { %2483 = vrsqrt.f32 %v391_v46 }
 0x18b   : > { %v2478_v47 = vpop.eup %2477 }
 0x18c   : > { %v396_v48 = vmul.f32 %v2478_v47, %v364_v17 }
 0x18e   : > { %v406_v53 = vmul.f32 %v1927_v49, %v396_v48 }
 0x18f   : > { %v2480_v50 = vpop.eup %2479 }
 0x190   : > { %v2482_v51 = vpop.eup %2481  ;;  %v397_v52 = vmul.f32 %v2480_v50, %v365_v25  ;;  %v416_v59 = vadd.f32 %v1928_v55, %v406_v53 }
 0x191   : > { %v398_v54 = vmul.f32 %v2482_v51, %v366_v18 }
 0x192   : > { %v407_v56 = vmul.f32 %v1927_v49, %v397_v52 }
 0x193   : > { %v2484_v57 = vpop.eup %2483  ;;  %v408_v61 = vmul.f32 %v1927_v49, %v398_v54 }
 0x194   : > { %v399_v58 = vmul.f32 %v2484_v57, %v367_v27  ;;  %v417_v60 = vadd.f32 %v1928_v55, %v407_v56 }
 0x195   : > { %v418_v6 = vadd.f32 %v1928_v55, %v408_v61 }
 0x196   : > { %v420_v62 = vpack.c.bf16 %v417_v60, %v416_v59  ;;  %v409_v63 = vmul.f32 %v1927_v49, %v399_v58 }
 0x198   : > { %2022 = vmatprep.mubr.msk.bf16.mxu0 %vm346_vm0, %v420_v62  ;;  %v419_v10 = vadd.f32 %v1928_v55, %v409_v63 }
 0x19a   : > { %v421_v11 = vpack.c.bf16 %v419_v10, %v418_v6 }
 0x19c   : > { %2023 = vmatmul.mubr.msk.bf16.vlgmr.msra.gmra.mrb[0].mxu0 %vm346_vm0, %v421_v11 }
 0x26f   : > { %v2024_v13 = vpop.f32.mrb[0].mxu0 }
 0x270   : > { %v494_v14 = vadd.f32 %v2024_v13, %v1929_v12  ;;  %v485_v15 = vpop.f32.mrb[1].mxu0  ;;  %v3322_v13 = vmov 1.0  }
 0x271   : > { %v486_v16 = vadd.f32 %v1929_v12, %v485_v15  ;;  %v2025_v17 = vpop.f32.mrb[2].mxu0  ;;  %v3326_v15 = vmov 1.0  }
 0x272   : > { %v497_v18 = vadd.f32 %v2025_v17, %v1929_v12  ;;  %v488_v19 = vpop.f32.mrb[3].mxu0  ;;  %v502_v21 = vmul.f32 0.35355338, %v494_v14  ;;  %v3330_v17 = vmov 0.0  }
 0x273   : > { %v489_v20 = vadd.f32 %v1929_v12, %v488_v19  ;;  %v500_v24 = vmul.f32 0.35355338, %v486_v16  ;;  %v3320_v12 = vmov 1.0   ;;  %v3334_v19 = vmov 0.0  }
 0x274   : > { %v503_v22 = vmul.f32 0.35355338, %v497_v18  ;;  %v3253_v23 = vpack.c.bf16 %v497_v18, %v494_v14  ;;  %v3324_v14 = vmov 1.0   ;;  %v3332_v18 = vmov 0.0  }
 0x275   : > { %v501_v25 = vmul.f32 0.35355338, %v489_v20  ;;  %v3255_v26 = vpack.c.bf16 %v489_v20, %v486_v16  ;;  %v3328_v16 = vmov 0.0  }
 0x276   : > { %v3257_v27 = vpack.c.bf16 %v503_v22, %v502_v21  ;;  %530 = vrot.lane.b32.xlu1 %v3253_v23, %s2973_s14 }
 0x277   : > { %528 = vrot.lane.b32.xlu0 %v3255_v26, %s2973_s14  ;;  %v3261_v28 = vpack.c.bf16 %v501_v25, %v500_v24 }
 0x279   : > { %2030 = vmatprep.mubr.msk.bf16.mxu1 %vm532_vm2, %v3261_v28 }
 0x2e8   : > { %v531_v31 = vpop.permute.xlu1 %530 }
 0x2e9   : > { %v529_v29 = vpop.permute.xlu0 %528  ;;  %v543_v32 = vsel %vm532_vm2, %v531_v31, 0 }
 0x2ea   : > { %2098 = vmatprep.subr.msk.bf16.mxu1 %vm532_vm2, %v529_v29  ;;  %v540_v30 = vsel %vm532_vm2, %v529_v29, 0 }
 0x2eb   : > { %2027 = vmatpush3.bf16.xpose.msra.mxu1 %v540_v30 }
 0x2ec   : > { %2099 = vmatprep.subr.msk.bf16.mxu1 %vm532_vm2, %v531_v31 }
 0x2f3   : > { %2029 = vmatpush3.bf16.xpose.msra.mxu1 %v543_v32 }
 0x2fa   : > { %2031 = vmatmul.mubr.msk.bf16.vlgmr.msra.gmra.mrb[0].mxu1 %vm532_vm2, %v3257_v27 }
 0x3cd   : > { %v2032_v39 = vpop.f32.mrb[0].mxu1 }
 0x3ce   : > { %v579_v40 = vpop.f32.mrb[1].mxu1  ;;  %v596_v48 = vsel %vm513_vm6, -1e+30, %v2032_v39 }
 0x3cf   : > { %v594_v41 = vsel %vm511_vm3, -1e+30, %v579_v40  ;;  %v2033_v42 = vpop.f32.mrb[2].mxu1  ;;  %v604_v50 = vsel %vm346_vm0, %v596_v48, -inf }
 0x3d0   : > { %v582_v43 = vpop.f32.mrb[3].mxu1  ;;  %v598_v44 = vsel %vm346_vm0, %v594_v41, -inf  ;;  %v597_v45 = vsel %vm514_vm4, -1e+30, %v2033_v42 }
 0x3d1   : > { %v595_v46 = vsel %vm512_vm5, -1e+30, %v582_v43  ;;  %599 = vmax.xlane.f32.xlu1 %v598_v44  ;;  %v607_v49 = vsel %vm346_vm0, %v597_v45, -inf }
 0x3d2   : > { %v601_v47 = vsel %vm346_vm0, %v595_v46, -inf }
 0x3d3   : > { %602 = vmax.xlane.f32.xlu0 %v601_v47 }
 0x3d5   : > { %608 = vmax.xlane.f32.xlu1 %v607_v49 }
 0x3d7   : > { %605 = vmax.xlane.f32.xlu0 %v604_v50 }
 0x45e   : > { %v600_v51 = vpop.xlane.xlu1 %599 }
 0x45f   : > { %v610_v52 = vsub.f32 %v594_v41, %v600_v51 }
 0x460   : > { %v603_v53 = vpop.xlane.xlu0 %602 }
 0x461   : > { %v614_v54 = vmul.f32 1.442695, %v610_v52  ;;  %v611_v55 = vsub.f32 %v595_v46, %v603_v53 }
 0x462   : > { %v609_v56 = vpop.xlane.xlu1 %608 }
 0x463   : > { %2485 = vpow2.f32 %v614_v54  ;;  %v616_v57 = vmul.f32 1.442695, %v611_v55  ;;  %v613_v58 = vsub.f32 %v597_v45, %v609_v56 }
 0x464   : > { %v606_v59 = vpop.xlane.xlu0 %605 }
 0x465   : > { %2487 = vpow2.f32 %v616_v57  ;;  %v620_v60 = vmul.f32 1.442695, %v613_v58  ;;  %v612_v61 = vsub.f32 %v596_v48, %v606_v59 }
 0x467   : > { %2489 = vpow2.f32 %v620_v60  ;;  %v618_v62 = vmul.f32 1.442695, %v612_v61 }
 0x469   : > { %2491 = vpow2.f32 %v618_v62 }
 0x46d   : > { %v3308_v63 = vpop.eup %2485 }
 0x46f   : > { %v3310_v6 = vpop.eup %2487 }
 0x471   : > { %v3312_v10 = vpop.eup %2489 }
 0x473   : > { %v3314_v11 = vpop.eup %2491 }
 0x474 LB: >> { %v636_v20 = vadd.f32 %v2837_v15, %v2853_v19  ;;  %v638_v21 = vadd.f32 %v2829_v13, %v2845_v17  ;;  %v637_v24 = vadd.f32 %v2833_v14, %v2849_v18  ;;  %v639_v30 = vadd.f32 %v2825_v12, %v2841_v16  ;;  %s627_s17 = sadd.s32 1, %s2857_s17   ;;  %s2857_s17 = sphi %s3336_s17, %s627_s17   ;;  %v2853_v19 = vphi %v3334_v19, %v3882_v19   ;;  %v2849_v18 = vphi %v3332_v18, %v3881_v18   ;;  %v2845_v17 = vphi %v3330_v17, %v3880_v17   ;;  %v2841_v16 = vphi %v3328_v16, %v3879_v16   ;;  %v2837_v15 = vphi %v3326_v15, %v676_v15   ;;  %v2833_v14 = vphi %v3324_v14, %v677_v14   ;;  %v2829_v13 = vphi %v3322_v13, %v678_v13   ;;  %v2825_v12 = vphi %v3320_v12, %v679_v12  }
 0x475   : >> { %v2974_v31 = vmov 0.0   ;;  %p624_p4 = scmp.ge.s32.totalorder %s627_s17, 30  }
 0x476   : >> { %v640_v22 = vmul.f32 0.5, %v636_v20  ;;  %v642_v25 = vmul.f32 0.5, %v638_v21  ;;  %v641_v29 = vmul.f32 0.5, %v637_v24  ;;  %v643_v40 = vmul.f32 0.5, %v639_v30  ;;  %s2976_s16 = smov (%p624_p4), 64   ;;  %s2977_s22 = smov (%p624_p4), 88  }
 0x477   : > { %v687_v54 = vsub.s32 (%p624_p4), 0, %v3271_v34  ;;  %v2975_v55 = vmov (%p624_p4), 0   ;;  %v696_v58 = vmul.f32 (%p624_p4), 1.2, %v3314_v11  ;;  %v694_v59 = vmul.f32 (%p624_p4), 1.2, %v3308_v63 }
 0x478   : >> { %vm644_vm7 = vcmp.ge.f32.partialorder %v3308_v63, %v640_v22  ;;  %vm646_vm8 = vcmp.ge.f32.partialorder %v3314_v11, %v642_v25  ;;  %vm645_vm9 = vcmp.ge.f32.partialorder %v3310_v6, %v641_v29  ;;  %vm647_vm10 = vcmp.ge.f32.partialorder %v3312_v10, %v643_v40  ;;  %s2978_s20 = smov (%p624_p4), 120   ;;  %s3464_s26 = smov (%p624_p4), 0  }
 0x479   : >> { %v1936_v32 = vsel %vm644_vm7, 1.0, %v2974_v31  ;;  %v1938_v39 = vsel %vm646_vm8, 1.0, %v2974_v31  ;;  %v1937_v42 = vsel %vm645_vm9, 1.0, %v2974_v31  ;;  %v1939_v44 = vsel %vm647_vm10, 1.0, %v2974_v31 }
 0x47a   : >> { %v656_v33 = vsel %vm346_vm0, %v1936_v32, 0.0  ;;  %v662_v41 = vsel %vm346_vm0, %v1938_v39, 0.0  ;;  %v659_v43 = vsel %vm346_vm0, %v1937_v42, 0.0  ;;  %v665_v45 = vsel %vm346_vm0, %v1939_v44, 0.0 }
 0x47b   : >> { %657 = vadd.xlane.f32.xlu0 %v656_v33  ;;  %663 = vadd.xlane.f32.xlu1 %v662_v41  ;;  %v684_v56 = vsel (%p624_p4), %vm516_vm1, 1, %v2975_v55  ;;  %v697_v60 = vmul.f32 (%p624_p4), 1.2, %v3312_v10  ;;  %v695_v0 = vmul.f32 (%p624_p4), 1.2, %v3310_v6 }
 0x47c   : > { %v3380_v57 = vrot.slane (%p624_p4), %v684_v56, %v687_v54 }
 0x47e   : > { %vm689_vm8 = vcmp.eq.s32.totalorder (%p624_p4), %v3380_v57, 1 }
 0x47f   : >> { %660 = vadd.xlane.f32.xlu0 %v659_v43  ;;  %666 = vadd.xlane.f32.xlu1 %v665_v45 }
 0x508   : >> { %v658_v46 = vpop.xlane.xlu0 %657  ;;  %v664_v47 = vpop.xlane.xlu1 %663 }
 0x509   : >> { %vm668_vm11 = vcmp.ge.f32.partialorder %v658_v46, 2.0  ;;  %vm670_vm12 = vcmp.ge.f32.partialorder %v664_v47, 2.0  ;;  %626 = sbr.rel (!%p624_p4) target bundleno = 1140 (0x474), region = 129 }
 0x50a   : >> { %v672_v48 = vsel %vm668_vm11, %v640_v22, %v2853_v19   ;;  %v676_v15 = vsel %vm668_vm11, %v2837_v15, %v640_v22   ;;  %v674_v49 = vsel %vm670_vm12, %v642_v25, %v2845_v17   ;;  %v678_v13 = vsel %vm670_vm12, %v2829_v13, %v642_v25  }
 0x50b   : >> { %v3880_v17 = vmov %v674_v49  ;;  %v3882_v19 = vmov %v672_v48  ;;  %vm682_vm15 = vcmp.ge.f32.partialorder (%p624_p4), %v3314_v11, %v674_v49  ;;  %vm680_vm7 = vcmp.ge.f32.partialorder (%p624_p4), %v3308_v63, %v672_v48 }
 0x50c   : >> { %v661_v50 = vpop.xlane.xlu0 %660  ;;  %v667_v51 = vpop.xlane.xlu1 %666  ;;  %vm692_vm10 = vmor (%p624_p4), %vm689_vm8, %vm682_vm15 }
 0x50d   : >> { %vm669_vm13 = vcmp.ge.f32.partialorder %v661_v50, 2.0  ;;  %vm671_vm14 = vcmp.ge.f32.partialorder %v667_v51, 2.0  ;;  %v700_v61 = vsel (%p624_p4), %vm692_vm10, %v696_v58, %v3314_v11  ;;  %vm690_vm11 = vmor (%p624_p4), %vm689_vm8, %vm680_vm7 }
 0x50e   : >> { %v673_v52 = vsel %vm669_vm13, %v641_v29, %v2849_v18   ;;  %v677_v14 = vsel %vm669_vm13, %v2833_v14, %v641_v29   ;;  %v675_v53 = vsel %vm671_vm14, %v643_v40, %v2841_v16   ;;  %v679_v12 = vsel %vm671_vm14, %v2825_v12, %v643_v40  }
 0x50f   : >> { %v3879_v16 = vmov %v675_v53  ;;  %v3881_v18 = vmov %v673_v52  ;;  %vm683_vm9 = vcmp.ge.f32.partialorder (%p624_p4), %v3312_v10, %v675_v53  ;;  %vm681_vm1 = vcmp.ge.f32.partialorder (%p624_p4), %v3310_v6, %v673_v52 }
 0x510   : > { %v708_v62 = vsel %vm346_vm0, %v700_v61, 0.0  ;;  %v698_v12 = vsel %vm690_vm11, %v694_v59, %v3308_v63  ;;  %vm693_vm12 = vmor %vm689_vm8, %vm683_vm9 }
 0x511   : > { %709 = vadd.xlane.f32.xlu1 %v708_v62  ;;  %v702_v13 = vsel %vm346_vm0, %v698_v12, 0.0  ;;  %v701_v14 = vsel %vm693_vm12, %v697_v60, %v3312_v10  ;;  %vm691_vm13 = vmor %vm689_vm8, %vm681_vm1 }
 0x512   : > { %703 = vadd.xlane.f32.xlu0 %v702_v13  ;;  %v711_v11 = vsel %vm346_vm0, %v701_v14, 0.0  ;;  %v699_v15 = vsel %vm691_vm13, %v695_v0, %v3310_v6 }
 0x513   : > { %v705_v16 = vsel %vm346_vm0, %v699_v15, 0.0 }
 0x515   : > { %712 = vadd.xlane.f32.xlu1 %v711_v11 }
 0x516   : > { %706 = vadd.xlane.f32.xlu0 %v705_v16 }
 0x526   : > { %726 = vrot.lane.b32.xlu1 %v3253_v23, %s2976_s16 }
 0x52a   : > { %795 = vrot.lane.b32.xlu1 %v3255_v26, %s2977_s22 }
 0x52c   : > { %724 = vrot.lane.b32.xlu0 %v3255_v26, %s2976_s16 }
 0x52e   : > { %797 = vrot.lane.b32.xlu1 %v3253_v23, %s2977_s22 }
 0x530   : > { %791 = vrot.lane.b32.xlu0 %v3261_v28, %s2978_s20 }
 0x532   : > { %793 = vrot.lane.b32.xlu1 %v3257_v27, %s2978_s20 }
 0x59e   : > { %v710_v63 = vpop.xlane.xlu1 %709 }
 0x59f   : > { %2493 = vrcp.f32 %v710_v63  ;;  %v704_v6 = vpop.xlane.xlu0 %703 }
 0x5a0   : > { %2495 = vrcp.f32 %v704_v6 }
 0x5a2   : > { %v713_v10 = vpop.xlane.xlu1 %712 }
 0x5a3   : > { %2497 = vrcp.f32 %v713_v10  ;;  %v707_v17 = vpop.xlane.xlu0 %706 }
 0x5a4   : > { %2499 = vrcp.f32 %v707_v17 }
 0x5a6   : > { %v727_v19 = vpop.permute.xlu1 %726 }
 0x5a7   : > { %v725_v18 = vpop.permute.xlu0 %724 }
 0x5a8   : > { %2034 = vmatprep.subr.bf16.mxu0 %v725_v18 }
 0x5a9   : > { %v2494_v20 = vpop.eup %2493  ;;  %2035 = vmatpush3.bf16.msra.mxu0 %v725_v18 }
 0x5aa   : > { %2036 = vmatprep.subr.bf16.mxu0 %v727_v19  ;;  %v796_v21 = vpop.permute.xlu1 %795  ;;  %v2496_v22 = vpop.eup %2495  ;;  %v720_v24 = vmul.f32 %v2494_v20, %v700_v61 }
 0x5ab   : > { %v718_v31 = vmul.f32 %v2496_v22, %v698_v12  ;;  %v792_v40 = vpop.permute.xlu0 %791  ;;  %v806_v41 = vsel %vm532_vm2, %v796_v21, 0  ;;  %v3448_v22 = vmov 1.0  }
 0x5ad   : > { %v2498_v25 = vpop.eup %2497  ;;  %2037 = vmatpush3.bf16.msra.mxu0 %v727_v19 }
 0x5ae   : > { %v2500_v29 = vpop.eup %2499  ;;  %v721_v30 = vmul.f32 %v2498_v25, %v701_v14  ;;  %2100 = vmatprep.subr.msk.bf16.mxu0 %vm532_vm2, %v796_v21  ;;  %v798_v42 = vpop.permute.xlu1 %797  ;;  %v3452_v25 = vmov 1.0  }
 0x5af   : > { %v719_v32 = vmul.f32 %v2500_v29, %v699_v15  ;;  %v809_v43 = vsel %vm532_vm2, %v798_v42, 0  ;;  %v3454_v29 = vmov 1.0  }
 0x5b0   : > { %v723_v33 = vpack.c.bf16 %v721_v30, %v720_v24  ;;  %v3450_v24 = vmov 1.0   ;;  %v3456_v30 = vmov 0.0  }
 0x5b1   : > { %v722_v39 = vpack.c.bf16 %v719_v32, %v718_v31  ;;  %v3458_v31 = vmov 0.0   ;;  %v3460_v32 = vmov 0.0  }
 0x5b2   : > { %v794_v44 = vpop.permute.xlu1 %793 }
 0x5b3   : > { %2038 = vmatprep.mubr.msk.bf16.mxu0 %vm346_vm0, %v722_v39 }
 0x5b4   : > { %2039 = vmatmul.mubr.msk.bf16.vlgmr.msra.gmra.mrb[4].mxu0 %vm346_vm0, %v723_v33  ;;  %v3462_v33 = vmov 0.0  }
 0x5b5   : > { %2046 = vmatprep.mubr.msk.bf16.mxu0 %vm532_vm2, %v792_v40 }
 0x5b6   : > { %2043 = vmatpush3.bf16.xpose.msra.mxu0 %v806_v41 }
 0x5b7   : > { %2101 = vmatprep.subr.msk.bf16.mxu0 %vm532_vm2, %v798_v42 }
 0x5be   : > { %2045 = vmatpush3.bf16.xpose.msra.mxu0 %v809_v43 }
 0x5c5   : > { %2047 = vmatmul.mubr.msk.bf16.vlgmr.msra.gmra.mrb[8].mxu0 %vm532_vm2, %v794_v44 }
 0x687   : > { %v2040_v45 = vpop.f32.mrb[4].mxu0 }
 0x688   : > { %787 = vst.msk [vmem:[#allocation2 + $0x10] sm:$0xff] %vm532_vm2, %v2040_v45  ;;  %v770_v46 = vpop.f32.mrb[5].mxu0 }
 0x689   : > { %785 = vst.msk [vmem:[#allocation2] sm:$0xff] %vm532_vm2, %v770_v46  ;;  %v2041_v47 = vpop.f32.mrb[6].mxu0 }
 0x68a   : > { %788 = vst.msk [vmem:[#allocation2 + $0x18] sm:$0xff] %vm532_vm2, %v2041_v47  ;;  %v773_v48 = vpop.f32.mrb[7].mxu0 }
 0x68b   : > { %786 = vst.msk [vmem:[#allocation2 + $0x8] sm:$0xff] %vm532_vm2, %v773_v48 }
 0x698   : > { %v2048_v49 = vpop.f32.mrb[8].mxu0 }
 0x699   : > { %v845_v50 = vpop.f32.mrb[9].mxu0  ;;  %v862_v55 = vsel %vm513_vm6, -1e+30, %v2048_v49 }
 0x69a   : > { %v860_v51 = vsel %vm511_vm3, -1e+30, %v845_v50  ;;  %v2049_v52 = vpop.f32.mrb[10].mxu0  ;;  %v870_v59 = vsel %vm346_vm0, %v862_v55, -inf }
 0x69b   : > { %v848_v53 = vpop.f32.mrb[11].mxu0  ;;  %v864_v54 = vsel %vm346_vm0, %v860_v51, -inf  ;;  %v863_v60 = vsel %vm514_vm4, -1e+30, %v2049_v52 }
 0x69c   : > { %v861_v56 = vsel %vm512_vm5, -1e+30, %v848_v53  ;;  %865 = vmax.xlane.f32.xlu0 %v864_v54  ;;  %v873_v0 = vsel %vm346_vm0, %v863_v60, -inf }
 0x69d   : > { %v867_v58 = vsel %vm346_vm0, %v861_v56, -inf }
 0x69e   : > { %868 = vmax.xlane.f32.xlu1 %v867_v58 }
 0x6a0   : > { %871 = vmax.xlane.f32.xlu0 %v870_v59 }
 0x6a4   : > { %874 = vmax.xlane.f32.xlu0 %v873_v0 }
 0x729   : > { %v866_v61 = vpop.xlane.xlu0 %865 }
 0x72a   : > { %v876_v62 = vsub.f32 %v860_v51, %v866_v61 }
 0x72b   : > { %v869_v12 = vpop.xlane.xlu1 %868 }
 0x72c   : > { %v880_v13 = vmul.f32 1.442695, %v876_v62  ;;  %v877_v14 = vsub.f32 %v861_v56, %v869_v12 }
 0x72d   : > { %v872_v11 = vpop.xlane.xlu0 %871 }
 0x72e   : > { %2501 = vpow2.f32 %v880_v13  ;;  %v882_v15 = vmul.f32 1.442695, %v877_v14  ;;  %v878_v16 = vsub.f32 %v862_v55, %v872_v11 }
 0x730   : > { %2503 = vpow2.f32 %v882_v15  ;;  %v884_v63 = vmul.f32 1.442695, %v878_v16 }
 0x731   : > { %v875_v6 = vpop.xlane.xlu0 %874 }
 0x732   : > { %2505 = vpow2.f32 %v884_v63  ;;  %v879_v10 = vsub.f32 %v863_v60, %v875_v6 }
 0x734   : > { %v886_v17 = vmul.f32 1.442695, %v879_v10 }
 0x736   : > { %2507 = vpow2.f32 %v886_v17 }
 0x738   : > { %v3440_v18 = vpop.eup %2501 }
 0x73a   : > { %v3442_v19 = vpop.eup %2503 }
 0x73c   : > { %v3444_v20 = vpop.eup %2505 }
 0x740   : > { %v3446_v21 = vpop.eup %2507 }
 0x741 LB: >> { %v902_v39 = vadd.f32 %v2873_v29, %v2889_v33  ;;  %v904_v40 = vadd.f32 %v2865_v24, %v2881_v31  ;;  %v903_v42 = vadd.f32 %v2869_v25, %v2885_v32  ;;  %v905_v45 = vadd.f32 %v2861_v22, %v2877_v30  ;;  %s893_s26 = sadd.s32 1, %s2893_s26   ;;  %s2893_s26 = sphi %s3464_s26, %s893_s26   ;;  %v2889_v33 = vphi %v3462_v33, %v3886_v33   ;;  %v2885_v32 = vphi %v3460_v32, %v3885_v32   ;;  %v2881_v31 = vphi %v3458_v31, %v3884_v31   ;;  %v2877_v30 = vphi %v3456_v30, %v3883_v30   ;;  %v2873_v29 = vphi %v3454_v29, %v942_v29   ;;  %v2869_v25 = vphi %v3452_v25, %v943_v25   ;;  %v2865_v24 = vphi %v3450_v24, %v944_v24   ;;  %v2861_v22 = vphi %v3448_v22, %v945_v22  }
 0x742   : >> { %v2979_v46 = vmov 0.0   ;;  %p890_p6 = scmp.ge.s32.totalorder %s893_s26, 30  }
 0x743   : >> { %v906_v41 = vmul.f32 0.5, %v902_v39  ;;  %v908_v43 = vmul.f32 0.5, %v904_v40  ;;  %v907_v44 = vmul.f32 0.5, %v903_v42  ;;  %v909_v50 = vmul.f32 0.5, %v905_v45  ;;  %s2980_s25 = smov (%p890_p6), 56   ;;  %s2981_s15 = smov (%p890_p6), 80  }
 0x744   : > { %v956_v13 = vmul.f32 (%p890_p6), 1.2, %v3444_v20  ;;  %v954_v14 = vmul.f32 (%p890_p6), 1.2, %v3440_v18  ;;  %v957_v11 = vmul.f32 (%p890_p6), 1.2, %v3446_v21 }
 0x745   : >> { %vm910_vm14 = vcmp.ge.f32.partialorder %v3440_v18, %v906_v41  ;;  %vm912_vm15 = vcmp.ge.f32.partialorder %v3444_v20, %v908_v43  ;;  %vm911_vm7 = vcmp.ge.f32.partialorder %v3442_v19, %v907_v44  ;;  %vm913_vm9 = vcmp.ge.f32.partialorder %v3446_v21, %v909_v50  ;;  %s2982_s13 = smov (%p890_p6), 112   ;;  %s2983_s21 = smov (%p890_p6), 8  }
 0x746   : >> { %v1944_v47 = vsel %vm910_vm14, 1.0, %v2979_v46  ;;  %v1946_v49 = vsel %vm912_vm15, 1.0, %v2979_v46  ;;  %v1945_v52 = vsel %vm911_vm7, 1.0, %v2979_v46  ;;  %v1947_v54 = vsel %vm913_vm9, 1.0, %v2979_v46  ;;  %s3590_s18 = smov (%p890_p6), 0  }
 0x747   : >> { %v922_v48 = vsel %vm346_vm0, %v1944_v47, 0.0  ;;  %v928_v51 = vsel %vm346_vm0, %v1946_v49, 0.0  ;;  %v925_v53 = vsel %vm346_vm0, %v1945_v52, 0.0  ;;  %v931_v55 = vsel %vm346_vm0, %v1947_v54, 0.0 }
 0x748   : >> { %923 = vadd.xlane.f32.xlu0 %v922_v48  ;;  %929 = vadd.xlane.f32.xlu1 %v928_v51  ;;  %v955_v15 = vmul.f32 (%p890_p6), 1.2, %v3442_v19 }
 0x74c   : >> { %926 = vadd.xlane.f32.xlu0 %v925_v53  ;;  %932 = vadd.xlane.f32.xlu1 %v931_v55 }
 0x7d5   : >> { %v924_v56 = vpop.xlane.xlu0 %923  ;;  %v930_v58 = vpop.xlane.xlu1 %929 }
 0x7d6   : >> { %vm934_vm10 = vcmp.ge.f32.partialorder %v924_v56, 2.0  ;;  %vm936_vm1 = vcmp.ge.f32.partialorder %v930_v58, 2.0  ;;  %892 = sbr.rel (!%p890_p6) target bundleno = 1857 (0x741), region = 140 }
 0x7d7   : >> { %v938_v59 = vsel %vm934_vm10, %v906_v41, %v2889_v33   ;;  %v942_v29 = vsel %vm934_vm10, %v2873_v29, %v906_v41   ;;  %v940_v60 = vsel %vm936_vm1, %v908_v43, %v2881_v31   ;;  %v944_v24 = vsel %vm936_vm1, %v2865_v24, %v908_v43  }
 0x7d8   : >> { %v3884_v31 = vmov %v940_v60  ;;  %v3886_v33 = vmov %v938_v59  ;;  %vm948_vm13 = vcmp.ge.f32.partialorder (%p890_p6), %v3444_v20, %v940_v60  ;;  %vm946_vm14 = vcmp.ge.f32.partialorder (%p890_p6), %v3440_v18, %v938_v59 }
 0x7d9   : >> { %v927_v0 = vpop.xlane.xlu0 %926  ;;  %v933_v61 = vpop.xlane.xlu1 %932  ;;  %vm952_vm15 = vmor (%p890_p6), %vm689_vm8, %vm948_vm13 }
 0x7da   : >> { %vm935_vm11 = vcmp.ge.f32.partialorder %v927_v0, 2.0  ;;  %vm937_vm12 = vcmp.ge.f32.partialorder %v933_v61, 2.0  ;;  %v960_v16 = vsel (%p890_p6), %vm952_vm15, %v956_v13, %v3444_v20  ;;  %vm950_vm10 = vmor (%p890_p6), %vm689_vm8, %vm946_vm14 }
 0x7db   : >> { %v939_v62 = vsel %vm935_vm11, %v907_v44, %v2885_v32   ;;  %v943_v25 = vsel %vm935_vm11, %v2869_v25, %v907_v44   ;;  %v941_v12 = vsel %vm937_vm12, %v909_v50, %v2877_v30   ;;  %v945_v22 = vsel %vm937_vm12, %v2861_v22, %v909_v50  }
 0x7dc   : >> { %v3883_v30 = vmov %v941_v12  ;;  %v3885_v32 = vmov %v939_v62  ;;  %vm949_vm7 = vcmp.ge.f32.partialorder (%p890_p6), %v3446_v21, %v941_v12  ;;  %vm947_vm9 = vcmp.ge.f32.partialorder (%p890_p6), %v3442_v19, %v939_v62 }
 0x7dd   : > { %v968_v63 = vsel %vm346_vm0, %v960_v16, 0.0  ;;  %v958_v6 = vsel %vm950_vm10, %v954_v14, %v3440_v18  ;;  %vm953_vm1 = vmor %vm689_vm8, %vm949_vm7  ;;  %vm1061_vm12 = vcmask 130112  }
 0x7de   : > { %969 = vadd.xlane.f32.xlu1 %v968_v63  ;;  %v962_v10 = vsel %vm346_vm0, %v958_v6, 0.0  ;;  %v961_v17 = vsel %vm953_vm1, %v957_v11, %v3446_v21  ;;  %vm951_vm11 = vmor %vm689_vm8, %vm947_vm9 }
 0x7df   : > { %963 = vadd.xlane.f32.xlu0 %v962_v10  ;;  %v971_v20 = vsel %vm346_vm0, %v961_v17, 0.0  ;;  %v959_v22 = vsel %vm951_vm11, %v955_v15, %v3442_v19 }
 0x7e0   : > { %v965_v24 = vsel %vm346_vm0, %v959_v22, 0.0 }
 0x7e2   : > { %972 = vadd.xlane.f32.xlu1 %v971_v20 }
 0x7e3   : > { %966 = vadd.xlane.f32.xlu0 %v965_v24 }
 0x7f3   : > { %986 = vrot.lane.b32.xlu1 %v3253_v23, %s2980_s25 }
 0x7f7   : > { %1070 = vrot.lane.b32.xlu1 %v3255_v26, %s2981_s15 }
 0x7f9   : > { %984 = vrot.lane.b32.xlu0 %v3255_v26, %s2980_s25 }
 0x7fb   : > { %1072 = vrot.lane.b32.xlu1 %v3253_v23, %s2981_s15 }
 0x7fd   : > { %1066 = vrot.lane.b32.xlu0 %v3261_v28, %s2982_s13 }
 0x7ff   : > { %1068 = vrot.lane.b32.xlu1 %v3257_v27, %s2982_s13 }
 0x86b   : > { %v970_v18 = vpop.xlane.xlu1 %969 }
 0x86c   : > { %v964_v19 = vpop.xlane.xlu0 %963  ;;  %2509 = vrcp.f32 %v970_v18 }
 0x86d   : > { %2511 = vrcp.f32 %v964_v19 }
 0x86f   : > { %v973_v21 = vpop.xlane.xlu1 %972 }
 0x870   : > { %2513 = vrcp.f32 %v973_v21  ;;  %v967_v25 = vpop.xlane.xlu0 %966 }
 0x871   : > { %2515 = vrcp.f32 %v967_v25 }
 0x873   : > { %v987_v30 = vpop.permute.xlu1 %986 }
 0x874   : > { %v985_v29 = vpop.permute.xlu0 %984 }
 0x875   : > { %2050 = vmatprep.subr.bf16.mxu1 %v985_v29 }
 0x876   : > { %2051 = vmatpush3.bf16.msra.mxu1 %v985_v29  ;;  %v2510_v31 = vpop.eup %2509 }
 0x877   : > { %2052 = vmatprep.subr.bf16.mxu1 %v987_v30  ;;  %v1071_v32 = vpop.permute.xlu1 %1070  ;;  %v2512_v33 = vpop.eup %2511  ;;  %v980_v41 = vmul.f32 %v2510_v31, %v960_v16 }
 0x878   : > { %v978_v43 = vmul.f32 %v2512_v33, %v958_v6  ;;  %v1067_v47 = vpop.permute.xlu0 %1066  ;;  %v1081_v48 = vsel %vm532_vm2, %v1071_v32, 0 }
 0x87a   : > { %v2514_v39 = vpop.eup %2513  ;;  %2053 = vmatpush3.bf16.msra.mxu1 %v987_v30 }
 0x87b   : > { %v2516_v40 = vpop.eup %2515  ;;  %v981_v42 = vmul.f32 %v2514_v39, %v961_v17  ;;  %2102 = vmatprep.subr.msk.bf16.mxu1 %vm532_vm2, %v1071_v32  ;;  %v1073_v49 = vpop.permute.xlu1 %1072 }
 0x87c   : > { %v979_v44 = vmul.f32 %v2516_v40, %v959_v22  ;;  %v1084_v50 = vsel %vm532_vm2, %v1073_v49, 0 }
 0x87d   : > { %v983_v45 = vpack.c.bf16 %v981_v42, %v980_v41  ;;  %v3574_v42 = vmov 1.0  }
 0x87e   : > { %v982_v46 = vpack.c.bf16 %v979_v44, %v978_v43  ;;  %v3576_v43 = vmov 1.0   ;;  %v3578_v44 = vmov 1.0  }
 0x87f   : > { %v1069_v51 = vpop.permute.xlu1 %1068 }
 0x880   : > { %2054 = vmatprep.mubr.msk.bf16.mxu1 %vm346_vm0, %v982_v46  ;;  %v3582_v46 = vmov 0.0  }
 0x881   : > { %2055 = vmatmul.mubr.msk.bf16.vlgmr.msra.gmra.mrb[4].mxu1 %vm346_vm0, %v983_v45  ;;  %v3580_v45 = vmov 1.0  }
 0x882   : > { %2062 = vmatprep.mubr.msk.bf16.mxu1 %vm532_vm2, %v1067_v47  ;;  %v3584_v47 = vmov 0.0  }
 0x883   : > { %2059 = vmatpush3.bf16.xpose.msra.mxu1 %v1081_v48  ;;  %v3586_v48 = vmov 0.0  }
 0x884   : > { %2103 = vmatprep.subr.msk.bf16.mxu1 %vm532_vm2, %v1073_v49  ;;  %v3588_v49 = vmov 0.0  }
 0x88b   : > { %2061 = vmatpush3.bf16.xpose.msra.mxu1 %v1084_v50 }
 0x892   : > { %2063 = vmatmul.mubr.msk.bf16.vlgmr.msra.gmra.mrb[8].mxu1 %vm532_vm2, %v1069_v51 }
 0x954   : > { %v2056_v52 = vpop.f32.mrb[4].mxu1 }
 0x955   : > { %v1030_v53 = vpop.f32.mrb[5].mxu1 }
 0x956   : > { %v2057_v54 = vpop.f32.mrb[6].mxu1 }
 0x957   : > { %v1033_v55 = vpop.f32.mrb[7].mxu1 }
 0x958   : > { %1051 = vrot.lane.b32.xlu1 %v1033_v55, %s2983_s21 }
 0x95c   : > { %1053 = vrot.lane.b32.xlu1 %v2056_v52, %s2983_s21 }
 0x965   : > { %v2064_v56 = vpop.f32.mrb[8].mxu1 }
 0x966   : > { %v1137_v58 = vsel %vm513_vm6, -1e+30, %v2064_v56  ;;  %v1120_v59 = vpop.f32.mrb[9].mxu1 }
 0x967   : > { %v1145_v60 = vsel %vm346_vm0, %v1137_v58, -inf  ;;  %v1135_v0 = vsel %vm511_vm3, -1e+30, %v1120_v59  ;;  %v2065_v61 = vpop.f32.mrb[10].mxu1 }
 0x968   : > { %1146 = vmax.xlane.f32.xlu0 %v1145_v60  ;;  %v1123_v62 = vpop.f32.mrb[11].mxu1  ;;  %v1139_v12 = vsel %vm346_vm0, %v1135_v0, -inf  ;;  %v1138_v13 = vsel %vm514_vm4, -1e+30, %v2065_v61 }
 0x969   : > { %v1148_v14 = vsel %vm346_vm0, %v1138_v13, -inf  ;;  %v1136_v11 = vsel %vm512_vm5, -1e+30, %v1123_v62 }
 0x96a   : > { %v1142_v15 = vsel %vm346_vm0, %v1136_v11, -inf }
 0x96c   : > { %1140 = vmax.xlane.f32.xlu0 %v1139_v12 }
 0x970   : > { %1149 = vmax.xlane.f32.xlu0 %v1148_v14 }
 0x980   : > { %1143 = vmax.xlane.f32.xlu1 %v1142_v15 }
 0x986   : > { %1049 = vrot.lane.b32.xlu0 %v1030_v53, %s2983_s21 }
 0x991   : > { %1055 = vrot.lane.b32.xlu1 %v2057_v54, %s2983_s21 }
 0x9ca   : > { %v1052_v16 = vpop.permute.xlu1 %1051 }
 0x9cb   : > { %1063 = vst.msk [vmem:[#allocation2 + $0x8] sm:$0xff] %vm1061_vm12, %v1052_v16 }
 0x9ce   : > { %v1054_v63 = vpop.permute.xlu1 %1053 }
 0x9cf   : > { %1064 = vst.msk [vmem:[#allocation2 + $0x10] sm:$0xff] %vm1061_vm12, %v1054_v63 }
 0x9f5   : > { %v1147_v6 = vpop.xlane.xlu0 %1146 }
 0x9f6   : > { %v1153_v10 = vsub.f32 %v1137_v58, %v1147_v6 }
 0x9f8   : > { %v1159_v17 = vmul.f32 1.442695, %v1153_v10 }
 0x9f9   : > { %v1141_v20 = vpop.xlane.xlu0 %1140 }
 0x9fa   : > { %2517 = vpow2.f32 %v1159_v17  ;;  %v1151_v22 = vsub.f32 %v1135_v0, %v1141_v20 }
 0x9fc   : > { %v1155_v24 = vmul.f32 1.442695, %v1151_v22 }
 0x9fd   : > { %v1150_v18 = vpop.xlane.xlu0 %1149 }
 0x9fe   : > { %2519 = vpow2.f32 %v1155_v24  ;;  %v1154_v19 = vsub.f32 %v1138_v13, %v1150_v18 }
 0xa00   : > { %v1161_v21 = vmul.f32 1.442695, %v1154_v19 }
 0xa01   : > { %v1050_v25 = vpop.permute.xlu0 %1049 }
 0xa02   : > { %2521 = vpow2.f32 %v1161_v21  ;;  %1062 = vst.msk [vmem:[#allocation2] sm:$0xff] %vm1061_vm12, %v1050_v25 }
 0xa04   : > { %v3565_v29 = vpop.eup %2517 }
 0xa08   : > { %v3567_v30 = vpop.eup %2519 }
 0xa0c   : > { %v3569_v31 = vpop.eup %2521 }
 0xa0d   : > { %v1144_v32 = vpop.xlane.xlu1 %1143 }
 0xa0e   : > { %v1152_v33 = vsub.f32 %v1136_v11, %v1144_v32 }
 0xa10   : > { %v1157_v39 = vmul.f32 1.442695, %v1152_v33 }
 0xa11   : > { %v1056_v40 = vpop.permute.xlu1 %1055 }
 0xa12   : > { %2523 = vpow2.f32 %v1157_v39  ;;  %1065 = vst.msk [vmem:[#allocation2 + $0x18] sm:$0xff] %vm1061_vm12, %v1056_v40 }
 0xa1c   : > { %v3572_v41 = vpop.eup %2523 }
 0xa1d LB: >> { %v1177_v50 = vadd.f32 %v2909_v45, %v2925_v49  ;;  %v1179_v51 = vadd.f32 %v2901_v43, %v2917_v47  ;;  %v1178_v53 = vadd.f32 %v2905_v44, %v2921_v48  ;;  %v1180_v56 = vadd.f32 %v2897_v42, %v2913_v46  ;;  %s1168_s18 = sadd.s32 1, %s2929_s18   ;;  %s2929_s18 = sphi %s3590_s18, %s1168_s18   ;;  %v2925_v49 = vphi %v3588_v49, %v3890_v49   ;;  %v2921_v48 = vphi %v3586_v48, %v3889_v48   ;;  %v2917_v47 = vphi %v3584_v47, %v3888_v47   ;;  %v2913_v46 = vphi %v3582_v46, %v3887_v46   ;;  %v2909_v45 = vphi %v3580_v45, %v1217_v45   ;;  %v2905_v44 = vphi %v3578_v44, %v1218_v44   ;;  %v2901_v43 = vphi %v3576_v43, %v1219_v43   ;;  %v2897_v42 = vphi %v3574_v42, %v1220_v42  }
 0xa1e   : >> { %v2984_v58 = vmov 0.0   ;;  %p1165_p8 = scmp.ge.s32.totalorder %s1168_s18, 30  }
 0xa1f   : >> { %v1181_v52 = vmul.f32 0.5, %v1177_v50  ;;  %v1183_v54 = vmul.f32 0.5, %v1179_v51  ;;  %v1182_v55 = vmul.f32 0.5, %v1178_v53  ;;  %v1184_v61 = vmul.f32 0.5, %v1180_v56  ;;  %s2985_s19 = smov (%p1165_p8), 48   ;;  %s2986_s14 = smov (%p1165_p8), 72  }
 0xa20   : > { %v1231_v24 = vmul.f32 (%p1165_p8), 1.2, %v3565_v29  ;;  %v1229_v18 = vmul.f32 (%p1165_p8), 1.2, %v3567_v30  ;;  %v1232_v19 = vmul.f32 (%p1165_p8), 1.2, %v3569_v31 }
 0xa21   : >> { %vm1185_vm13 = vcmp.ge.f32.partialorder %v3567_v30, %v1181_v52  ;;  %vm1187_vm14 = vcmp.ge.f32.partialorder %v3565_v29, %v1183_v54  ;;  %vm1186_vm15 = vcmp.ge.f32.partialorder %v3572_v41, %v1182_v55  ;;  %vm1188_vm7 = vcmp.ge.f32.partialorder %v3569_v31, %v1184_v61  ;;  %s2987_s17 = smov (%p1165_p8), 104   ;;  %s2988_s16 = smov (%p1165_p8), 16  }
 0xa22   : >> { %v1952_v59 = vsel %vm1185_vm13, 1.0, %v2984_v58  ;;  %v1954_v0 = vsel %vm1187_vm14, 1.0, %v2984_v58  ;;  %v1953_v12 = vsel %vm1186_vm15, 1.0, %v2984_v58  ;;  %v1955_v14 = vsel %vm1188_vm7, 1.0, %v2984_v58  ;;  %s3712_s22 = smov (%p1165_p8), 0  }
 0xa23   : >> { %v1197_v60 = vsel %vm346_vm0, %v1952_v59, 0.0  ;;  %v1203_v62 = vsel %vm346_vm0, %v1954_v0, 0.0  ;;  %v1200_v13 = vsel %vm346_vm0, %v1953_v12, 0.0  ;;  %v1206_v11 = vsel %vm346_vm0, %v1955_v14, 0.0 }
 0xa24   : >> { %1198 = vadd.xlane.f32.xlu0 %v1197_v60  ;;  %1204 = vadd.xlane.f32.xlu1 %v1203_v62  ;;  %v1230_v21 = vmul.f32 (%p1165_p8), 1.2, %v3572_v41 }
 0xa28   : >> { %1201 = vadd.xlane.f32.xlu0 %v1200_v13  ;;  %1207 = vadd.xlane.f32.xlu1 %v1206_v11 }
 0xab1   : >> { %v1199_v15 = vpop.xlane.xlu0 %1198  ;;  %v1205_v16 = vpop.xlane.xlu1 %1204 }
 0xab2   : >> { %vm1209_vm9 = vcmp.ge.f32.partialorder %v1199_v15, 2.0  ;;  %vm1211_vm10 = vcmp.ge.f32.partialorder %v1205_v16, 2.0  ;;  %1167 = sbr.rel (!%p1165_p8) target bundleno = 2589 (0xa1d), region = 151 }
 0xab3   : >> { %v1213_v63 = vsel %vm1209_vm9, %v1181_v52, %v2925_v49   ;;  %v1217_v45 = vsel %vm1209_vm9, %v2909_v45, %v1181_v52   ;;  %v1215_v6 = vsel %vm1211_vm10, %v1183_v54, %v2917_v47   ;;  %v1219_v43 = vsel %vm1211_vm10, %v2901_v43, %v1183_v54  }
 0xab4   : >> { %v3888_v47 = vmov %v1215_v6  ;;  %v3890_v49 = vmov %v1213_v63  ;;  %vm1223_vm12 = vcmp.ge.f32.partialorder (%p1165_p8), %v3565_v29, %v1215_v6  ;;  %vm1221_vm13 = vcmp.ge.f32.partialorder (%p1165_p8), %v3567_v30, %v1213_v63 }
 0xab5   : >> { %v1202_v10 = vpop.xlane.xlu0 %1201  ;;  %v1208_v17 = vpop.xlane.xlu1 %1207  ;;  %vm1227_vm14 = vmor (%p1165_p8), %vm689_vm8, %vm1223_vm12 }
 0xab6   : >> { %vm1210_vm1 = vcmp.ge.f32.partialorder %v1202_v10, 2.0  ;;  %vm1212_vm11 = vcmp.ge.f32.partialorder %v1208_v17, 2.0  ;;  %v1235_v25 = vsel (%p1165_p8), %vm1227_vm14, %v1231_v24, %v3565_v29  ;;  %vm1225_vm9 = vmor (%p1165_p8), %vm689_vm8, %vm1221_vm13 }
 0xab7   : >> { %v1214_v20 = vsel %vm1210_vm1, %v1182_v55, %v2921_v48   ;;  %v1218_v44 = vsel %vm1210_vm1, %v2905_v44, %v1182_v55   ;;  %v1216_v22 = vsel %vm1212_vm11, %v1184_v61, %v2913_v46   ;;  %v1220_v42 = vsel %vm1212_vm11, %v2897_v42, %v1184_v61  }
 0xab8   : >> { %v3887_v46 = vmov %v1216_v22  ;;  %v3889_v48 = vmov %v1214_v20  ;;  %vm1224_vm15 = vcmp.ge.f32.partialorder (%p1165_p8), %v3569_v31, %v1216_v22  ;;  %vm1222_vm7 = vcmp.ge.f32.partialorder (%p1165_p8), %v3572_v41, %v1214_v20 }
 0xab9   : > { %v1243_v32 = vsel %vm346_vm0, %v1235_v25, 0.0  ;;  %v1233_v33 = vsel %vm1225_vm9, %v1229_v18, %v3567_v30  ;;  %vm1228_vm10 = vmor %vm689_vm8, %vm1224_vm15 }
 0xaba   : > { %1244 = vadd.xlane.f32.xlu1 %v1243_v32  ;;  %v1237_v39 = vsel %vm346_vm0, %v1233_v33, 0.0  ;;  %v1236_v40 = vsel %vm1228_vm10, %v1232_v19, %v3569_v31  ;;  %vm1226_vm1 = vmor %vm689_vm8, %vm1222_vm7 }
 0xabb   : > { %1238 = vadd.xlane.f32.xlu0 %v1237_v39  ;;  %v1246_v29 = vsel %vm346_vm0, %v1236_v40, 0.0  ;;  %v1234_v42 = vsel %vm1226_vm1, %v1230_v21, %v3572_v41 }
 0xabc   : > { %v1240_v43 = vsel %vm346_vm0, %v1234_v42, 0.0 }
 0xabe   : > { %1247 = vadd.xlane.f32.xlu1 %v1246_v29 }
 0xabf   : > { %1241 = vadd.xlane.f32.xlu0 %v1240_v43 }
 0xacf   : > { %1261 = vrot.lane.b32.xlu1 %v3253_v23, %s2985_s19 }
 0xad3   : > { %1345 = vrot.lane.b32.xlu1 %v3255_v26, %s2986_s14 }
 0xad5   : > { %1259 = vrot.lane.b32.xlu0 %v3255_v26, %s2985_s19 }
 0xad7   : > { %1347 = vrot.lane.b32.xlu1 %v3253_v23, %s2986_s14 }
 0xad9   : > { %1341 = vrot.lane.b32.xlu0 %v3261_v28, %s2987_s17 }
 0xadb   : > { %1343 = vrot.lane.b32.xlu1 %v3257_v27, %s2987_s17 }
 0xb47   : > { %v1245_v30 = vpop.xlane.xlu1 %1244 }
 0xb48   : > { %v1239_v31 = vpop.xlane.xlu0 %1238  ;;  %2525 = vrcp.f32 %v1245_v30 }
 0xb49   : > { %2527 = vrcp.f32 %v1239_v31 }
 0xb4b   : > { %v1248_v41 = vpop.xlane.xlu1 %1247 }
 0xb4c   : > { %2529 = vrcp.f32 %v1248_v41  ;;  %v1242_v44 = vpop.xlane.xlu0 %1241 }
 0xb4d   : > { %2531 = vrcp.f32 %v1242_v44 }
 0xb4f   : > { %v1262_v46 = vpop.permute.xlu1 %1261 }
 0xb50   : > { %v1260_v45 = vpop.permute.xlu0 %1259 }
 0xb51   : > { %2066 = vmatprep.subr.bf16.mxu0 %v1260_v45 }
 0xb52   : > { %2067 = vmatpush3.bf16.msra.mxu0 %v1260_v45  ;;  %v2526_v47 = vpop.eup %2525 }
 0xb53   : > { %2068 = vmatprep.subr.bf16.mxu0 %v1262_v46  ;;  %v1346_v48 = vpop.permute.xlu1 %1345  ;;  %v2528_v49 = vpop.eup %2527  ;;  %v1255_v27 = vmul.f32 %v2526_v47, %v1235_v25  ;;  %v3698_v47 = vmov 1.0  }
 0xb54   : > { %v1253_v52 = vmul.f32 %v2528_v49, %v1233_v33  ;;  %v1342_v56 = vpop.permute.xlu0 %1341  ;;  %v1356_v58 = vsel %vm532_vm2, %v1346_v48, 0  ;;  %v3702_v49 = vmov 1.0  }
 0xb56   : > { %v2530_v50 = vpop.eup %2529  ;;  %2069 = vmatpush3.bf16.msra.mxu0 %v1262_v46  ;;  %v3696_v46 = vmov 1.0  }
 0xb57   : > { %v2532_v28 = vpop.eup %2531  ;;  %v1256_v51 = vmul.f32 %v2530_v50, %v1236_v40  ;;  %2104 = vmatprep.subr.msk.bf16.mxu0 %vm532_vm2, %v1346_v48  ;;  %v1348_v59 = vpop.permute.xlu1 %1347  ;;  %v3700_v48 = vmov 1.0   ;;  %v3704_v50 = vmov 0.0  }
 0xb58   : > { %v1254_v53 = vmul.f32 %v2532_v28, %v1234_v42  ;;  %v1359_v60 = vsel %vm532_vm2, %v1348_v59, 0  ;;  %v3706_v28 = vmov 0.0  }
 0xb59   : > { %v1258_v54 = vpack.c.bf16 %v1256_v51, %v1255_v27  ;;  %v3708_v27 = vmov 0.0   ;;  %v3710_v51 = vmov 0.0  }
 0xb5a   : > { %v1257_v55 = vpack.c.bf16 %v1254_v53, %v1253_v52 }
 0xb5b   : > { %v1344_v0 = vpop.permute.xlu1 %1343 }
 0xb5c   : > { %2070 = vmatprep.mubr.msk.bf16.mxu0 %vm346_vm0, %v1257_v55 }
 0xb5d   : > { %2071 = vmatmul.mubr.msk.bf16.vlgmr.msra.gmra.mrb[12].mxu0 %vm346_vm0, %v1258_v54 }
 0xb5e   : > { %2078 = vmatprep.mubr.msk.bf16.mxu0 %vm532_vm2, %v1342_v56 }
 0xb5f   : > { %2075 = vmatpush3.bf16.xpose.msra.mxu0 %v1356_v58 }
 0xb60   : > { %2105 = vmatprep.subr.msk.bf16.mxu0 %vm532_vm2, %v1348_v59 }
 0xb67   : > { %2077 = vmatpush3.bf16.xpose.msra.mxu0 %v1359_v60 }
 0xb6e   : > { %2079 = vmatmul.mubr.msk.bf16.vlgmr.msra.gmra.mrb[16].mxu0 %vm532_vm2, %v1344_v0  ;;  %vm1336_vm2 = vcmask 195712  }
 0xc30   : > { %v2072_v61 = vpop.f32.mrb[12].mxu0 }
 0xc31   : > { %v1305_v62 = vpop.f32.mrb[13].mxu0 }
 0xc32   : > { %v2073_v12 = vpop.f32.mrb[14].mxu0 }
 0xc33   : > { %v1308_v13 = vpop.f32.mrb[15].mxu0 }
 0xc34   : > { %1326 = vrot.lane.b32.xlu1 %v1308_v13, %s2988_s16 }
 0xc38   : > { %1328 = vrot.lane.b32.xlu1 %v2072_v61, %s2988_s16 }
 0xc41   : > { %v2080_v14 = vpop.f32.mrb[16].mxu0 }
 0xc42   : > { %v1412_v11 = vsel %vm513_vm6, -1e+30, %v2080_v14  ;;  %v1395_v15 = vpop.f32.mrb[17].mxu0 }
 0xc43   : > { %v1420_v16 = vsel %vm346_vm0, %v1412_v11, -inf  ;;  %v1410_v63 = vsel %vm511_vm3, -1e+30, %v1395_v15  ;;  %v2081_v6 = vpop.f32.mrb[18].mxu0 }
 0xc44   : > { %1421 = vmax.xlane.f32.xlu0 %v1420_v16  ;;  %v1398_v10 = vpop.f32.mrb[19].mxu0  ;;  %v1414_v17 = vsel %vm346_vm0, %v1410_v63, -inf  ;;  %v1413_v20 = vsel %vm514_vm4, -1e+30, %v2081_v6 }
 0xc45   : > { %v1423_v38 = vsel %vm346_vm0, %v1413_v20, -inf  ;;  %v1411_v22 = vsel %vm512_vm5, -1e+30, %v1398_v10 }
 0xc46   : > { %v1417_v34 = vsel %vm346_vm0, %v1411_v22, -inf }
 0xc48   : > { %1415 = vmax.xlane.f32.xlu0 %v1414_v17 }
 0xc4c   : > { %1424 = vmax.xlane.f32.xlu0 %v1423_v38 }
 0xc5c   : > { %1418 = vmax.xlane.f32.xlu1 %v1417_v34 }
 0xc62   : > { %1324 = vrot.lane.b32.xlu0 %v1305_v62, %s2988_s16 }
 0xc6d   : > { %1330 = vrot.lane.b32.xlu1 %v2073_v12, %s2988_s16 }
 0xca6   : > { %v1327_v24 = vpop.permute.xlu1 %1326 }
 0xca7   : > { %1338 = vst.msk [vmem:[#allocation2 + $0x8] sm:$0xff] %vm1336_vm2, %v1327_v24 }
 0xcaa   : > { %v1329_v18 = vpop.permute.xlu1 %1328 }
 0xcab   : > { %1339 = vst.msk [vmem:[#allocation2 + $0x10] sm:$0xff] %vm1336_vm2, %v1329_v18 }
 0xcd1   : > { %v1422_v36 = vpop.xlane.xlu0 %1421 }
 0xcd2   : > { %v1428_v19 = vsub.f32 %v1412_v11, %v1422_v36 }
 0xcd4   : > { %v1434_v21 = vmul.f32 1.442695, %v1428_v19 }
 0xcd5   : > { %v1416_v25 = vpop.xlane.xlu0 %1415 }
 0xcd6   : > { %2533 = vpow2.f32 %v1434_v21  ;;  %v1426_v32 = vsub.f32 %v1410_v63, %v1416_v25 }
 0xcd8   : > { %v1430_v35 = vmul.f32 1.442695, %v1426_v32 }
 0xcd9   : > { %v1425_v37 = vpop.xlane.xlu0 %1424 }
 0xcda   : > { %2535 = vpow2.f32 %v1430_v35  ;;  %v1429_v33 = vsub.f32 %v1413_v20, %v1425_v37 }
 0xcdc   : > { %v1436_v39 = vmul.f32 1.442695, %v1429_v33 }
 0xcdd   : > { %v1325_v40 = vpop.permute.xlu0 %1324 }
 0xcde   : > { %2537 = vpow2.f32 %v1436_v39  ;;  %1337 = vst.msk [vmem:[#allocation2] sm:$0xff] %vm1336_vm2, %v1325_v40 }
 0xce0   : > { %v3687_v29 = vpop.eup %2533 }
 0xce4   : > { %v3689_v42 = vpop.eup %2535 }
 0xce8   : > { %v3691_v43 = vpop.eup %2537 }
 0xce9   : > { %v1419_v30 = vpop.xlane.xlu1 %1418 }
 0xcea   : > { %v1427_v31 = vsub.f32 %v1411_v22, %v1419_v30 }
 0xcec   : > { %v1432_v41 = vmul.f32 1.442695, %v1427_v31 }
 0xced   : > { %v1331_v44 = vpop.permute.xlu1 %1330 }
 0xcee   : > { %2539 = vpow2.f32 %v1432_v41  ;;  %1340 = vst.msk [vmem:[#allocation2 + $0x18] sm:$0xff] %vm1336_vm2, %v1331_v44 }
 0xcf8   : > { %v3694_v45 = vpop.eup %2539 }
 0xcf9 LB: >> { %v1452_v52 = vadd.f32 %v2945_v49, %v2961_v51  ;;  %v1454_v53 = vadd.f32 %v2937_v47, %v2953_v28  ;;  %v1453_v55 = vadd.f32 %v2941_v48, %v2957_v27  ;;  %v1455_v59 = vadd.f32 %v2933_v46, %v2949_v50  ;;  %s1443_s22 = sadd.s32 1, %s2965_s22   ;;  %s2965_s22 = sphi %s3712_s22, %s1443_s22   ;;  %v2961_v51 = vphi %v3710_v51, %v3894_v51   ;;  %v2957_v27 = vphi %v3708_v27, %v3893_v27   ;;  %v2953_v28 = vphi %v3706_v28, %v3892_v28   ;;  %v2949_v50 = vphi %v3704_v50, %v3891_v50   ;;  %v2945_v49 = vphi %v3702_v49, %v1492_v49   ;;  %v2941_v48 = vphi %v3700_v48, %v1493_v48   ;;  %v2937_v47 = vphi %v3698_v47, %v1494_v47   ;;  %v2933_v46 = vphi %v3696_v46, %v1495_v46  }
 0xcfa   : >> { %v2989_v60 = vmov 0.0   ;;  %p1440_p10 = scmp.ge.s32.totalorder %s1443_s22, 30  }
 0xcfb   : >> { %v1456_v54 = vmul.f32 0.5, %v1452_v52  ;;  %v1458_v56 = vmul.f32 0.5, %v1454_v53  ;;  %v1457_v58 = vmul.f32 0.5, %v1453_v55  ;;  %v1459_v12 = vmul.f32 0.5, %v1455_v59  ;;  %s2990_s20 = smov (%p1440_p10), 40   ;;  %s2991_s26 = smov (%p1440_p10), 24  }
 0xcfc   : > { %v1506_v24 = vmul.f32 (%p1440_p10), 1.2, %v3687_v29  ;;  %v1504_v18 = vmul.f32 (%p1440_p10), 1.2, %v3689_v42  ;;  %v1507_v36 = vmul.f32 (%p1440_p10), 1.2, %v3691_v43 }
 0xcfd   : >> { %vm1460_vm3 = vcmp.ge.f32.partialorder %v3689_v42, %v1456_v54  ;;  %vm1462_vm4 = vcmp.ge.f32.partialorder %v3687_v29, %v1458_v56  ;;  %vm1461_vm5 = vcmp.ge.f32.partialorder %v3694_v45, %v1457_v58  ;;  %vm1463_vm6 = vcmp.ge.f32.partialorder %v3691_v43, %v1459_v12  ;;  %s1977_s13 = sshll.u32 (%p1440_p10), %s3060_s9, 9  ;;  %s1717_s18 = sshll.u32 (%p1440_p10), %s3318_s11, 4  ;;  %s3804_s18 = int_to_ptr.vmem [resolvable:$true] %s1717_s18 }
 0xcfe   : >> { %v1960_v0 = vsel %vm1460_vm3, 1.0, %v2989_v60  ;;  %v1962_v62 = vsel %vm1462_vm4, 1.0, %v2989_v60  ;;  %v1961_v14 = vsel %vm1461_vm5, 1.0, %v2989_v60  ;;  %v1963_v15 = vsel %vm1463_vm6, 1.0, %v2989_v60  ;;  %s3799_s17 = scalar_lea.hbm (%p1440_p10), %s3861_s8, %s1977_s13  ;;  %s1704_s9 = scalar_lea.sflag (%p1440_p10), [#allocation5], %s3178_s10 }
 0xcff   : >> { %v1472_v61 = vsel %vm346_vm0, %v1960_v0, 0.0  ;;  %v1478_v13 = vsel %vm346_vm0, %v1962_v62, 0.0  ;;  %v1475_v11 = vsel %vm346_vm0, %v1961_v14, 0.0  ;;  %v1481_v16 = vsel %vm346_vm0, %v1963_v15, 0.0  ;;  %s2607_s16 = scalar_lea.vmem (%p1440_p10), %s3804_s18, 512  ;;  %s2992_s22 = smov (%p1440_p10), [#allocation8]  }
 0xd00   : >> { %1473 = vadd.xlane.f32.xlu0 %v1472_v61  ;;  %1479 = vadd.xlane.f32.xlu1 %v1478_v13  ;;  %v1505_v19 = vmul.f32 (%p1440_p10), 1.2, %v3694_v45  ;;  %v1966_v61 = vld [vmem:[%s3860_s7] ss:$0 sm:$0xff] (%p1440_p10)  ;;  %p2608_p13 = scmp.ne.s32.totalorder (%p1440_p10), %s3804_s18, %s2607_s16 }
 0xd02   : > { %p2609_p3 = pnand (%p1440_p10), %p2608_p13, %p3130_p12 }
 0xd04   : >> { %1476 = vadd.xlane.f32.xlu0 %v1475_v11  ;;  %1482 = vadd.xlane.f32.xlu1 %v1481_v16  ;;  %p2610_p7 = pneg (%p1440_p10), %p2609_p3 }
 0xd8d   : >> { %v1474_v63 = vpop.xlane.xlu0 %1473  ;;  %v1480_v6 = vpop.xlane.xlu1 %1479 }
 0xd8e   : >> { %vm1484_vm11 = vcmp.ge.f32.partialorder %v1474_v63, 2.0  ;;  %vm1486_vm12 = vcmp.ge.f32.partialorder %v1480_v6, 2.0  ;;  %1442 = sbr.rel (!%p1440_p10) target bundleno = 3321 (0xcf9), region = 162 }
 0xd8f   : >> { %v1488_v10 = vsel %vm1484_vm11, %v1456_v54, %v2961_v51   ;;  %v1492_v49 = vsel %vm1484_vm11, %v2945_v49, %v1456_v54   ;;  %v1490_v17 = vsel %vm1486_vm12, %v1458_v56, %v2953_v28   ;;  %v1494_v47 = vsel %vm1486_vm12, %v2937_v47, %v1458_v56  }
 0xd90   : >> { %v3892_v28 = vmov %v1490_v17  ;;  %v3894_v51 = vmov %v1488_v10  ;;  %vm1498_vm15 = vcmp.ge.f32.partialorder (%p1440_p10), %v3687_v29, %v1490_v17  ;;  %vm1496_vm7 = vcmp.ge.f32.partialorder (%p1440_p10), %v3689_v42, %v1488_v10 }
 0xd91   : >> { %v1477_v20 = vpop.xlane.xlu0 %1476  ;;  %v1483_v38 = vpop.xlane.xlu1 %1482  ;;  %vm1502_vm9 = vmor (%p1440_p10), %vm689_vm8, %vm1498_vm15  ;;  %v1967_v28 = vcombine.low (%p1440_p10), %v3200_v1, %v3205_v2 }
 0xd92   : >> { %vm1485_vm13 = vcmp.ge.f32.partialorder %v1477_v20, 2.0  ;;  %vm1487_vm14 = vcmp.ge.f32.partialorder %v1483_v38, 2.0  ;;  %v1510_v21 = vsel (%p1440_p10), %vm1502_vm9, %v1506_v24, %v3687_v29  ;;  %vm1500_vm2 = vmor (%p1440_p10), %vm689_vm8, %vm1496_vm7 }
 0xd93   : >> { %v1489_v22 = vsel %vm1485_vm13, %v1457_v58, %v2957_v27   ;;  %v1493_v48 = vsel %vm1485_vm13, %v2941_v48, %v1457_v58   ;;  %v1491_v34 = vsel %vm1487_vm14, %v1459_v12, %v2949_v50   ;;  %v1495_v46 = vsel %vm1487_vm14, %v2933_v46, %v1459_v12  }
 0xd94   : >> { %v3891_v50 = vmov %v1491_v34  ;;  %v3893_v27 = vmov %v1489_v22  ;;  %vm1499_vm10 = vcmp.ge.f32.partialorder (%p1440_p10), %v3691_v43, %v1491_v34  ;;  %vm1497_vm1 = vcmp.ge.f32.partialorder (%p1440_p10), %v3694_v45, %v1489_v22 }
 0xd95   : > { %v1518_v25 = vsel %vm346_vm0, %v1510_v21, 0.0  ;;  %v1508_v32 = vsel %vm1500_vm2, %v1504_v18, %v3689_v42  ;;  %vm1503_vm3 = vmor %vm689_vm8, %vm1499_vm10  ;;  %v1968_v27 = vcombine.low %v3211_v3, %v3216_v4 }
 0xd96   : > { %1519 = vadd.xlane.f32.xlu1 %v1518_v25  ;;  %v1512_v35 = vsel %vm346_vm0, %v1508_v32, 0.0  ;;  %v1511_v37 = vsel %vm1503_vm3, %v1507_v36, %v3691_v43  ;;  %vm1501_vm4 = vmor %vm689_vm8, %vm1497_vm1  ;;  %vm1611_vm8 = vcmask 261312  }
 0xd97   : > { %1513 = vadd.xlane.f32.xlu0 %v1512_v35  ;;  %v1521_v33 = vsel %vm346_vm0, %v1511_v37, 0.0  ;;  %v1509_v39 = vsel %vm1501_vm4, %v1505_v19, %v3694_v45 }
 0xd98   : > { %v1515_v40 = vsel %vm346_vm0, %v1509_v39, 0.0 }
 0xd9a   : > { %1522 = vadd.xlane.f32.xlu1 %v1521_v33 }
 0xd9b   : > { %1516 = vadd.xlane.f32.xlu0 %v1515_v40 }
 0xdab   : > { %1536 = vrot.lane.b32.xlu1 %v3253_v23, %s2990_s20 }
 0xdb1   : > { %1534 = vrot.lane.b32.xlu0 %v3255_v26, %s2990_s20  ;;  %s2611_s20 = sshll.u32 %s2992_s22, 4  ;;  %s2612_s20 = int_to_ptr.vmem [resolvable:$false] %s2611_s20 }
 0xdb2   : > { %p2614_p9 = scmp.lt.s32.totalorder %s3804_s18, %s2612_s20 }
 0xe23   : > { %v1520_v29 = vpop.xlane.xlu1 %1519 }
 0xe24   : > { %v1514_v42 = vpop.xlane.xlu0 %1513  ;;  %2541 = vrcp.f32 %v1520_v29 }
 0xe25   : > { %2543 = vrcp.f32 %v1514_v42 }
 0xe27   : > { %v1523_v57 = vpop.xlane.xlu1 %1522 }
 0xe28   : > { %2545 = vrcp.f32 %v1523_v57  ;;  %v1517_v43 = vpop.xlane.xlu0 %1516 }
 0xe29   : > { %2547 = vrcp.f32 %v1517_v43 }
 0xe2b   : > { %v1537_v31 = vpop.permute.xlu1 %1536 }
 0xe2c   : > { %v1535_v30 = vpop.permute.xlu0 %1534 }
 0xe2d   : > { %2082 = vmatprep.subr.bf16.mxu1 %v1535_v30 }
 0xe2e   : > { %2083 = vmatpush3.bf16.msra.mxu1 %v1535_v30  ;;  %v2542_v41 = vpop.eup %2541 }
 0xe2f   : > { %2084 = vmatprep.subr.bf16.mxu1 %v1537_v31  ;;  %v2544_v44 = vpop.eup %2543  ;;  %v1530_v46 = vmul.f32 %v2542_v41, %v1510_v21 }
 0xe30   : > { %v1528_v47 = vmul.f32 %v2544_v44, %v1508_v32 }
 0xe32   : > { %v2546_v45 = vpop.eup %2545  ;;  %2085 = vmatpush3.bf16.msra.mxu1 %v1537_v31 }
 0xe33   : > { %v2548_v23 = vpop.eup %2547  ;;  %v1531_v26 = vmul.f32 %v2546_v45, %v1511_v37  ;;  %2090 = vmatprep.subr.bf16.mxu1 %v1967_v28 }
 0xe34   : > { %v1529_v48 = vmul.f32 %v2548_v23, %v1509_v39 }
 0xe35   : > { %v1533_v49 = vpack.c.bf16 %v1531_v26, %v1530_v46 }
 0xe36   : > { %v1532_v50 = vpack.c.bf16 %v1529_v48, %v1528_v47 }
 0xe38   : > { %2086 = vmatprep.mubr.msk.bf16.mxu1 %vm346_vm0, %v1532_v50 }
 0xe39   : > { %2087 = vmatmul.mubr.msk.bf16.vlgmr.msra.gmra.mrb[12].mxu1 %vm346_vm0, %v1533_v49 }
 0xe3a   : > { %2091 = vmatpush3.bf16.msra.mxu1 %v1967_v28 }
 0xe3b   : > { %2092 = vmatprep.subr.bf16.mxu1 %v1968_v27 }
 0xe3e   : > { %2093 = vmatpush3.bf16.msra.mxu1 %v1968_v27 }
 0xf0c   : > { %v2088_v51 = vpop.f32.mrb[12].mxu1 }
 0xf0d   : > { %1603 = vrot.lane.b32.xlu0 %v2088_v51, %s2991_s26  ;;  %v1580_v52 = vpop.f32.mrb[13].mxu1 }
 0xf0e   : > { %1599 = vrot.lane.b32.xlu1 %v1580_v52, %s2991_s26  ;;  %v2089_v53 = vpop.f32.mrb[14].mxu1 }
 0xf0f   : > { %v1583_v54 = vpop.f32.mrb[15].mxu1 }
 0xf12   : > { %1601 = vrot.lane.b32.xlu1 %v1583_v54, %s2991_s26 }
 0xf16   : > { %1605 = vrot.lane.b32.xlu1 %v2089_v53, %s2991_s26  ;;  %s2613_s26 = scalar_lea.vmem %s2612_s20, 1024 }
 0xf17   : > { %p2615_p2 = scmp.lt.s32.totalorder %s2613_s26, %s2607_s16 }
 0xf19   : > { %p2616_p0 = por %p2615_p2, %p2614_p9 }
 0xf1b   : > { %p2617_p5 = pnand %p2616_p0, %p2610_p7 }
 0xf7f   : > { %v1604_v55 = vpop.permute.xlu0 %1603 }
 0xf80   : > { %1614 = vst.msk [vmem:[#allocation2 + $0x10] sm:$0xff] %vm1611_vm8, %v1604_v55  ;;  %v1600_v1 = vpop.permute.xlu1 %1599 }
 0xf81   : > { %1612 = vst.msk [vmem:[#allocation2] sm:$0xff] %vm1611_vm8, %v1600_v1 }
 0xf84   : > { %v1602_v2 = vpop.permute.xlu1 %1601 }
 0xf85   : > { %1613 = vst.msk [vmem:[#allocation2 + $0x8] sm:$0xff] %vm1611_vm8, %v1602_v2 }
 0xf87   : > { %v1618_v59 = vld [vmem:[#allocation2 + $0x10] sm:$0xff] }
 0xf88   : > { %v1606_v3 = vpop.permute.xlu1 %1605  ;;  %v1616_v4 = vld [vmem:[#allocation2] sm:$0xff] }
 0xf89   : > { %1615 = vst.msk [vmem:[#allocation2 + $0x18] sm:$0xff] %vm1611_vm8, %v1606_v3 }
 0xf8c   : > { %v1617_v56 = vld [vmem:[#allocation2 + $0x8] sm:$0xff] }
 0xf8d   : > { %v1620_v58 = vpack.c.bf16 %v1617_v56, %v1616_v4 }
 0xf8f   : > { %2094 = vmatprep.mubr.msk.bf16.mxu1 %vm346_vm0, %v1620_v58 }
 0xf90   : > { %v1619_v60 = vld [vmem:[#allocation2 + $0x18] sm:$0xff] }
 0xf91   : > { %v1621_v0 = vpack.c.bf16 %v1619_v60, %v1618_v59 }
 0xf93   : > { %2095 = vmatmul.mubr.msk.bf16.vlgmr.msra.gmra.mrb[16].mxu1 %vm346_vm0, %v1621_v0 }
0x1066   : > { %v2096_v62 = vpop.f32.mrb[16].mxu1 }
0x1067   : > { %v1689_v12 = vadd.f32 %v2096_v62, %v1966_v61  ;;  %v1680_v13 = vpop.f32.mrb[17].mxu1 }
0x1068   : > { %v1681_v14 = vadd.f32 %v1966_v61, %v1680_v13  ;;  %v2097_v11 = vpop.f32.mrb[18].mxu1 }
0x1069   : > { %v1697_v15 = vadd.f32 %v1689_v12, %v3222_v7  ;;  %v1692_v16 = vadd.f32 %v2097_v11, %v1966_v61  ;;  %v1683_v63 = vpop.f32.mrb[19].mxu1 }
0x106a   : > { %v1695_v6 = vadd.f32 %v1681_v14, %v3218_v5  ;;  %v1684_v10 = vadd.f32 %v1966_v61, %v1683_v63 }
0x106b   : > { %1701 = vst.msk [vmem:[%s3318_s11 + $0x10] sm:$0xff] %vm346_vm0, %v1697_v15  ;;  %v1698_v17 = vadd.f32 %v1692_v16, %v3226_v9 }
0x106c   : > { %1699 = vst.msk [vmem:[%s3318_s11] sm:$0xff] %vm346_vm0, %v1695_v6  ;;  %v1696_v7 = vadd.f32 %v1684_v10, %v3224_v8 }
0x106d   : > { %1702 = vst.msk [vmem:[%s3318_s11 + $0x18] sm:$0xff] %vm346_vm0, %v1698_v17 }
0x106e   : > { %1700 = vst.msk [vmem:[%s3318_s11 + $0x8] sm:$0xff] %vm346_vm0, %v1696_v7 }
0x106f   : > { %2620 = shalt.err (!%p2617_p5)
}
0x1070   : > { %s2621_s11 = scalar_lea.hbm %s3799_s17, 512  ;;  %s2625_s13 = scalar_lea.hbm %s3861_s8, 1024 }
0x1071   : > { %p2622_p11 = scmp.ne.s32.totalorder %s3799_s17, %s2621_s11  ;;  %p2626_p6 = scmp.lt.u32.totalorder %s3799_s17, %s3861_s8 }
0x1072   : > { %p2627_p8 = scmp.lt.u32.totalorder %s2625_s13, %s2621_s11  ;;  %p2629_p13 = scmp.lt.u32.totalorder %s2621_s11, %s3799_s17 }
0x1073   : > { %p2623_p1 = pnand %p2622_p11, %p3130_p12 }
0x1074   : > { %p2628_p10 = por %p2627_p8, %p2626_p6 }
0x1075   : > { %p2624_p4 = pneg %p2623_p1 }
0x1076   : > { %p2630_p3 = por %p2629_p13, %p2628_p10 }
0x1078   : > { %p2631_p7 = pnand %p2630_p3, %p2624_p4 }
0x107a   : > { %2634 = shalt.err (!%p2631_p7)
}
0x107b   : > { %s2993_s16 = smov 128  }
0x107c   : > { %2112 = dma.vmem_to_hbm [thread:$0]  (%p3130_p12), %s3804_s18, 512, %s3799_s17, %s1704_s9, %s2993_s16, %s2993_s16, %s2983_s21  }
0x107d PF: > { %s1732_s22 = sand.u32 1, %s2809_s27   ;;  %p3895_p9 = scmp.ne.s32.totalorder %s3868_s12, 0 }
0x107e   : > { %p3896_p2 = scmp.ge.s32.totalorder %s2821_s30, 2  ;;  %s1733_s20 = scalar_lea.sflag [#allocation5], %s1732_s22 }
0x1080   : > { %p2123_p0 = pnand %p3896_p2, %p3895_p9 }
0x1082   : > { %2804 = dma.done.wait (!%p2123_p0), %s1733_s20, 512  }
0x1083   : > { %2806 = vsyncadd (!%p2123_p0), %s1733_s20, 4294966784  ;;  %s3897_s30 = sld [smem:[#allocation12_spill]]  ;;  %s3898_s27 = smov %s2813_s28 }
0x1084   : > { %s3899_s28 = smov %s2817_s29  ;;  %s3900_s29 = smov %s3126_s23 }
0x1089   : > { %p22_p5 = scmp.ge.s32.totalorder %s3897_s30, 4  }
0x108b   :  { %24 = sbr.rel (!%p22_p5) target bundleno = 6 (0x6), region = 173 }
0x1092   :  { %1738 = vsyncpa [#allocation4], 1 }
0x1093   :  { %1740 = vsyncpa [#allocation4 + $0x1], 1 }
0x1094   :  { %1741 = vsyncpa [#allocation7], 1 }
0x1095   :  { %1742 = vsyncpa [#allocation5], 1 }
0x1096   :  { %1744 = vsyncpa [#allocation5 + $0x1], 1 }

</bundles_post_ra>
